<compile_context>
chip_gen: v6e
topology: v6e:2x2x1
jax: 0.10.0
libtpu: 0.0.40
codegen_flags: <defaults>
</compile_context>

<pallas_src>
import functools

import jax
import jax.numpy as jnp
from jax.experimental import pallas as pl
from jax.experimental.pallas import tpu as pltpu


def _round_up(x, m):
    return (x + m - 1) // m * m


# ----------------------------------------------------------------------------
# Pallas kernel 1: tiled matmul + bias (+ optional ReLU).
#   grid = (M_tiles,), x streams (TM, K) tiles, w/b stay resident in VMEM.
#   bf16 operands, f32 accumulation, f32 epilogue, cast on store.
# ----------------------------------------------------------------------------
def _mm_bias_act_kernel(x_ref, w_ref, b_ref, o_ref, *, relu):
    acc = jnp.dot(x_ref[...], w_ref[...], preferred_element_type=jnp.float32)
    acc = acc + b_ref[...]                      # (1, N) bias broadcasts over rows
    if relu:
        acc = jnp.maximum(acc, 0.0)
    o_ref[...] = acc.astype(o_ref.dtype)


def matmul_bias_act(x, w, b2d, *, relu, out_dtype=jnp.float32, max_tm=512):
    """x: (M, K) bf16, w: (K, N) bf16, b2d: (1, N) f32 -> (M, N) out_dtype."""
    M, K = x.shape
    K2, N = w.shape
    assert K == K2 and b2d.shape == (1, N)

    tm = min(max_tm, _round_up(M, 8))           # M-tile (multiple of 8 sublanes)
    m_pad = _round_up(M, tm)
    if m_pad != M:
        x = jnp.pad(x, ((0, m_pad - M), (0, 0)))

    out = pl.pallas_call(
        functools.partial(_mm_bias_act_kernel, relu=relu),
        out_shape=jax.ShapeDtypeStruct((m_pad, N), out_dtype),
        grid=(m_pad // tm,),
        in_specs=[
            pl.BlockSpec((tm, K), lambda i: (i, 0)),     # streamed activations
            pl.BlockSpec((K, N), lambda i: (0, 0)),      # resident weight
            pl.BlockSpec((1, N), lambda i: (0, 0)),      # resident bias
        ],
        out_specs=pl.BlockSpec((tm, N), lambda i: (i, 0)),
        compiler_params=pltpu.CompilerParams(
            dimension_semantics=("parallel",),           # megacore-split M on v7x
            vmem_limit_bytes=32 * 1024 * 1024,
        ),
    )(x, w, b2d)
    return out[:M] if m_pad != M else out


# ----------------------------------------------------------------------------
# Pallas kernel 2: fused FC head — fc1 + ReLU + fc2 in one call.
#   Both weight slabs are VMEM-resident; only x tiles stream.
# ----------------------------------------------------------------------------
def _head_kernel(x_ref, w1_ref, b1_ref, w2_ref, b2_ref, o_ref):
    h = jnp.dot(x_ref[...], w1_ref[...], preferred_element_type=jnp.float32)
    h = jnp.maximum(h + b1_ref[...], 0.0).astype(w2_ref.dtype)
    o = jnp.dot(h, w2_ref[...], preferred_element_type=jnp.float32) + b2_ref[...]
    o_ref[...] = o.astype(o_ref.dtype)


def fused_head(x, w1, b1, w2, b2, *, max_tm=512):
    """x: (M, K) bf16, w1: (K, H) bf16, w2: (H, A) bf16 -> (M, A) f32."""
    M, K = x.shape
    _, H = w1.shape
    _, A = w2.shape

    tm = min(max_tm, _round_up(M, 8))
    m_pad = _round_up(M, tm)
    if m_pad != M:
        x = jnp.pad(x, ((0, m_pad - M), (0, 0)))

    out = pl.pallas_call(
        _head_kernel,
        out_shape=jax.ShapeDtypeStruct((m_pad, A), jnp.float32),
        grid=(m_pad // tm,),
        in_specs=[
            pl.BlockSpec((tm, K), lambda i: (i, 0)),
            pl.BlockSpec((K, H), lambda i: (0, 0)),
            pl.BlockSpec((1, H), lambda i: (0, 0)),
            pl.BlockSpec((H, A), lambda i: (0, 0)),
            pl.BlockSpec((1, A), lambda i: (0, 0)),
        ],
        out_specs=pl.BlockSpec((tm, A), lambda i: (i, 0)),
        compiler_params=pltpu.CompilerParams(
            dimension_semantics=("parallel",),
            vmem_limit_bytes=32 * 1024 * 1024,
        ),
    )(x, w1, b1, w2, b2)
    return out[:M] if m_pad != M else out


# ----------------------------------------------------------------------------
# Conv2d (valid padding, stride s) via im2col (bf16 layout glue) + Pallas matmul.
# ----------------------------------------------------------------------------
def _im2col(x_nhwc, kh, kw, stride):
    N, H, W, C = x_nhwc.shape
    oh = (H - kh) // stride + 1
    ow = (W - kw) // stride + 1
    patches = []
    for i in range(kh):
        for j in range(kw):
            patches.append(
                jax.lax.slice(
                    x_nhwc,
                    (0, i, j, 0),
                    (N, i + (oh - 1) * stride + 1, j + (ow - 1) * stride + 1, C),
                    (1, stride, stride, 1),
                )
            )
    p = jnp.stack(patches, axis=3)                    # (N, oh, ow, kh*kw, C)
    return p.reshape(N * oh * ow, kh * kw * C), oh, ow


def conv2d_relu(x_nhwc, w2d, b2d, kh, kw, stride):
    """x: (N,H,W,C) bf16, w2d: (kh*kw*C, Cout) bf16, b2d: (1, Cout) f32."""
    N = x_nhwc.shape[0]
    cout = w2d.shape[1]
    p, oh, ow = _im2col(x_nhwc, kh, kw, stride)
    y = matmul_bias_act(p, w2d, b2d, relu=True, out_dtype=jnp.bfloat16)
    return y.reshape(N, oh, ow, cout)


# ----------------------------------------------------------------------------
# Parameter init (PyTorch-shaped f32 tensors, uniform(-1/sqrt(fan_in))).
# ----------------------------------------------------------------------------
def init_params(key, action_size, num_frames):
    in_ch = 3 * num_frames
    ks = jax.random.split(key, 10)

    def u(k, shape, fan_in):
        bound = 1.0 / float(fan_in) ** 0.5
        return jax.random.uniform(k, shape, jnp.float32, -bound, bound)

    return {
        "conv1_w": u(ks[0], (32, in_ch, 8, 8), in_ch * 8 * 8),
        "conv1_b": u(ks[1], (32,), in_ch * 8 * 8),
        "conv2_w": u(ks[2], (64, 32, 4, 4), 32 * 4 * 4),
        "conv2_b": u(ks[3], (64,), 32 * 4 * 4),
        "conv3_w": u(ks[4], (64, 64, 3, 3), 64 * 3 * 3),
        "conv3_b": u(ks[5], (64,), 64 * 3 * 3),
        "fc1_w": u(ks[6], (512, 64 * 7 * 7), 64 * 7 * 7),   # PyTorch Linear: (out, in)
        "fc1_b": u(ks[7], (512,), 64 * 7 * 7),
        "fc2_w": u(ks[8], (action_size, 512), 512),
        "fc2_b": u(ks[9], (action_size,), 512),
    }


# ----------------------------------------------------------------------------
# One-time parameter prep: reshape/permute/cast weights for the kernels so the
# forward pass pays no runtime transposes.
# ----------------------------------------------------------------------------
def prepare_params(params):
    def conv_prep(w_oihw, b):
        cout, cin, kh, kw = w_oihw.shape
        # K-axis order (kh, kw, Cin) matches the im2col patch ordering.
        w2d = jnp.transpose(w_oihw, (2, 3, 1, 0)).reshape(kh * kw * cin, cout)
        return w2d.astype(jnp.bfloat16), b.reshape(1, cout).astype(jnp.float32)

    p = {}
    p["conv1_w2d"], p["conv1_b"] = conv_prep(params["conv1_w"], params["conv1_b"])
    p["conv2_w2d"], p["conv2_b"] = conv_prep(params["conv2_w"], params["conv2_b"])
    p["conv3_w2d"], p["conv3_b"] = conv_prep(params["conv3_w"], params["conv3_b"])

    # fc1: PyTorch stores (512, 64*7*7) with the input axis in (c, h, w) order.
    # Re-permute the input axis to NHWC flatten order (h, w, c) so the conv3
    # output can be flattened directly (no NCHW transpose at runtime).
    fc1 = params["fc1_w"].reshape(512, 64, 7, 7)            # (o, c, h, w)
    p["fc1_w"] = (
        jnp.transpose(fc1, (2, 3, 1, 0)).reshape(7 * 7 * 64, 512).astype(jnp.bfloat16)
    )
    p["fc1_b"] = params["fc1_b"].reshape(1, 512).astype(jnp.float32)
    p["fc2_w"] = params["fc2_w"].T.astype(jnp.bfloat16)      # (512, action_size)
    p["fc2_b"] = params["fc2_b"].reshape(1, -1).astype(jnp.float32)
    return p


# ----------------------------------------------------------------------------
# Forward pass == QNetwork_CNN.forward (bf16 compute, f32 accumulation/output).
# ----------------------------------------------------------------------------
def qnetwork_cnn_forward(prep, state_nchw):
    # NCHW -> NHWC once, cast to bf16 for MXU-rate matmuls.
    x = jnp.transpose(state_nchw, (0, 2, 3, 1)).astype(jnp.bfloat16)

    x = conv2d_relu(x, prep["conv1_w2d"], prep["conv1_b"], 8, 8, 4)  # (N, 20, 20, 32)
    x = conv2d_relu(x, prep["conv2_w2d"], prep["conv2_b"], 4, 4, 2)  # (N,  9,  9, 64)
    x = conv2d_relu(x, prep["conv3_w2d"], prep["conv3_b"], 3, 3, 1)  # (N,  7,  7, 64)

    # NHWC flatten; fc1_w was pre-permuted to this order, so semantics match
    # PyTorch's x.view(-1, 64*7*7) on the NCHW tensor exactly.
    N = x.shape[0]
    x = x.reshape(N, 7 * 7 * 64)

    # Fused fc1 + ReLU + fc2 in a single Pallas call.
    return fused_head(x, prep["fc1_w"], prep["fc1_b"], prep["fc2_w"], prep["fc2_b"])


if __name__ == "__main__":
    # fc1 hardcodes 64*7*7, which forces 84x84 spatial input.
    batch, num_frames, action_size = 2, 1, 4
    in_ch = 3 * num_frames

    key = jax.random.PRNGKey(0)
    k_params, k_x = jax.random.split(key)
    params = init_params(k_params, action_size, num_frames)
    prep = prepare_params(params)
    state = jax.random.normal(k_x, (batch, in_ch, 84, 84), dtype=jnp.float32)

    fwd = jax.jit(qnetwork_cnn_forward)
    out = jax.block_until_ready(fwd(prep, state))
    assert out.shape == (batch, action_size), out.shape
    print("KERNEL_OK")
</pallas_src>

<mosaic_0001>
module attributes {stable_mosaic.version = 11 : i64} {
  func.func @_mm_bias_act_kernel(%arg0: i32, %arg1: memref<512x192xbf16, #tpu.memory_space<vmem>>, %arg2: memref<192x32xbf16, #tpu.memory_space<vmem>>, %arg3: memref<1x32xf32, #tpu.memory_space<vmem>>, %arg4: memref<512x32xbf16, #tpu.memory_space<vmem>>) attributes {dimension_semantics = [#tpu.dimension_semantics<parallel>], iteration_bounds = array<i64: 2>, scalar_prefetch = 0 : i64, scratch_operands = 0 : i64, tpu.core_type = #tpu.core_type<tc>, window_params = [{transform_indices = @transform_0, window_bounds = array<i64: 512, 192>}, {pipeline_mode = #tpu.pipeline_mode<synchronous>, transform_indices = @transform_1, window_bounds = array<i64: 192, 32>}, {pipeline_mode = #tpu.pipeline_mode<synchronous>, transform_indices = @transform_2, window_bounds = array<i64: 1, 32>}, {transform_indices = @transform_3, window_bounds = array<i64: 512, 32>}]} {
    %c0 = arith.constant 0 : index
    %c0_0 = arith.constant 0 : index
    %0 = vector.load %arg1[%c0, %c0_0] : memref<512x192xbf16, #tpu.memory_space<vmem>>, vector<512x192xbf16>
    %c0_1 = arith.constant 0 : index
    %c0_2 = arith.constant 0 : index
    %1 = vector.load %arg2[%c0_1, %c0_2] : memref<192x32xbf16, #tpu.memory_space<vmem>>, vector<192x32xbf16>
    %cst = arith.constant dense<0.000000e+00> : vector<512x32xf32>
    %2 = tpu.matmul %0, %1, %cst {dimension_numbers = #tpu.dot_dimension_numbers<[1], [0], [0], [1], [0, 0, 1, 1], [], []>} : vector<512x192xbf16>, vector<192x32xbf16>, vector<512x32xf32> -> vector<512x32xf32>
    %c0_3 = arith.constant 0 : index
    %c0_4 = arith.constant 0 : index
    %3 = vector.load %arg3[%c0_3, %c0_4] : memref<1x32xf32, #tpu.memory_space<vmem>>, vector<1x32xf32>
    %4 = vector.broadcast %3 : vector<1x32xf32> to vector<512x32xf32>
    %5 = arith.addf %2, %4 : vector<512x32xf32>
    %cst_5 = arith.constant 0.000000e+00 : f32
    %6 = vector.broadcast %cst_5 : f32 to vector<512x32xf32>
    %7 = arith.maximumf %5, %6 : vector<512x32xf32>
    %8 = arith.truncf %7 : vector<512x32xf32> to vector<512x32xbf16>
    %c0_6 = arith.constant 0 : index
    %c0_7 = arith.constant 0 : index
    %9 = vector.load %arg4[%c0_6, %c0_7] : memref<512x32xbf16, #tpu.memory_space<vmem>>, vector<512x32xbf16>
    tpu.vector_store %arg4[%c0_6, %c0_7], %8 {strides = array<i32>} : memref<512x32xbf16, #tpu.memory_space<vmem>>, vector<512x32xbf16>,
    return
  }
  func.func @transform_0(%arg0: i32) -> (i32, i32) {
    %c0_i32 = arith.constant 0 : i32
    %c0_i32_0 = arith.constant 0 : i32
    return %arg0, %c0_i32 : i32, i32
  }
  func.func @transform_1(%arg0: i32) -> (i32, i32) {
    %c0_i32 = arith.constant 0 : i32
    %c0_i32_0 = arith.constant 0 : i32
    %c0_i32_1 = arith.constant 0 : i32
    return %c0_i32, %c0_i32_0 : i32, i32
  }
  func.func @transform_2(%arg0: i32) -> (i32, i32) {
    %c0_i32 = arith.constant 0 : i32
    %c0_i32_0 = arith.constant 0 : i32
    %c0_i32_1 = arith.constant 0 : i32
    return %c0_i32, %c0_i32_0 : i32, i32
  }
  func.func @transform_3(%arg0: i32) -> (i32, i32) {
    %c0_i32 = arith.constant 0 : i32
    %c0_i32_0 = arith.constant 0 : i32
    return %arg0, %c0_i32 : i32, i32
  }
}

module attributes {stable_mosaic.version = 11 : i64} {
  func.func @_mm_bias_act_kernel(%arg0: i32, %arg1: memref<168x512xbf16, #tpu.memory_space<vmem>>, %arg2: memref<512x64xbf16, #tpu.memory_space<vmem>>, %arg3: memref<1x64xf32, #tpu.memory_space<vmem>>, %arg4: memref<168x64xbf16, #tpu.memory_space<vmem>>) attributes {dimension_semantics = [#tpu.dimension_semantics<parallel>], iteration_bounds = array<i64: 1>, scalar_prefetch = 0 : i64, scratch_operands = 0 : i64, tpu.core_type = #tpu.core_type<tc>, window_params = [{transform_indices = @transform_0, window_bounds = array<i64: 168, 512>}, {pipeline_mode = #tpu.pipeline_mode<synchronous>, transform_indices = @transform_1, window_bounds = array<i64: 512, 64>}, {pipeline_mode = #tpu.pipeline_mode<synchronous>, transform_indices = @transform_2, window_bounds = array<i64: 1, 64>}, {transform_indices = @transform_3, window_bounds = array<i64: 168, 64>}]} {
    %c0 = arith.constant 0 : index
    %c0_0 = arith.constant 0 : index
    %0 = vector.load %arg1[%c0, %c0_0] : memref<168x512xbf16, #tpu.memory_space<vmem>>, vector<168x512xbf16>
    %c0_1 = arith.constant 0 : index
    %c0_2 = arith.constant 0 : index
    %1 = vector.load %arg2[%c0_1, %c0_2] : memref<512x64xbf16, #tpu.memory_space<vmem>>, vector<512x64xbf16>
    %cst = arith.constant dense<0.000000e+00> : vector<168x64xf32>
    %2 = tpu.matmul %0, %1, %cst {dimension_numbers = #tpu.dot_dimension_numbers<[1], [0], [0], [1], [0, 0, 1, 1], [], []>} : vector<168x512xbf16>, vector<512x64xbf16>, vector<168x64xf32> -> vector<168x64xf32>
    %c0_3 = arith.constant 0 : index
    %c0_4 = arith.constant 0 : index
    %3 = vector.load %arg3[%c0_3, %c0_4] : memref<1x64xf32, #tpu.memory_space<vmem>>, vector<1x64xf32>
    %4 = vector.broadcast %3 : vector<1x64xf32> to vector<168x64xf32>
    %5 = arith.addf %2, %4 : vector<168x64xf32>
    %cst_5 = arith.constant 0.000000e+00 : f32
    %6 = vector.broadcast %cst_5 : f32 to vector<168x64xf32>
    %7 = arith.maximumf %5, %6 : vector<168x64xf32>
    %8 = arith.truncf %7 : vector<168x64xf32> to vector<168x64xbf16>
    %c0_6 = arith.constant 0 : index
    %c0_7 = arith.constant 0 : index
    %9 = vector.load %arg4[%c0_6, %c0_7] : memref<168x64xbf16, #tpu.memory_space<vmem>>, vector<168x64xbf16>
    tpu.vector_store %arg4[%c0_6, %c0_7], %8 {strides = array<i32>} : memref<168x64xbf16, #tpu.memory_space<vmem>>, vector<168x64xbf16>,
    return
  }
  func.func @transform_0(%arg0: i32) -> (i32, i32) {
    %c0_i32 = arith.constant 0 : i32
    %c0_i32_0 = arith.constant 0 : i32
    return %arg0, %c0_i32 : i32, i32
  }
  func.func @transform_1(%arg0: i32) -> (i32, i32) {
    %c0_i32 = arith.constant 0 : i32
    %c0_i32_0 = arith.constant 0 : i32
    %c0_i32_1 = arith.constant 0 : i32
    return %c0_i32, %c0_i32_0 : i32, i32
  }
  func.func @transform_2(%arg0: i32) -> (i32, i32) {
    %c0_i32 = arith.constant 0 : i32
    %c0_i32_0 = arith.constant 0 : i32
    %c0_i32_1 = arith.constant 0 : i32
    return %c0_i32, %c0_i32_0 : i32, i32
  }
  func.func @transform_3(%arg0: i32) -> (i32, i32) {
    %c0_i32 = arith.constant 0 : i32
    %c0_i32_0 = arith.constant 0 : i32
    return %arg0, %c0_i32 : i32, i32
  }
}

module attributes {stable_mosaic.version = 11 : i64} {
  func.func @_mm_bias_act_kernel(%arg0: i32, %arg1: memref<104x576xbf16, #tpu.memory_space<vmem>>, %arg2: memref<576x64xbf16, #tpu.memory_space<vmem>>, %arg3: memref<1x64xf32, #tpu.memory_space<vmem>>, %arg4: memref<104x64xbf16, #tpu.memory_space<vmem>>) attributes {dimension_semantics = [#tpu.dimension_semantics<parallel>], iteration_bounds = array<i64: 1>, scalar_prefetch = 0 : i64, scratch_operands = 0 : i64, tpu.core_type = #tpu.core_type<tc>, window_params = [{transform_indices = @transform_0, window_bounds = array<i64: 104, 576>}, {pipeline_mode = #tpu.pipeline_mode<synchronous>, transform_indices = @transform_1, window_bounds = array<i64: 576, 64>}, {pipeline_mode = #tpu.pipeline_mode<synchronous>, transform_indices = @transform_2, window_bounds = array<i64: 1, 64>}, {transform_indices = @transform_3, window_bounds = array<i64: 104, 64>}]} {
    %c0 = arith.constant 0 : index
    %c0_0 = arith.constant 0 : index
    %0 = vector.load %arg1[%c0, %c0_0] : memref<104x576xbf16, #tpu.memory_space<vmem>>, vector<104x576xbf16>
    %c0_1 = arith.constant 0 : index
    %c0_2 = arith.constant 0 : index
    %1 = vector.load %arg2[%c0_1, %c0_2] : memref<576x64xbf16, #tpu.memory_space<vmem>>, vector<576x64xbf16>
    %cst = arith.constant dense<0.000000e+00> : vector<104x64xf32>
    %2 = tpu.matmul %0, %1, %cst {dimension_numbers = #tpu.dot_dimension_numbers<[1], [0], [0], [1], [0, 0, 1, 1], [], []>} : vector<104x576xbf16>, vector<576x64xbf16>, vector<104x64xf32> -> vector<104x64xf32>
    %c0_3 = arith.constant 0 : index
    %c0_4 = arith.constant 0 : index
    %3 = vector.load %arg3[%c0_3, %c0_4] : memref<1x64xf32, #tpu.memory_space<vmem>>, vector<1x64xf32>
    %4 = vector.broadcast %3 : vector<1x64xf32> to vector<104x64xf32>
    %5 = arith.addf %2, %4 : vector<104x64xf32>
    %cst_5 = arith.constant 0.000000e+00 : f32
    %6 = vector.broadcast %cst_5 : f32 to vector<104x64xf32>
    %7 = arith.maximumf %5, %6 : vector<104x64xf32>
    %8 = arith.truncf %7 : vector<104x64xf32> to vector<104x64xbf16>
    %c0_6 = arith.constant 0 : index
    %c0_7 = arith.constant 0 : index
    %9 = vector.load %arg4[%c0_6, %c0_7] : memref<104x64xbf16, #tpu.memory_space<vmem>>, vector<104x64xbf16>
    tpu.vector_store %arg4[%c0_6, %c0_7], %8 {strides = array<i32>} : memref<104x64xbf16, #tpu.memory_space<vmem>>, vector<104x64xbf16>,
    return
  }
  func.func @transform_0(%arg0: i32) -> (i32, i32) {
    %c0_i32 = arith.constant 0 : i32
    %c0_i32_0 = arith.constant 0 : i32
    return %arg0, %c0_i32 : i32, i32
  }
  func.func @transform_1(%arg0: i32) -> (i32, i32) {
    %c0_i32 = arith.constant 0 : i32
    %c0_i32_0 = arith.constant 0 : i32
    %c0_i32_1 = arith.constant 0 : i32
    return %c0_i32, %c0_i32_0 : i32, i32
  }
  func.func @transform_2(%arg0: i32) -> (i32, i32) {
    %c0_i32 = arith.constant 0 : i32
    %c0_i32_0 = arith.constant 0 : i32
    %c0_i32_1 = arith.constant 0 : i32
    return %c0_i32, %c0_i32_0 : i32, i32
  }
  func.func @transform_3(%arg0: i32) -> (i32, i32) {
    %c0_i32 = arith.constant 0 : i32
    %c0_i32_0 = arith.constant 0 : i32
    return %arg0, %c0_i32 : i32, i32
  }
}

module attributes {stable_mosaic.version = 11 : i64} {
  func.func @_head_kernel(%arg0: i32, %arg1: memref<8x3136xbf16, #tpu.memory_space<vmem>>, %arg2: memref<3136x512xbf16, #tpu.memory_space<vmem>>, %arg3: memref<1x512xf32, #tpu.memory_space<vmem>>, %arg4: memref<512x4xbf16, #tpu.memory_space<vmem>>, %arg5: memref<1x4xf32, #tpu.memory_space<vmem>>, %arg6: memref<8x4xf32, #tpu.memory_space<vmem>>) attributes {dimension_semantics = [#tpu.dimension_semantics<parallel>], iteration_bounds = array<i64: 1>, scalar_prefetch = 0 : i64, scratch_operands = 0 : i64, tpu.core_type = #tpu.core_type<tc>, window_params = [{transform_indices = @transform_0, window_bounds = array<i64: 8, 3136>}, {pipeline_mode = #tpu.pipeline_mode<synchronous>, transform_indices = @transform_1, window_bounds = array<i64: 3136, 512>}, {pipeline_mode = #tpu.pipeline_mode<synchronous>, transform_indices = @transform_2, window_bounds = array<i64: 1, 512>}, {pipeline_mode = #tpu.pipeline_mode<synchronous>, transform_indices = @transform_3, window_bounds = array<i64: 512, 4>}, {pipeline_mode = #tpu.pipeline_mode<synchronous>, transform_indices = @transform_4, window_bounds = array<i64: 1, 4>}, {transform_indices = @transform_5, window_bounds = array<i64: 8, 4>}]} {
    %c0 = arith.constant 0 : index
    %c0_0 = arith.constant 0 : index
    %0 = vector.load %arg1[%c0, %c0_0] : memref<8x3136xbf16, #tpu.memory_space<vmem>>, vector<8x3136xbf16>
    %c0_1 = arith.constant 0 : index
    %c0_2 = arith.constant 0 : index
    %1 = vector.load %arg2[%c0_1, %c0_2] : memref<3136x512xbf16, #tpu.memory_space<vmem>>, vector<3136x512xbf16>
    %cst = arith.constant dense<0.000000e+00> : vector<8x512xf32>
    %2 = tpu.matmul %0, %1, %cst {dimension_numbers = #tpu.dot_dimension_numbers<[1], [0], [0], [1], [0, 0, 1, 1], [], []>} : vector<8x3136xbf16>, vector<3136x512xbf16>, vector<8x512xf32> -> vector<8x512xf32>
    %c0_3 = arith.constant 0 : index
    %c0_4 = arith.constant 0 : index
    %3 = vector.load %arg3[%c0_3, %c0_4] : memref<1x512xf32, #tpu.memory_space<vmem>>, vector<1x512xf32>
    %4 = vector.broadcast %3 : vector<1x512xf32> to vector<8x512xf32>
    %5 = arith.addf %2, %4 : vector<8x512xf32>
    %cst_5 = arith.constant 0.000000e+00 : f32
    %6 = vector.broadcast %cst_5 : f32 to vector<8x512xf32>
    %7 = arith.maximumf %5, %6 : vector<8x512xf32>
    %8 = arith.truncf %7 : vector<8x512xf32> to vector<8x512xbf16>
    %c0_6 = arith.constant 0 : index
    %c0_7 = arith.constant 0 : index
    %9 = vector.load %arg4[%c0_6, %c0_7] : memref<512x4xbf16, #tpu.memory_space<vmem>>, vector<512x4xbf16>
    %cst_8 = arith.constant dense<0.000000e+00> : vector<8x4xf32>
    %10 = tpu.matmul %8, %9, %cst_8 {dimension_numbers = #tpu.dot_dimension_numbers<[1], [0], [0], [1], [0, 0, 1, 1], [], []>} : vector<8x512xbf16>, vector<512x4xbf16>, vector<8x4xf32> -> vector<8x4xf32>
    %c0_9 = arith.constant 0 : index
    %c0_10 = arith.constant 0 : index
    %11 = vector.load %arg5[%c0_9, %c0_10] : memref<1x4xf32, #tpu.memory_space<vmem>>, vector<1x4xf32>
    %12 = vector.broadcast %11 : vector<1x4xf32> to vector<8x4xf32>
    %13 = arith.addf %10, %12 : vector<8x4xf32>
    %c0_11 = arith.constant 0 : index
    %c0_12 = arith.constant 0 : index
    %14 = vector.load %arg6[%c0_11, %c0_12] : memref<8x4xf32, #tpu.memory_space<vmem>>, vector<8x4xf32>
    tpu.vector_store %arg6[%c0_11, %c0_12], %13 {strides = array<i32>} : memref<8x4xf32, #tpu.memory_space<vmem>>, vector<8x4xf32>,
    return
  }
  func.func @transform_0(%arg0: i32) -> (i32, i32) {
    %c0_i32 = arith.constant 0 : i32
    %c0_i32_0 = arith.constant 0 : i32
    return %arg0, %c0_i32 : i32, i32
  }
  func.func @transform_1(%arg0: i32) -> (i32, i32) {
    %c0_i32 = arith.constant 0 : i32
    %c0_i32_0 = arith.constant 0 : i32
    %c0_i32_1 = arith.constant 0 : i32
    return %c0_i32, %c0_i32_0 : i32, i32
  }
  func.func @transform_2(%arg0: i32) -> (i32, i32) {
    %c0_i32 = arith.constant 0 : i32
    %c0_i32_0 = arith.constant 0 : i32
    %c0_i32_1 = arith.constant 0 : i32
    return %c0_i32, %c0_i32_0 : i32, i32
  }
  func.func @transform_3(%arg0: i32) -> (i32, i32) {
    %c0_i32 = arith.constant 0 : i32
    %c0_i32_0 = arith.constant 0 : i32
    %c0_i32_1 = arith.constant 0 : i32
    return %c0_i32, %c0_i32_0 : i32, i32
  }
  func.func @transform_4(%arg0: i32) -> (i32, i32) {
    %c0_i32 = arith.constant 0 : i32
    %c0_i32_0 = arith.constant 0 : i32
    %c0_i32_1 = arith.constant 0 : i32
    return %c0_i32, %c0_i32_0 : i32, i32
  }
  func.func @transform_5(%arg0: i32) -> (i32, i32) {
    %c0_i32 = arith.constant 0 : i32
    %c0_i32_0 = arith.constant 0 : i32
    return %arg0, %c0_i32 : i32, i32
  }
}

</mosaic_0001>

<bundles_post_ra>
// kernel: qnetwork_cnn_forward.4
= control target key start
LH: loop header
LB: loop body
LE: loop exit
PB: predicated region body
PF: predicated region fallthrough
CT: control target
= control target key end

     0   :  { %s1880_s12 = smov 0   ;;  %s2258_s0 = inlined_call_operand.vmem [shape: bf16[1024,192], index: 0, kind: input, shape index: {}]   ;;  %s2259_s1 = inlined_call_operand.vmem [shape: bf16[192,32], index: 1, kind: input, shape index: {}]   ;;  %s2260_s2 = inlined_call_operand.vmem [shape: f32[1,32], index: 2, kind: input, shape index: {}]   ;;  %s2261_s3 = inlined_call_operand.vmem [shape: bf16[1024,32], index: 3, kind: output, shape index: {}]  }
   0x1 LB: > { %s1460_s13 = sadd.s32 4294967295, %s1857_s12   ;;  %p1464_p0 = scmp.ge.s32.totalorder %s1857_s12, 1  ;;  %s1857_s12 = sphi %s1880_s12, %s13_s12  }
   0x2   : > { %p139_p1 = scmp.lt.s32.totalorder %s1857_s12, 3 }
   0x4   : > { %p140_p2 = pnand %p1464_p0, %p139_p1 }
   0x5   : > { %s1465_s16 = sshll.u32 (!%p140_p2), %s1460_s13, 6 }
   0x6   : > { %143 = sbr.rel (%p140_p2) target bundleno = 384 (0x180), region = 32  ;;  %p165_p3 = scmp.lt.s32.totalorder (!%p140_p2), %s1465_s16, 127 }
   0xb   : > { %v1743_v0 = vld [vmem:[%s2259_s1 + $0x38] sm:$0xff]   ;;  %v1859_v1 = vmov 0   ;;  %v1744_v2 = vld [vmem:[%s2259_s1 + $0x30] sm:$0xff]   ;;  %s2263_s16 = smov (!%p165_p3, %s1465_s16), 127  ;;  %v1745_v3 = vld [vmem:[%s2259_s1 + $0x28] sm:$0xff]   ;;  %vm633_vm0 = vcmask 523264  }
   0xc   : > { %730 = vmatprep.subr.bf16.mxu0 %v1859_v1  ;;  %1710 = vmatprep.subr.bf16.mxu1 %v1859_v1  ;;  %s1645_s21 = sshll.u32 %s2263_s16, 3  ;;  %v1746_v4 = vld [vmem:[%s2259_s1 + $0x20] sm:$0xff]   ;;  %v1747_v6 = vld [vmem:[%s2259_s1 + $0x18] sm:$0xff]   ;;  %v1748_v8 = vld [vmem:[%s2259_s1 + $0x10] sm:$0xff]   ;;  %s1469_s20 = sshll.u32 %s2263_s16, 2  ;;  %vm1339_vm1 = vcmask 257024  }
   0xd   : > { %731 = vmatpush1.bf16.msra.mxu0 %v1743_v0  ;;  %1722 = vmatpush1.bf16.msra.mxu1 %v1743_v0  ;;  %s1912_s26 = scalar_lea.vmem %s2258_s0, %s1645_s21  ;;  %v1749_v9 = vld [vmem:[%s2259_s1 + $0x8] sm:$0xff]   ;;  %v1750_v10 = vld [vmem:[%s2259_s1] sm:$0xff]   ;;  %v1751_v11 = vld [vmem:[%s2259_s1 + $0x58] sm:$0xff]   ;;  %s2063_s23 = scalar_lea.vmem %s2261_s3, %s1469_s20 }
   0xe   : > { %732 = vmatprep.subr.bf16.mxu0 %v1859_v1  ;;  %1711 = vmatprep.subr.bf16.mxu1 %v1859_v1  ;;  %v1757_v5 = vld [vmem:[%s1912_s26 + $0x4] ss:$8 sps:$4 sm:$0xff]   ;;  %v1752_v12 = vld [vmem:[%s2259_s1 + $0x50] sm:$0xff]   ;;  %v1755_v15 = vld [vmem:[%s1912_s26] ss:$8 sps:$4 sm:$0xff]  }
   0xf   : > { %v1760_v7 = vld [vmem:[%s1912_s26 + $0x104] ss:$8 sps:$4 sm:$0xff]   ;;  %1547 = vmatprep.mubr.msk.bf16.mxu0 %vm633_vm0, %v1757_v5  ;;  %v1758_v16 = vld [vmem:[%s1912_s26 + $0x100] ss:$8 sps:$4 sm:$0xff]   ;;  %v1761_v17 = vld [vmem:[%s1912_s26 + $0x14] ss:$8 sps:$4 sm:$0xff]  }
  0x10   : > { %1563 = vmatprep.mubr.msk.bf16.mxu1 %vm633_vm0, %v1760_v7  ;;  %v1753_v13 = vld [vmem:[%s2259_s1 + $0x48] sm:$0xff]   ;;  %v1754_v14 = vld [vmem:[%s2259_s1 + $0x40] sm:$0xff]   ;;  %v1763_v18 = vld [vmem:[%s1912_s26 + $0x114] ss:$8 sps:$4 sm:$0xff]  }
  0x11   : > { %733 = vmatpush1.bf16.msra.mxu0 %v1744_v2  ;;  %1723 = vmatpush1.bf16.msra.mxu1 %v1744_v2  ;;  %v1765_v19 = vld [vmem:[%s1912_s26 + $0x10] ss:$8 sps:$4 sm:$0xff]   ;;  %v1767_v21 = vld [vmem:[%s1912_s26 + $0x24] ss:$8 sps:$4 sm:$0xff]   ;;  %v1771_v23 = vld [vmem:[%s1912_s26 + $0x20] ss:$8 sps:$4 sm:$0xff]  }
  0x12   : > { %734 = vmatprep.subr.bf16.mxu0 %v1859_v1  ;;  %1712 = vmatprep.subr.bf16.mxu1 %v1859_v1  ;;  %v1766_v20 = vld [vmem:[%s1912_s26 + $0x110] ss:$8 sps:$4 sm:$0xff]   ;;  %v1769_v22 = vld [vmem:[%s1912_s26 + $0x124] ss:$8 sps:$4 sm:$0xff]   ;;  %v1772_v24 = vld [vmem:[%s1912_s26 + $0x120] ss:$8 sps:$4 sm:$0xff]  }
  0x13   : > { %v1773_v25 = vld [vmem:[%s1912_s26 + $0x34] ss:$8 sps:$4 sm:$0xff]   ;;  %v1777_v27 = vld [vmem:[%s1912_s26 + $0x30] ss:$8 sps:$4 sm:$0xff]   ;;  %v1779_v29 = vld [vmem:[%s1912_s26 + $0x44] ss:$8 sps:$4 sm:$0xff]  }
  0x14   : > { %v1775_v26 = vld [vmem:[%s1912_s26 + $0x134] ss:$8 sps:$4 sm:$0xff]   ;;  %v1778_v28 = vld [vmem:[%s1912_s26 + $0x130] ss:$8 sps:$4 sm:$0xff]   ;;  %v1781_v30 = vld [vmem:[%s1912_s26 + $0x144] ss:$8 sps:$4 sm:$0xff]  }
  0x15   : > { %735 = vmatpush1.bf16.msra.mxu0 %v1745_v3  ;;  %1724 = vmatpush1.bf16.msra.mxu1 %v1745_v3  ;;  %v1783_v31 = vld [vmem:[%s1912_s26 + $0x40] ss:$8 sps:$4 sm:$0xff]   ;;  %v1785_v33 = vld [vmem:[%s1912_s26 + $0x54] ss:$8 sps:$4 sm:$0xff]   ;;  %v1789_v35 = vld [vmem:[%s1912_s26 + $0x50] ss:$8 sps:$4 sm:$0xff]  }
  0x16   : > { %736 = vmatprep.subr.bf16.mxu0 %v1859_v1  ;;  %1713 = vmatprep.subr.bf16.mxu1 %v1859_v1  ;;  %v1784_v32 = vld [vmem:[%s1912_s26 + $0x140] ss:$8 sps:$4 sm:$0xff]   ;;  %v1787_v34 = vld [vmem:[%s1912_s26 + $0x154] ss:$8 sps:$4 sm:$0xff]   ;;  %v1790_v36 = vld [vmem:[%s1912_s26 + $0x150] ss:$8 sps:$4 sm:$0xff]  }
  0x17   : > { %v1791_v37 = vld [vmem:[%s1912_s26 + $0x64] ss:$8 sps:$4 sm:$0xff]   ;;  %v1795_v39 = vld [vmem:[%s1912_s26 + $0x60] ss:$8 sps:$4 sm:$0xff]   ;;  %v1797_v41 = vld [vmem:[%s1912_s26 + $0x74] ss:$8 sps:$4 sm:$0xff]  }
  0x18   : > { %v1793_v38 = vld [vmem:[%s1912_s26 + $0x164] ss:$8 sps:$4 sm:$0xff]   ;;  %v1796_v40 = vld [vmem:[%s1912_s26 + $0x160] ss:$8 sps:$4 sm:$0xff]   ;;  %v1799_v42 = vld [vmem:[%s1912_s26 + $0x174] ss:$8 sps:$4 sm:$0xff]  }
  0x19   : > { %737 = vmatpush1.bf16.msra.mxu0 %v1746_v4  ;;  %1725 = vmatpush1.bf16.msra.mxu1 %v1746_v4  ;;  %v1801_v43 = vld [vmem:[%s1912_s26 + $0x70] ss:$8 sps:$4 sm:$0xff]   ;;  %v1803_v45 = vld [vmem:[%s1912_s26 + $0x84] ss:$8 sps:$4 sm:$0xff]   ;;  %v1807_v47 = vld [vmem:[%s1912_s26 + $0x80] ss:$8 sps:$4 sm:$0xff]  }
  0x1a   : > { %738 = vmatprep.subr.bf16.mxu0 %v1859_v1  ;;  %1714 = vmatprep.subr.bf16.mxu1 %v1859_v1  ;;  %v1802_v44 = vld [vmem:[%s1912_s26 + $0x170] ss:$8 sps:$4 sm:$0xff]   ;;  %v1805_v46 = vld [vmem:[%s1912_s26 + $0x184] ss:$8 sps:$4 sm:$0xff]   ;;  %v1808_v48 = vld [vmem:[%s1912_s26 + $0x180] ss:$8 sps:$4 sm:$0xff]  }
  0x1b   : > { %v1809_v49 = vld [vmem:[%s1912_s26 + $0x94] ss:$8 sps:$4 sm:$0xff]   ;;  %v1813_v51 = vld [vmem:[%s1912_s26 + $0x90] ss:$8 sps:$4 sm:$0xff]   ;;  %v1815_v53 = vld [vmem:[%s1912_s26 + $0xa4] ss:$8 sps:$4 sm:$0xff]  }
  0x1c   : > { %v1811_v50 = vld [vmem:[%s1912_s26 + $0x194] ss:$8 sps:$4 sm:$0xff]   ;;  %v1814_v52 = vld [vmem:[%s1912_s26 + $0x190] ss:$8 sps:$4 sm:$0xff]   ;;  %v1817_v54 = vld [vmem:[%s1912_s26 + $0x1a4] ss:$8 sps:$4 sm:$0xff]  }
  0x1d   : > { %739 = vmatpush1.bf16.msra.mxu0 %v1747_v6  ;;  %1726 = vmatpush1.bf16.msra.mxu1 %v1747_v6  ;;  %v1819_v55 = vld [vmem:[%s1912_s26 + $0xa0] ss:$8 sps:$4 sm:$0xff]   ;;  %v1821_v57 = vld [vmem:[%s1912_s26 + $0xb4] ss:$8 sps:$4 sm:$0xff]   ;;  %v1825_v59 = vld [vmem:[%s1912_s26 + $0xb0] ss:$8 sps:$4 sm:$0xff]  }
  0x1e   : > { %740 = vmatprep.subr.bf16.mxu0 %v1859_v1  ;;  %1715 = vmatprep.subr.bf16.mxu1 %v1859_v1  ;;  %v1820_v56 = vld [vmem:[%s1912_s26 + $0x1a0] ss:$8 sps:$4 sm:$0xff]   ;;  %v1823_v58 = vld [vmem:[%s1912_s26 + $0x1b4] ss:$8 sps:$4 sm:$0xff]   ;;  %v1826_v60 = vld [vmem:[%s1912_s26 + $0x1b0] ss:$8 sps:$4 sm:$0xff]  }
  0x1f   : > { %v1827_v61 = vld [vmem:[%s1912_s26 + $0xc4] ss:$8 sps:$4 sm:$0xff]   ;;  %v1831_v63 = vld [vmem:[%s1912_s26 + $0xc0] ss:$8 sps:$4 sm:$0xff]   ;;  %v1835_v2 = vld [vmem:[%s1912_s26 + $0x1d4] ss:$8 sps:$4 sm:$0xff]  }
  0x20   : > { %v1829_v62 = vld [vmem:[%s1912_s26 + $0x1c4] ss:$8 sps:$4 sm:$0xff]   ;;  %v1832_v0 = vld [vmem:[%s1912_s26 + $0x1c0] ss:$8 sps:$4 sm:$0xff]   ;;  %v1837_v3 = vld [vmem:[%s1912_s26 + $0xd0] ss:$8 sps:$4 sm:$0xff]  }
  0x21   : > { %741 = vmatpush1.bf16.msra.mxu0 %v1748_v8  ;;  %1727 = vmatpush1.bf16.msra.mxu1 %v1748_v8  ;;  %v1838_v4 = vld [vmem:[%s1912_s26 + $0x1d0] ss:$8 sps:$4 sm:$0xff]   ;;  %v1839_v5 = vld [vmem:[%s1912_s26 + $0xe4] ss:$8 sps:$4 sm:$0xff]   ;;  %v1843_v7 = vld [vmem:[%s1912_s26 + $0xe0] ss:$8 sps:$4 sm:$0xff]  }
  0x22   : > { %742 = vmatprep.subr.bf16.mxu0 %v1859_v1  ;;  %1716 = vmatprep.subr.bf16.mxu1 %v1859_v1  ;;  %v1841_v6 = vld [vmem:[%s1912_s26 + $0x1e4] ss:$8 sps:$4 sm:$0xff]   ;;  %v1844_v8 = vld [vmem:[%s1912_s26 + $0x1e0] ss:$8 sps:$4 sm:$0xff]  }
  0x25   : > { %743 = vmatpush1.bf16.msra.mxu0 %v1749_v9  ;;  %1728 = vmatpush1.bf16.msra.mxu1 %v1749_v9  ;;  %v1845_v9 = vld [vmem:[%s1912_s26 + $0xf4] ss:$8 sps:$4 sm:$0xff]  }
  0x26   : > { %744 = vmatprep.subr.bf16.mxu0 %v1859_v1  ;;  %1717 = vmatprep.subr.bf16.mxu1 %v1859_v1 }
  0x29   : > { %745 = vmatpush1.bf16.msra.mxu0 %v1750_v10  ;;  %1729 = vmatpush1.bf16.msra.mxu1 %v1750_v10  ;;  %v1847_v10 = vld [vmem:[%s1912_s26 + $0x1f4] ss:$8 sps:$4 sm:$0xff]  }
  0x2a   : > { %754 = vmatprep.subr.bf16.mxu0 %v1859_v1  ;;  %1718 = vmatprep.subr.bf16.mxu1 %v1859_v1 }
  0x2d   : > { %755 = vmatpush2.bf16.msra.mxu0 %v1751_v11  ;;  %1730 = vmatpush2.bf16.msra.mxu1 %v1751_v11  ;;  %v1849_v11 = vld [vmem:[%s1912_s26 + $0xf0] ss:$8 sps:$4 sm:$0xff]  }
  0x2e   : > { %756 = vmatprep.subr.bf16.mxu0 %v1859_v1  ;;  %1719 = vmatprep.subr.bf16.mxu1 %v1859_v1 }
  0x31   : > { %757 = vmatpush2.bf16.msra.mxu0 %v1752_v12  ;;  %1731 = vmatpush2.bf16.msra.mxu1 %v1752_v12  ;;  %v1850_v12 = vld [vmem:[%s1912_s26 + $0x1f0] ss:$8 sps:$4 sm:$0xff]  }
  0x32   : > { %758 = vmatprep.subr.bf16.mxu0 %v1859_v1  ;;  %1720 = vmatprep.subr.bf16.mxu1 %v1859_v1 }
  0x35   : > { %759 = vmatpush2.bf16.msra.mxu0 %v1753_v13  ;;  %1732 = vmatpush2.bf16.msra.mxu1 %v1753_v13  ;;  %v2055_v13 = vld [vmem:[%s2260_s2] ss:$0 sm:$0xff] }
  0x36   : > { %760 = vmatprep.subr.bf16.mxu0 %v1859_v1  ;;  %1721 = vmatprep.subr.bf16.mxu1 %v1859_v1  ;;  %v1833_v1 = vld [vmem:[%s1912_s26 + $0xd4] ss:$8 sps:$4 sm:$0xff]  }
  0x39   : > { %761 = vmatpush2.bf16.msra.mxu0 %v1754_v14  ;;  %1733 = vmatpush2.bf16.msra.mxu1 %v1754_v14 }
  0x3c   : > { %763 = vmatmul.mubr.bf16.vlgmr.msra.gmra.mxu0 %v1755_v15  ;;  %891 = vmatmul.mubr.bf16.vlgmr.msra.gmra.mxu1 %v1758_v16 }
  0x3d   : > { %1548 = vmatprep.mubr.msk.bf16.mxu0 %vm633_vm0, %v1761_v17  ;;  %1564 = vmatprep.mubr.msk.bf16.mxu1 %vm633_vm0, %v1763_v18 }
  0x44   : > { %771 = vmatmul.mubr.bf16.gmra.mxu0 %v1765_v19  ;;  %899 = vmatmul.mubr.bf16.gmra.mxu1 %v1766_v20 }
  0x45   : > { %1549 = vmatprep.mubr.msk.bf16.mxu0 %vm633_vm0, %v1767_v21  ;;  %1565 = vmatprep.mubr.msk.bf16.mxu1 %vm633_vm0, %v1769_v22 }
  0x4c   : > { %779 = vmatmul.mubr.bf16.gmra.mxu0 %v1771_v23  ;;  %907 = vmatmul.mubr.bf16.gmra.mxu1 %v1772_v24 }
  0x4d   : > { %1550 = vmatprep.mubr.msk.bf16.mxu0 %vm633_vm0, %v1773_v25  ;;  %1566 = vmatprep.mubr.msk.bf16.mxu1 %vm633_vm0, %v1775_v26 }
  0x54   : > { %787 = vmatmul.mubr.bf16.gmra.mxu0 %v1777_v27  ;;  %915 = vmatmul.mubr.bf16.gmra.mxu1 %v1778_v28 }
  0x55   : > { %1551 = vmatprep.mubr.msk.bf16.mxu0 %vm633_vm0, %v1779_v29  ;;  %1567 = vmatprep.mubr.msk.bf16.mxu1 %vm633_vm0, %v1781_v30 }
  0x5c   : > { %795 = vmatmul.mubr.bf16.gmra.mxu0 %v1783_v31  ;;  %923 = vmatmul.mubr.bf16.gmra.mxu1 %v1784_v32 }
  0x5d   : > { %1552 = vmatprep.mubr.msk.bf16.mxu0 %vm633_vm0, %v1785_v33  ;;  %1568 = vmatprep.mubr.msk.bf16.mxu1 %vm633_vm0, %v1787_v34 }
  0x64   : > { %803 = vmatmul.mubr.bf16.gmra.mxu0 %v1789_v35  ;;  %931 = vmatmul.mubr.bf16.gmra.mxu1 %v1790_v36 }
  0x65   : > { %1553 = vmatprep.mubr.msk.bf16.mxu0 %vm633_vm0, %v1791_v37  ;;  %1569 = vmatprep.mubr.msk.bf16.mxu1 %vm633_vm0, %v1793_v38 }
  0x6c   : > { %811 = vmatmul.mubr.bf16.gmra.mxu0 %v1795_v39  ;;  %939 = vmatmul.mubr.bf16.gmra.mxu1 %v1796_v40 }
  0x6d   : > { %1554 = vmatprep.mubr.msk.bf16.mxu0 %vm633_vm0, %v1797_v41  ;;  %1570 = vmatprep.mubr.msk.bf16.mxu1 %vm633_vm0, %v1799_v42 }
  0x74   : > { %819 = vmatmul.mubr.bf16.gmra.mxu0 %v1801_v43  ;;  %947 = vmatmul.mubr.bf16.gmra.mxu1 %v1802_v44 }
  0x75   : > { %1555 = vmatprep.mubr.msk.bf16.mxu0 %vm633_vm0, %v1803_v45  ;;  %1571 = vmatprep.mubr.msk.bf16.mxu1 %vm633_vm0, %v1805_v46 }
  0x7c   : > { %827 = vmatmul.mubr.bf16.gmra.mxu0 %v1807_v47  ;;  %955 = vmatmul.mubr.bf16.gmra.mxu1 %v1808_v48 }
  0x7d   : > { %1556 = vmatprep.mubr.msk.bf16.mxu0 %vm633_vm0, %v1809_v49  ;;  %1572 = vmatprep.mubr.msk.bf16.mxu1 %vm633_vm0, %v1811_v50 }
  0x84   : > { %835 = vmatmul.mubr.bf16.gmra.mxu0 %v1813_v51  ;;  %963 = vmatmul.mubr.bf16.gmra.mxu1 %v1814_v52 }
  0x85   : > { %1557 = vmatprep.mubr.msk.bf16.mxu0 %vm633_vm0, %v1815_v53  ;;  %1573 = vmatprep.mubr.msk.bf16.mxu1 %vm633_vm0, %v1817_v54 }
  0x8c   : > { %843 = vmatmul.mubr.bf16.gmra.mxu0 %v1819_v55  ;;  %971 = vmatmul.mubr.bf16.gmra.mxu1 %v1820_v56 }
  0x8d   : > { %1558 = vmatprep.mubr.msk.bf16.mxu0 %vm633_vm0, %v1821_v57  ;;  %1574 = vmatprep.mubr.msk.bf16.mxu1 %vm633_vm0, %v1823_v58 }
  0x94   : > { %851 = vmatmul.mubr.bf16.gmra.mxu0 %v1825_v59  ;;  %979 = vmatmul.mubr.bf16.gmra.mxu1 %v1826_v60 }
  0x95   : > { %1559 = vmatprep.mubr.msk.bf16.mxu0 %vm633_vm0, %v1827_v61  ;;  %1575 = vmatprep.mubr.msk.bf16.mxu1 %vm633_vm0, %v1829_v62 }
  0x9c   : > { %859 = vmatmul.mubr.bf16.gmra.mxu0 %v1831_v63  ;;  %987 = vmatmul.mubr.bf16.gmra.mxu1 %v1832_v0 }
  0x9d   : > { %1560 = vmatprep.mubr.msk.bf16.mxu0 %vm633_vm0, %v1833_v1  ;;  %1576 = vmatprep.mubr.msk.bf16.mxu1 %vm633_vm0, %v1835_v2 }
  0xa4   : > { %867 = vmatmul.mubr.bf16.gmra.mxu0 %v1837_v3  ;;  %995 = vmatmul.mubr.bf16.gmra.mxu1 %v1838_v4 }
  0xa5   : > { %1561 = vmatprep.mubr.msk.bf16.mxu0 %vm633_vm0, %v1839_v5  ;;  %1577 = vmatprep.mubr.msk.bf16.mxu1 %vm633_vm0, %v1841_v6 }
  0xac   : > { %875 = vmatmul.mubr.bf16.gmra.mxu0 %v1843_v7  ;;  %1003 = vmatmul.mubr.bf16.gmra.mxu1 %v1844_v8 }
  0xad   : > { %1562 = vmatprep.mubr.msk.bf16.mxu0 %vm633_vm0, %v1845_v9  ;;  %1578 = vmatprep.mubr.msk.bf16.mxu1 %vm633_vm0, %v1847_v10 }
  0xb4   : > { %883 = vmatmul.mubr.bf16.gmra.mxu0 %v1849_v11  ;;  %1011 = vmatmul.mubr.bf16.gmra.mxu1 %v1850_v12 }
  0xfc   : > { %v764_v14 = vpop.f32.mrf.mxu0  ;;  %v892_v15 = vpop.f32.mrf.mxu1 }
  0xfd   : > { %v765_v16 = vadd.f32 %v2055_v13, %v764_v14  ;;  %v893_v17 = vadd.f32 %v2055_v13, %v892_v15 }
  0xfe   : > { %v766_v18 = vpop.f32.mrf.mxu0  ;;  %v894_v19 = vpop.f32.mrf.mxu1 }
  0xff   : > { %v1019_v20 = vmax.f32 %v765_v16, 0.0  ;;  %v1051_v21 = vmax.f32 %v893_v17, 0.0 }
 0x100   : > { %v767_v22 = vpop.f32.mrf.mxu0  ;;  %v895_v23 = vpop.f32.mrf.mxu1 }
 0x101   : > { %v1646_v24 = vpack.c.bf16 %v1019_v20, %v1019_v20  ;;  %v1678_v25 = vpack.c.bf16 %v1051_v21, %v1051_v21  ;;  %v768_v26 = vadd.f32 %v2055_v13, %v767_v22  ;;  %v896_v27 = vadd.f32 %v2055_v13, %v895_v23 }
 0x102   : > { %v769_v28 = vpop.f32.mrf.mxu0  ;;  %v897_v29 = vpop.f32.mrf.mxu1 }
 0x103   : > { %1340 = vst.msk [vmem:[%s2063_s23] sm:$0xf] %vm1339_vm1, %v1646_v24  ;;  %1372 = vst.msk [vmem:[%s2063_s23 + $0x80] sm:$0xf] %vm1339_vm1, %v1678_v25  ;;  %v1020_v30 = vmax.f32 %v768_v26, 0.0  ;;  %v1052_v31 = vmax.f32 %v896_v27, 0.0 }
 0x104   : > { %v772_v32 = vpop.f32.mrf.mxu0  ;;  %v900_v33 = vpop.f32.mrf.mxu1 }
 0x105   : > { %v1647_v34 = vpack.c.bf16 %v1020_v30, %v1020_v30  ;;  %v1679_v35 = vpack.c.bf16 %v1052_v31, %v1052_v31  ;;  %v773_v36 = vadd.f32 %v2055_v13, %v772_v32  ;;  %v901_v37 = vadd.f32 %v2055_v13, %v900_v33 }
 0x106   : > { %v774_v38 = vpop.f32.mrf.mxu0  ;;  %v902_v39 = vpop.f32.mrf.mxu1 }
 0x107   : > { %1341 = vst.msk [vmem:[%s2063_s23 + $0x4] sm:$0xf] %vm1339_vm1, %v1647_v34  ;;  %1373 = vst.msk [vmem:[%s2063_s23 + $0x84] sm:$0xf] %vm1339_vm1, %v1679_v35  ;;  %v1021_v40 = vmax.f32 %v773_v36, 0.0  ;;  %v1053_v41 = vmax.f32 %v901_v37, 0.0 }
 0x108   : > { %v775_v42 = vpop.f32.mrf.mxu0  ;;  %v903_v43 = vpop.f32.mrf.mxu1 }
 0x109   : > { %v1648_v44 = vpack.c.bf16 %v1021_v40, %v1021_v40  ;;  %v1680_v45 = vpack.c.bf16 %v1053_v41, %v1053_v41  ;;  %v776_v46 = vadd.f32 %v2055_v13, %v775_v42  ;;  %v904_v47 = vadd.f32 %v2055_v13, %v903_v43 }
 0x10a   : > { %v777_v48 = vpop.f32.mrf.mxu0  ;;  %v905_v49 = vpop.f32.mrf.mxu1 }
 0x10b   : > { %1342 = vst.msk [vmem:[%s2063_s23 + $0x8] sm:$0xf] %vm1339_vm1, %v1648_v44  ;;  %1374 = vst.msk [vmem:[%s2063_s23 + $0x88] sm:$0xf] %vm1339_vm1, %v1680_v45  ;;  %v1022_v50 = vmax.f32 %v776_v46, 0.0  ;;  %v1054_v51 = vmax.f32 %v904_v47, 0.0 }
 0x10c   : > { %v780_v52 = vpop.f32.mrf.mxu0  ;;  %v908_v53 = vpop.f32.mrf.mxu1 }
 0x10d   : > { %v1649_v54 = vpack.c.bf16 %v1022_v50, %v1022_v50  ;;  %v1681_v55 = vpack.c.bf16 %v1054_v51, %v1054_v51  ;;  %v781_v56 = vadd.f32 %v2055_v13, %v780_v52  ;;  %v909_v57 = vadd.f32 %v2055_v13, %v908_v53 }
 0x10e   : > { %v782_v58 = vpop.f32.mrf.mxu0  ;;  %v910_v59 = vpop.f32.mrf.mxu1 }
 0x10f   : > { %1343 = vst.msk [vmem:[%s2063_s23 + $0xc] sm:$0xf] %vm1339_vm1, %v1649_v54  ;;  %1375 = vst.msk [vmem:[%s2063_s23 + $0x8c] sm:$0xf] %vm1339_vm1, %v1681_v55  ;;  %v1023_v60 = vmax.f32 %v781_v56, 0.0  ;;  %v1055_v61 = vmax.f32 %v909_v57, 0.0 }
 0x110   : > { %v783_v62 = vpop.f32.mrf.mxu0  ;;  %v911_v63 = vpop.f32.mrf.mxu1 }
 0x111   : > { %v1650_v0 = vpack.c.bf16 %v1023_v60, %v1023_v60  ;;  %v1682_v1 = vpack.c.bf16 %v1055_v61, %v1055_v61  ;;  %v784_v2 = vadd.f32 %v2055_v13, %v783_v62  ;;  %v912_v3 = vadd.f32 %v2055_v13, %v911_v63 }
 0x112   : > { %v785_v4 = vpop.f32.mrf.mxu0  ;;  %v913_v5 = vpop.f32.mrf.mxu1 }
 0x113   : > { %1344 = vst.msk [vmem:[%s2063_s23 + $0x10] sm:$0xf] %vm1339_vm1, %v1650_v0  ;;  %1376 = vst.msk [vmem:[%s2063_s23 + $0x90] sm:$0xf] %vm1339_vm1, %v1682_v1  ;;  %v1024_v6 = vmax.f32 %v784_v2, 0.0  ;;  %v1056_v7 = vmax.f32 %v912_v3, 0.0 }
 0x114   : > { %v788_v8 = vpop.f32.mrf.mxu0  ;;  %v916_v9 = vpop.f32.mrf.mxu1 }
 0x115   : > { %v1651_v10 = vpack.c.bf16 %v1024_v6, %v1024_v6  ;;  %v1683_v11 = vpack.c.bf16 %v1056_v7, %v1056_v7  ;;  %v789_v12 = vadd.f32 %v2055_v13, %v788_v8  ;;  %v917_v14 = vadd.f32 %v2055_v13, %v916_v9 }
 0x116   : > { %v790_v15 = vpop.f32.mrf.mxu0  ;;  %v918_v16 = vpop.f32.mrf.mxu1 }
 0x117   : > { %1345 = vst.msk [vmem:[%s2063_s23 + $0x14] sm:$0xf] %vm1339_vm1, %v1651_v10  ;;  %1377 = vst.msk [vmem:[%s2063_s23 + $0x94] sm:$0xf] %vm1339_vm1, %v1683_v11  ;;  %v1025_v17 = vmax.f32 %v789_v12, 0.0  ;;  %v1057_v18 = vmax.f32 %v917_v14, 0.0 }
 0x118   : > { %v791_v19 = vpop.f32.mrf.mxu0  ;;  %v919_v20 = vpop.f32.mrf.mxu1 }
 0x119   : > { %v1652_v21 = vpack.c.bf16 %v1025_v17, %v1025_v17  ;;  %v1684_v22 = vpack.c.bf16 %v1057_v18, %v1057_v18  ;;  %v792_v23 = vadd.f32 %v2055_v13, %v791_v19  ;;  %v920_v24 = vadd.f32 %v2055_v13, %v919_v20 }
 0x11a   : > { %v793_v25 = vpop.f32.mrf.mxu0  ;;  %v921_v26 = vpop.f32.mrf.mxu1 }
 0x11b   : > { %1346 = vst.msk [vmem:[%s2063_s23 + $0x18] sm:$0xf] %vm1339_vm1, %v1652_v21  ;;  %1378 = vst.msk [vmem:[%s2063_s23 + $0x98] sm:$0xf] %vm1339_vm1, %v1684_v22  ;;  %v1026_v27 = vmax.f32 %v792_v23, 0.0  ;;  %v1058_v28 = vmax.f32 %v920_v24, 0.0 }
 0x11c   : > { %v796_v29 = vpop.f32.mrf.mxu0  ;;  %v924_v30 = vpop.f32.mrf.mxu1 }
 0x11d   : > { %v1653_v31 = vpack.c.bf16 %v1026_v27, %v1026_v27  ;;  %v1685_v32 = vpack.c.bf16 %v1058_v28, %v1058_v28  ;;  %v797_v33 = vadd.f32 %v2055_v13, %v796_v29  ;;  %v925_v34 = vadd.f32 %v2055_v13, %v924_v30 }
 0x11e   : > { %v798_v35 = vpop.f32.mrf.mxu0  ;;  %v926_v36 = vpop.f32.mrf.mxu1 }
 0x11f   : > { %1347 = vst.msk [vmem:[%s2063_s23 + $0x1c] sm:$0xf] %vm1339_vm1, %v1653_v31  ;;  %1379 = vst.msk [vmem:[%s2063_s23 + $0x9c] sm:$0xf] %vm1339_vm1, %v1685_v32  ;;  %v1027_v37 = vmax.f32 %v797_v33, 0.0  ;;  %v1059_v38 = vmax.f32 %v925_v34, 0.0 }
 0x120   : > { %v799_v39 = vpop.f32.mrf.mxu0  ;;  %v927_v40 = vpop.f32.mrf.mxu1 }
 0x121   : > { %v1654_v41 = vpack.c.bf16 %v1027_v37, %v1027_v37  ;;  %v1686_v42 = vpack.c.bf16 %v1059_v38, %v1059_v38  ;;  %v800_v43 = vadd.f32 %v2055_v13, %v799_v39  ;;  %v928_v44 = vadd.f32 %v2055_v13, %v927_v40 }
 0x122   : > { %v801_v45 = vpop.f32.mrf.mxu0  ;;  %v929_v46 = vpop.f32.mrf.mxu1 }
 0x123   : > { %1348 = vst.msk [vmem:[%s2063_s23 + $0x20] sm:$0xf] %vm1339_vm1, %v1654_v41  ;;  %1380 = vst.msk [vmem:[%s2063_s23 + $0xa0] sm:$0xf] %vm1339_vm1, %v1686_v42  ;;  %v1028_v47 = vmax.f32 %v800_v43, 0.0  ;;  %v1060_v48 = vmax.f32 %v928_v44, 0.0 }
 0x124   : > { %v804_v49 = vpop.f32.mrf.mxu0  ;;  %v932_v50 = vpop.f32.mrf.mxu1 }
 0x125   : > { %v1655_v51 = vpack.c.bf16 %v1028_v47, %v1028_v47  ;;  %v1687_v52 = vpack.c.bf16 %v1060_v48, %v1060_v48  ;;  %v805_v53 = vadd.f32 %v2055_v13, %v804_v49  ;;  %v933_v54 = vadd.f32 %v2055_v13, %v932_v50 }
 0x126   : > { %v806_v55 = vpop.f32.mrf.mxu0  ;;  %v934_v56 = vpop.f32.mrf.mxu1 }
 0x127   : > { %1349 = vst.msk [vmem:[%s2063_s23 + $0x24] sm:$0xf] %vm1339_vm1, %v1655_v51  ;;  %1381 = vst.msk [vmem:[%s2063_s23 + $0xa4] sm:$0xf] %vm1339_vm1, %v1687_v52  ;;  %v1029_v57 = vmax.f32 %v805_v53, 0.0  ;;  %v1061_v58 = vmax.f32 %v933_v54, 0.0 }
 0x128   : > { %v807_v59 = vpop.f32.mrf.mxu0  ;;  %v935_v60 = vpop.f32.mrf.mxu1 }
 0x129   : > { %v1656_v61 = vpack.c.bf16 %v1029_v57, %v1029_v57  ;;  %v1688_v62 = vpack.c.bf16 %v1061_v58, %v1061_v58  ;;  %v808_v63 = vadd.f32 %v2055_v13, %v807_v59  ;;  %v936_v0 = vadd.f32 %v2055_v13, %v935_v60 }
 0x12a   : > { %v809_v1 = vpop.f32.mrf.mxu0  ;;  %v937_v2 = vpop.f32.mrf.mxu1 }
 0x12b   : > { %1350 = vst.msk [vmem:[%s2063_s23 + $0x28] sm:$0xf] %vm1339_vm1, %v1656_v61  ;;  %1382 = vst.msk [vmem:[%s2063_s23 + $0xa8] sm:$0xf] %vm1339_vm1, %v1688_v62  ;;  %v1030_v3 = vmax.f32 %v808_v63, 0.0  ;;  %v1062_v4 = vmax.f32 %v936_v0, 0.0 }
 0x12c   : > { %v812_v5 = vpop.f32.mrf.mxu0  ;;  %v940_v6 = vpop.f32.mrf.mxu1 }
 0x12d   : > { %v1657_v7 = vpack.c.bf16 %v1030_v3, %v1030_v3  ;;  %v1689_v8 = vpack.c.bf16 %v1062_v4, %v1062_v4  ;;  %v813_v9 = vadd.f32 %v2055_v13, %v812_v5  ;;  %v941_v10 = vadd.f32 %v2055_v13, %v940_v6 }
 0x12e   : > { %v814_v11 = vpop.f32.mrf.mxu0  ;;  %v942_v12 = vpop.f32.mrf.mxu1 }
 0x12f   : > { %1351 = vst.msk [vmem:[%s2063_s23 + $0x2c] sm:$0xf] %vm1339_vm1, %v1657_v7  ;;  %1383 = vst.msk [vmem:[%s2063_s23 + $0xac] sm:$0xf] %vm1339_vm1, %v1689_v8  ;;  %v1031_v14 = vmax.f32 %v813_v9, 0.0  ;;  %v1063_v15 = vmax.f32 %v941_v10, 0.0 }
 0x130   : > { %v815_v16 = vpop.f32.mrf.mxu0  ;;  %v943_v17 = vpop.f32.mrf.mxu1 }
 0x131   : > { %v1658_v18 = vpack.c.bf16 %v1031_v14, %v1031_v14  ;;  %v1690_v19 = vpack.c.bf16 %v1063_v15, %v1063_v15  ;;  %v816_v20 = vadd.f32 %v2055_v13, %v815_v16  ;;  %v944_v21 = vadd.f32 %v2055_v13, %v943_v17 }
 0x132   : > { %v817_v22 = vpop.f32.mrf.mxu0  ;;  %v945_v23 = vpop.f32.mrf.mxu1 }
 0x133   : > { %1352 = vst.msk [vmem:[%s2063_s23 + $0x30] sm:$0xf] %vm1339_vm1, %v1658_v18  ;;  %1384 = vst.msk [vmem:[%s2063_s23 + $0xb0] sm:$0xf] %vm1339_vm1, %v1690_v19  ;;  %v1032_v24 = vmax.f32 %v816_v20, 0.0  ;;  %v1064_v25 = vmax.f32 %v944_v21, 0.0 }
 0x134   : > { %v820_v26 = vpop.f32.mrf.mxu0  ;;  %v948_v27 = vpop.f32.mrf.mxu1 }
 0x135   : > { %v1659_v28 = vpack.c.bf16 %v1032_v24, %v1032_v24  ;;  %v1691_v29 = vpack.c.bf16 %v1064_v25, %v1064_v25  ;;  %v821_v30 = vadd.f32 %v2055_v13, %v820_v26  ;;  %v949_v31 = vadd.f32 %v2055_v13, %v948_v27 }
 0x136   : > { %v822_v32 = vpop.f32.mrf.mxu0  ;;  %v950_v33 = vpop.f32.mrf.mxu1 }
 0x137   : > { %1353 = vst.msk [vmem:[%s2063_s23 + $0x34] sm:$0xf] %vm1339_vm1, %v1659_v28  ;;  %1385 = vst.msk [vmem:[%s2063_s23 + $0xb4] sm:$0xf] %vm1339_vm1, %v1691_v29  ;;  %v1033_v34 = vmax.f32 %v821_v30, 0.0  ;;  %v1065_v35 = vmax.f32 %v949_v31, 0.0 }
 0x138   : > { %v823_v36 = vpop.f32.mrf.mxu0  ;;  %v951_v37 = vpop.f32.mrf.mxu1 }
 0x139   : > { %v1660_v38 = vpack.c.bf16 %v1033_v34, %v1033_v34  ;;  %v1692_v39 = vpack.c.bf16 %v1065_v35, %v1065_v35  ;;  %v824_v40 = vadd.f32 %v2055_v13, %v823_v36  ;;  %v952_v41 = vadd.f32 %v2055_v13, %v951_v37 }
 0x13a   : > { %v825_v42 = vpop.f32.mrf.mxu0  ;;  %v953_v43 = vpop.f32.mrf.mxu1 }
 0x13b   : > { %1354 = vst.msk [vmem:[%s2063_s23 + $0x38] sm:$0xf] %vm1339_vm1, %v1660_v38  ;;  %1386 = vst.msk [vmem:[%s2063_s23 + $0xb8] sm:$0xf] %vm1339_vm1, %v1692_v39  ;;  %v1034_v44 = vmax.f32 %v824_v40, 0.0  ;;  %v1066_v45 = vmax.f32 %v952_v41, 0.0 }
 0x13c   : > { %v828_v46 = vpop.f32.mrf.mxu0  ;;  %v956_v47 = vpop.f32.mrf.mxu1 }
 0x13d   : > { %v1661_v48 = vpack.c.bf16 %v1034_v44, %v1034_v44  ;;  %v1693_v49 = vpack.c.bf16 %v1066_v45, %v1066_v45  ;;  %v829_v50 = vadd.f32 %v2055_v13, %v828_v46  ;;  %v957_v51 = vadd.f32 %v2055_v13, %v956_v47 }
 0x13e   : > { %v830_v52 = vpop.f32.mrf.mxu0  ;;  %v958_v53 = vpop.f32.mrf.mxu1 }
 0x13f   : > { %1355 = vst.msk [vmem:[%s2063_s23 + $0x3c] sm:$0xf] %vm1339_vm1, %v1661_v48  ;;  %1387 = vst.msk [vmem:[%s2063_s23 + $0xbc] sm:$0xf] %vm1339_vm1, %v1693_v49  ;;  %v1035_v54 = vmax.f32 %v829_v50, 0.0  ;;  %v1067_v55 = vmax.f32 %v957_v51, 0.0 }
 0x140   : > { %v831_v56 = vpop.f32.mrf.mxu0  ;;  %v959_v57 = vpop.f32.mrf.mxu1 }
 0x141   : > { %v1662_v58 = vpack.c.bf16 %v1035_v54, %v1035_v54  ;;  %v1694_v59 = vpack.c.bf16 %v1067_v55, %v1067_v55  ;;  %v832_v60 = vadd.f32 %v2055_v13, %v831_v56  ;;  %v960_v61 = vadd.f32 %v2055_v13, %v959_v57 }
 0x142   : > { %v833_v62 = vpop.f32.mrf.mxu0  ;;  %v961_v63 = vpop.f32.mrf.mxu1 }
 0x143   : > { %1356 = vst.msk [vmem:[%s2063_s23 + $0x40] sm:$0xf] %vm1339_vm1, %v1662_v58  ;;  %1388 = vst.msk [vmem:[%s2063_s23 + $0xc0] sm:$0xf] %vm1339_vm1, %v1694_v59  ;;  %v1036_v0 = vmax.f32 %v832_v60, 0.0  ;;  %v1068_v1 = vmax.f32 %v960_v61, 0.0 }
 0x144   : > { %v836_v2 = vpop.f32.mrf.mxu0  ;;  %v964_v3 = vpop.f32.mrf.mxu1 }
 0x145   : > { %v1663_v4 = vpack.c.bf16 %v1036_v0, %v1036_v0  ;;  %v1695_v5 = vpack.c.bf16 %v1068_v1, %v1068_v1  ;;  %v837_v6 = vadd.f32 %v2055_v13, %v836_v2  ;;  %v965_v7 = vadd.f32 %v2055_v13, %v964_v3 }
 0x146   : > { %v838_v8 = vpop.f32.mrf.mxu0  ;;  %v966_v9 = vpop.f32.mrf.mxu1 }
 0x147   : > { %1357 = vst.msk [vmem:[%s2063_s23 + $0x44] sm:$0xf] %vm1339_vm1, %v1663_v4  ;;  %1389 = vst.msk [vmem:[%s2063_s23 + $0xc4] sm:$0xf] %vm1339_vm1, %v1695_v5  ;;  %v1037_v10 = vmax.f32 %v837_v6, 0.0  ;;  %v1069_v11 = vmax.f32 %v965_v7, 0.0 }
 0x148   : > { %v839_v12 = vpop.f32.mrf.mxu0  ;;  %v967_v14 = vpop.f32.mrf.mxu1 }
 0x149   : > { %v1664_v15 = vpack.c.bf16 %v1037_v10, %v1037_v10  ;;  %v1696_v16 = vpack.c.bf16 %v1069_v11, %v1069_v11  ;;  %v840_v17 = vadd.f32 %v2055_v13, %v839_v12  ;;  %v968_v18 = vadd.f32 %v2055_v13, %v967_v14 }
 0x14a   : > { %v841_v19 = vpop.f32.mrf.mxu0  ;;  %v969_v20 = vpop.f32.mrf.mxu1 }
 0x14b   : > { %1358 = vst.msk [vmem:[%s2063_s23 + $0x48] sm:$0xf] %vm1339_vm1, %v1664_v15  ;;  %1390 = vst.msk [vmem:[%s2063_s23 + $0xc8] sm:$0xf] %vm1339_vm1, %v1696_v16  ;;  %v1038_v21 = vmax.f32 %v840_v17, 0.0  ;;  %v1070_v22 = vmax.f32 %v968_v18, 0.0 }
 0x14c   : > { %v844_v23 = vpop.f32.mrf.mxu0  ;;  %v972_v24 = vpop.f32.mrf.mxu1 }
 0x14d   : > { %v1665_v25 = vpack.c.bf16 %v1038_v21, %v1038_v21  ;;  %v1697_v26 = vpack.c.bf16 %v1070_v22, %v1070_v22  ;;  %v845_v27 = vadd.f32 %v2055_v13, %v844_v23  ;;  %v973_v28 = vadd.f32 %v2055_v13, %v972_v24 }
 0x14e   : > { %v846_v29 = vpop.f32.mrf.mxu0  ;;  %v974_v30 = vpop.f32.mrf.mxu1 }
 0x14f   : > { %1359 = vst.msk [vmem:[%s2063_s23 + $0x4c] sm:$0xf] %vm1339_vm1, %v1665_v25  ;;  %1391 = vst.msk [vmem:[%s2063_s23 + $0xcc] sm:$0xf] %vm1339_vm1, %v1697_v26  ;;  %v1039_v31 = vmax.f32 %v845_v27, 0.0  ;;  %v1071_v32 = vmax.f32 %v973_v28, 0.0 }
 0x150   : > { %v847_v33 = vpop.f32.mrf.mxu0  ;;  %v975_v34 = vpop.f32.mrf.mxu1 }
 0x151   : > { %v1666_v35 = vpack.c.bf16 %v1039_v31, %v1039_v31  ;;  %v1698_v36 = vpack.c.bf16 %v1071_v32, %v1071_v32  ;;  %v848_v37 = vadd.f32 %v2055_v13, %v847_v33  ;;  %v976_v38 = vadd.f32 %v2055_v13, %v975_v34 }
 0x152   : > { %v849_v39 = vpop.f32.mrf.mxu0  ;;  %v977_v40 = vpop.f32.mrf.mxu1 }
 0x153   : > { %1360 = vst.msk [vmem:[%s2063_s23 + $0x50] sm:$0xf] %vm1339_vm1, %v1666_v35  ;;  %1392 = vst.msk [vmem:[%s2063_s23 + $0xd0] sm:$0xf] %vm1339_vm1, %v1698_v36  ;;  %v1040_v41 = vmax.f32 %v848_v37, 0.0  ;;  %v1072_v42 = vmax.f32 %v976_v38, 0.0 }
 0x154   : > { %v852_v43 = vpop.f32.mrf.mxu0  ;;  %v980_v44 = vpop.f32.mrf.mxu1 }
 0x155   : > { %v1667_v45 = vpack.c.bf16 %v1040_v41, %v1040_v41  ;;  %v1699_v46 = vpack.c.bf16 %v1072_v42, %v1072_v42  ;;  %v853_v47 = vadd.f32 %v2055_v13, %v852_v43  ;;  %v981_v48 = vadd.f32 %v2055_v13, %v980_v44 }
 0x156   : > { %v854_v49 = vpop.f32.mrf.mxu0  ;;  %v982_v50 = vpop.f32.mrf.mxu1 }
 0x157   : > { %1361 = vst.msk [vmem:[%s2063_s23 + $0x54] sm:$0xf] %vm1339_vm1, %v1667_v45  ;;  %1393 = vst.msk [vmem:[%s2063_s23 + $0xd4] sm:$0xf] %vm1339_vm1, %v1699_v46  ;;  %v1041_v51 = vmax.f32 %v853_v47, 0.0  ;;  %v1073_v52 = vmax.f32 %v981_v48, 0.0 }
 0x158   : > { %v855_v53 = vpop.f32.mrf.mxu0  ;;  %v983_v54 = vpop.f32.mrf.mxu1 }
 0x159   : > { %v1668_v55 = vpack.c.bf16 %v1041_v51, %v1041_v51  ;;  %v1700_v56 = vpack.c.bf16 %v1073_v52, %v1073_v52  ;;  %v856_v57 = vadd.f32 %v2055_v13, %v855_v53  ;;  %v984_v58 = vadd.f32 %v2055_v13, %v983_v54 }
 0x15a   : > { %v857_v59 = vpop.f32.mrf.mxu0  ;;  %v985_v60 = vpop.f32.mrf.mxu1 }
 0x15b   : > { %1362 = vst.msk [vmem:[%s2063_s23 + $0x58] sm:$0xf] %vm1339_vm1, %v1668_v55  ;;  %1394 = vst.msk [vmem:[%s2063_s23 + $0xd8] sm:$0xf] %vm1339_vm1, %v1700_v56  ;;  %v1042_v61 = vmax.f32 %v856_v57, 0.0  ;;  %v1074_v62 = vmax.f32 %v984_v58, 0.0 }
 0x15c   : > { %v860_v63 = vpop.f32.mrf.mxu0  ;;  %v988_v0 = vpop.f32.mrf.mxu1 }
 0x15d   : > { %v1669_v1 = vpack.c.bf16 %v1042_v61, %v1042_v61  ;;  %v1701_v2 = vpack.c.bf16 %v1074_v62, %v1074_v62  ;;  %v861_v3 = vadd.f32 %v2055_v13, %v860_v63  ;;  %v989_v4 = vadd.f32 %v2055_v13, %v988_v0 }
 0x15e   : > { %v862_v5 = vpop.f32.mrf.mxu0  ;;  %v990_v6 = vpop.f32.mrf.mxu1 }
 0x15f   : > { %1363 = vst.msk [vmem:[%s2063_s23 + $0x5c] sm:$0xf] %vm1339_vm1, %v1669_v1  ;;  %1395 = vst.msk [vmem:[%s2063_s23 + $0xdc] sm:$0xf] %vm1339_vm1, %v1701_v2  ;;  %v1043_v7 = vmax.f32 %v861_v3, 0.0  ;;  %v1075_v8 = vmax.f32 %v989_v4, 0.0 }
 0x160   : > { %v863_v9 = vpop.f32.mrf.mxu0  ;;  %v991_v10 = vpop.f32.mrf.mxu1 }
 0x161   : > { %v1670_v11 = vpack.c.bf16 %v1043_v7, %v1043_v7  ;;  %v1702_v12 = vpack.c.bf16 %v1075_v8, %v1075_v8  ;;  %v864_v14 = vadd.f32 %v2055_v13, %v863_v9  ;;  %v992_v15 = vadd.f32 %v2055_v13, %v991_v10 }
 0x162   : > { %v865_v16 = vpop.f32.mrf.mxu0  ;;  %v993_v17 = vpop.f32.mrf.mxu1 }
 0x163   : > { %1364 = vst.msk [vmem:[%s2063_s23 + $0x60] sm:$0xf] %vm1339_vm1, %v1670_v11  ;;  %1396 = vst.msk [vmem:[%s2063_s23 + $0xe0] sm:$0xf] %vm1339_vm1, %v1702_v12  ;;  %v1044_v18 = vmax.f32 %v864_v14, 0.0  ;;  %v1076_v19 = vmax.f32 %v992_v15, 0.0 }
 0x164   : > { %v868_v20 = vpop.f32.mrf.mxu0  ;;  %v996_v21 = vpop.f32.mrf.mxu1 }
 0x165   : > { %v1671_v22 = vpack.c.bf16 %v1044_v18, %v1044_v18  ;;  %v1703_v23 = vpack.c.bf16 %v1076_v19, %v1076_v19  ;;  %v869_v24 = vadd.f32 %v2055_v13, %v868_v20  ;;  %v997_v25 = vadd.f32 %v2055_v13, %v996_v21 }
 0x166   : > { %v870_v26 = vpop.f32.mrf.mxu0  ;;  %v998_v27 = vpop.f32.mrf.mxu1 }
 0x167   : > { %1365 = vst.msk [vmem:[%s2063_s23 + $0x64] sm:$0xf] %vm1339_vm1, %v1671_v22  ;;  %1397 = vst.msk [vmem:[%s2063_s23 + $0xe4] sm:$0xf] %vm1339_vm1, %v1703_v23  ;;  %v1045_v28 = vmax.f32 %v869_v24, 0.0  ;;  %v1077_v29 = vmax.f32 %v997_v25, 0.0 }
 0x168   : > { %v871_v30 = vpop.f32.mrf.mxu0  ;;  %v999_v31 = vpop.f32.mrf.mxu1 }
 0x169   : > { %v1672_v32 = vpack.c.bf16 %v1045_v28, %v1045_v28  ;;  %v1704_v33 = vpack.c.bf16 %v1077_v29, %v1077_v29  ;;  %v872_v34 = vadd.f32 %v2055_v13, %v871_v30  ;;  %v1000_v35 = vadd.f32 %v2055_v13, %v999_v31 }
 0x16a   : > { %v873_v36 = vpop.f32.mrf.mxu0  ;;  %v1001_v37 = vpop.f32.mrf.mxu1 }
 0x16b   : > { %1366 = vst.msk [vmem:[%s2063_s23 + $0x68] sm:$0xf] %vm1339_vm1, %v1672_v32  ;;  %1398 = vst.msk [vmem:[%s2063_s23 + $0xe8] sm:$0xf] %vm1339_vm1, %v1704_v33  ;;  %v1046_v38 = vmax.f32 %v872_v34, 0.0  ;;  %v1078_v39 = vmax.f32 %v1000_v35, 0.0 }
 0x16c   : > { %v876_v40 = vpop.f32.mrf.mxu0  ;;  %v1004_v41 = vpop.f32.mrf.mxu1 }
 0x16d   : > { %v1673_v42 = vpack.c.bf16 %v1046_v38, %v1046_v38  ;;  %v1705_v43 = vpack.c.bf16 %v1078_v39, %v1078_v39  ;;  %v877_v44 = vadd.f32 %v2055_v13, %v876_v40  ;;  %v1005_v45 = vadd.f32 %v2055_v13, %v1004_v41 }
 0x16e   : > { %v878_v46 = vpop.f32.mrf.mxu0  ;;  %v1006_v47 = vpop.f32.mrf.mxu1 }
 0x16f   : > { %1367 = vst.msk [vmem:[%s2063_s23 + $0x6c] sm:$0xf] %vm1339_vm1, %v1673_v42  ;;  %1399 = vst.msk [vmem:[%s2063_s23 + $0xec] sm:$0xf] %vm1339_vm1, %v1705_v43  ;;  %v1047_v48 = vmax.f32 %v877_v44, 0.0  ;;  %v1079_v49 = vmax.f32 %v1005_v45, 0.0 }
 0x170   : > { %v879_v50 = vpop.f32.mrf.mxu0  ;;  %v1007_v51 = vpop.f32.mrf.mxu1 }
 0x171   : > { %v1674_v52 = vpack.c.bf16 %v1047_v48, %v1047_v48  ;;  %v1706_v53 = vpack.c.bf16 %v1079_v49, %v1079_v49  ;;  %v880_v54 = vadd.f32 %v2055_v13, %v879_v50  ;;  %v1008_v55 = vadd.f32 %v2055_v13, %v1007_v51 }
 0x172   : > { %v881_v56 = vpop.f32.mrf.mxu0  ;;  %v1009_v57 = vpop.f32.mrf.mxu1 }
 0x173   : > { %1368 = vst.msk [vmem:[%s2063_s23 + $0x70] sm:$0xf] %vm1339_vm1, %v1674_v52  ;;  %1400 = vst.msk [vmem:[%s2063_s23 + $0xf0] sm:$0xf] %vm1339_vm1, %v1706_v53  ;;  %v1048_v58 = vmax.f32 %v880_v54, 0.0  ;;  %v1080_v59 = vmax.f32 %v1008_v55, 0.0 }
 0x174   : > { %v884_v60 = vpop.f32.mrf.mxu0  ;;  %v1012_v61 = vpop.f32.mrf.mxu1 }
 0x175   : > { %v1675_v62 = vpack.c.bf16 %v1048_v58, %v1048_v58  ;;  %v1707_v63 = vpack.c.bf16 %v1080_v59, %v1080_v59  ;;  %v885_v0 = vadd.f32 %v2055_v13, %v884_v60  ;;  %v1013_v1 = vadd.f32 %v2055_v13, %v1012_v61 }
 0x176   : > { %v886_v2 = vpop.f32.mrf.mxu0  ;;  %v1014_v3 = vpop.f32.mrf.mxu1 }
 0x177   : > { %1369 = vst.msk [vmem:[%s2063_s23 + $0x74] sm:$0xf] %vm1339_vm1, %v1675_v62  ;;  %1401 = vst.msk [vmem:[%s2063_s23 + $0xf4] sm:$0xf] %vm1339_vm1, %v1707_v63  ;;  %v1049_v4 = vmax.f32 %v885_v0, 0.0  ;;  %v1081_v5 = vmax.f32 %v1013_v1, 0.0 }
 0x178   : > { %v887_v6 = vpop.f32.mrf.mxu0  ;;  %v1015_v7 = vpop.f32.mrf.mxu1 }
 0x179   : > { %v1676_v8 = vpack.c.bf16 %v1049_v4, %v1049_v4  ;;  %v1708_v9 = vpack.c.bf16 %v1081_v5, %v1081_v5  ;;  %v888_v10 = vadd.f32 %v2055_v13, %v887_v6  ;;  %v1016_v11 = vadd.f32 %v2055_v13, %v1015_v7 }
 0x17a   : > { %v889_v12 = vpop.f32.mrf.mxu0  ;;  %v1017_v14 = vpop.f32.mrf.mxu1 }
 0x17b   : > { %1370 = vst.msk [vmem:[%s2063_s23 + $0x78] sm:$0xf] %vm1339_vm1, %v1676_v8  ;;  %1402 = vst.msk [vmem:[%s2063_s23 + $0xf8] sm:$0xf] %vm1339_vm1, %v1708_v9  ;;  %v1050_v15 = vmax.f32 %v888_v10, 0.0  ;;  %v1082_v16 = vmax.f32 %v1016_v11, 0.0 }
 0x17d   : > { %v1677_v17 = vpack.c.bf16 %v1050_v15, %v1050_v15  ;;  %v1709_v18 = vpack.c.bf16 %v1082_v16, %v1082_v16 }
 0x17f   : > { %1371 = vst.msk [vmem:[%s2063_s23 + $0x7c] sm:$0xf] %vm1339_vm1, %v1677_v17  ;;  %1403 = vst.msk [vmem:[%s2063_s23 + $0xfc] sm:$0xf] %vm1339_vm1, %v1709_v18 }
 0x180 PF: > { %s13_s12 = sadd.s32 1, %s1857_s12  }
 0x181   : > { %p10_p4 = scmp.ge.s32.totalorder %s13_s12, 4  }
 0x183   :  { %12 = sbr.rel (!%p10_p4) target bundleno = 1 (0x1), region = 62 }

// kernel: qnetwork_cnn_forward.5
= control target key start
LH: loop header
LB: loop body
LE: loop exit
PB: predicated region body
PF: predicated region fallthrough
CT: control target
= control target key end

     0   :  { %vm880_vm0 = vcmask 519168   ;;  %s1637_s1 = inlined_call_operand.vmem [shape: bf16[512,64], index: 1, kind: input, shape index: {}]   ;;  %s1638_s0 = inlined_call_operand.vmem [shape: bf16[168,512], index: 0, kind: input, shape index: {}]   ;;  %s1639_s2 = inlined_call_operand.vmem [shape: f32[1,64], index: 2, kind: input, shape index: {}]   ;;  %s1640_s3 = inlined_call_operand.vmem [shape: bf16[168,64], index: 3, kind: output, shape index: {}]  }
   0x1   :  { %v1189_v0 = vld [vmem:[%s1637_s1 + $0x78] sm:$0xff]   ;;  %v1193_v4 = vld [vmem:[%s1637_s1 + $0x70] sm:$0xff]   ;;  %v1197_v8 = vld [vmem:[%s1637_s1 + $0x68] sm:$0xff]  }
   0x2   :  { %v1190_v1 = vld [vmem:[%s1637_s1 + $0xf8] sm:$0xff]   ;;  %1025 = vmatprep.subr.bf16.mxu0 %v1189_v0  ;;  %v1194_v5 = vld [vmem:[%s1637_s1 + $0xf0] sm:$0xff]   ;;  %v1198_v9 = vld [vmem:[%s1637_s1 + $0xe8] sm:$0xff]  }
   0x3   :  { %v1191_v2 = vld [vmem:[%s1637_s1 + $0x38] sm:$0xff]   ;;  %1107 = vmatprep.subr.bf16.mxu1 %v1190_v1  ;;  %v1195_v6 = vld [vmem:[%s1637_s1 + $0x30] sm:$0xff]   ;;  %v1199_v10 = vld [vmem:[%s1637_s1 + $0x28] sm:$0xff]  }
   0x4   :  { %v1192_v3 = vld [vmem:[%s1637_s1 + $0xb8] sm:$0xff]   ;;  %1026 = vmatpush3.bf16.msra.mxu0 %v1191_v2  ;;  %v1196_v7 = vld [vmem:[%s1637_s1 + $0xb0] sm:$0xff]   ;;  %v1200_v11 = vld [vmem:[%s1637_s1 + $0xa8] sm:$0xff]  }
   0x5   :  { %1108 = vmatpush3.bf16.msra.mxu1 %v1192_v3  ;;  %1027 = vmatprep.subr.bf16.mxu0 %v1193_v4  ;;  %v1201_v12 = vld [vmem:[%s1637_s1 + $0x60] sm:$0xff]   ;;  %v1205_v16 = vld [vmem:[%s1637_s1 + $0x58] sm:$0xff]   ;;  %v1209_v20 = vld [vmem:[%s1637_s1 + $0x50] sm:$0xff]  }
   0x6   :  { %1109 = vmatprep.subr.bf16.mxu1 %v1194_v5  ;;  %v1202_v13 = vld [vmem:[%s1637_s1 + $0xe0] sm:$0xff]   ;;  %v1206_v17 = vld [vmem:[%s1637_s1 + $0xd8] sm:$0xff]   ;;  %v1210_v21 = vld [vmem:[%s1637_s1 + $0xd0] sm:$0xff]  }
   0x7   :  { %v1203_v14 = vld [vmem:[%s1637_s1 + $0x20] sm:$0xff]   ;;  %v1207_v18 = vld [vmem:[%s1637_s1 + $0x18] sm:$0xff]   ;;  %v1211_v22 = vld [vmem:[%s1637_s1 + $0x10] sm:$0xff]  }
   0x8   :  { %1028 = vmatpush3.bf16.msra.mxu0 %v1195_v6  ;;  %v1204_v15 = vld [vmem:[%s1637_s1 + $0xa0] sm:$0xff]   ;;  %v1208_v19 = vld [vmem:[%s1637_s1 + $0x98] sm:$0xff]   ;;  %v1212_v23 = vld [vmem:[%s1637_s1 + $0x90] sm:$0xff]  }
   0x9   :  { %1110 = vmatpush3.bf16.msra.mxu1 %v1196_v7  ;;  %1029 = vmatprep.subr.bf16.mxu0 %v1197_v8  ;;  %v1213_v24 = vld [vmem:[%s1637_s1 + $0x48] sm:$0xff]   ;;  %v1217_v28 = vld [vmem:[%s1637_s1 + $0x40] sm:$0xff]  }
   0xa   :  { %1111 = vmatprep.subr.bf16.mxu1 %v1198_v9  ;;  %v1214_v25 = vld [vmem:[%s1637_s1 + $0xc8] sm:$0xff]   ;;  %v1218_v29 = vld [vmem:[%s1637_s1 + $0xc0] sm:$0xff]  }
   0xb   :  { %v1215_v26 = vld [vmem:[%s1637_s1 + $0x8] sm:$0xff]   ;;  %v1219_v30 = vld [vmem:[%s1637_s1] sm:$0xff]  }
   0xc   :  { %1030 = vmatpush3.bf16.msra.mxu0 %v1199_v10  ;;  %v1216_v27 = vld [vmem:[%s1637_s1 + $0x88] sm:$0xff]   ;;  %v1220_v31 = vld [vmem:[%s1637_s1 + $0x80] sm:$0xff]  }
   0xd   :  { %1112 = vmatpush3.bf16.msra.mxu1 %v1200_v11  ;;  %1031 = vmatprep.subr.bf16.mxu0 %v1201_v12  ;;  %v1221_v32 = vld [vmem:[%s1638_s0] ss:$16 sps:$4 sm:$0xff]   ;;  %v1223_v33 = vld [vmem:[%s1638_s0 + $0x4] ss:$16 sps:$4 sm:$0xff]   ;;  %v1224_v34 = vld [vmem:[%s1638_s0 + $0x8] ss:$16 sps:$4 sm:$0xff]  }
   0xe   :  { %1113 = vmatprep.subr.bf16.mxu1 %v1202_v13  ;;  %v1226_v35 = vld [vmem:[%s1638_s0 + $0xc] ss:$16 sps:$4 sm:$0xff]   ;;  %566 = vmatprep.mubr.bf16.mxu0 %v1223_v33  ;;  %v1227_v36 = vld [vmem:[%s1638_s0 + $0x24] ss:$16 sps:$4 sm:$0xff]   ;;  %v1231_v38 = vld [vmem:[%s1638_s0 + $0x20] ss:$16 sps:$4 sm:$0xff]  }
   0xf   :  { %686 = vmatprep.mubr.bf16.mxu1 %v1226_v35  ;;  %v1229_v37 = vld [vmem:[%s1638_s0 + $0x2c] ss:$16 sps:$4 sm:$0xff]   ;;  %v1232_v39 = vld [vmem:[%s1638_s0 + $0x28] ss:$16 sps:$4 sm:$0xff]   ;;  %v1233_v40 = vld [vmem:[%s1638_s0 + $0x44] ss:$16 sps:$4 sm:$0xff]  }
  0x10   :  { %1032 = vmatpush3.bf16.msra.mxu0 %v1203_v14  ;;  %v1235_v41 = vld [vmem:[%s1638_s0 + $0x4c] ss:$16 sps:$4 sm:$0xff]   ;;  %v1237_v42 = vld [vmem:[%s1638_s0 + $0x40] ss:$16 sps:$4 sm:$0xff]   ;;  %v1238_v43 = vld [vmem:[%s1638_s0 + $0x48] ss:$16 sps:$4 sm:$0xff]  }
  0x11   :  { %1114 = vmatpush3.bf16.msra.mxu1 %v1204_v15  ;;  %1033 = vmatprep.subr.bf16.mxu0 %v1205_v16  ;;  %v1239_v44 = vld [vmem:[%s1638_s0 + $0x64] ss:$16 sps:$4 sm:$0xff]   ;;  %v1241_v45 = vld [vmem:[%s1638_s0 + $0x6c] ss:$16 sps:$4 sm:$0xff]   ;;  %v1243_v46 = vld [vmem:[%s1638_s0 + $0x60] ss:$16 sps:$4 sm:$0xff]  }
  0x12   :  { %1115 = vmatprep.subr.bf16.mxu1 %v1206_v17  ;;  %v1244_v47 = vld [vmem:[%s1638_s0 + $0x68] ss:$16 sps:$4 sm:$0xff]   ;;  %v1245_v48 = vld [vmem:[%s1638_s0 + $0x84] ss:$16 sps:$4 sm:$0xff]   ;;  %v1247_v49 = vld [vmem:[%s1638_s0 + $0x8c] ss:$16 sps:$4 sm:$0xff]  }
  0x13   :  { %v1249_v50 = vld [vmem:[%s1638_s0 + $0x80] ss:$16 sps:$4 sm:$0xff]   ;;  %v1250_v51 = vld [vmem:[%s1638_s0 + $0x88] ss:$16 sps:$4 sm:$0xff]   ;;  %v1251_v52 = vld [vmem:[%s1638_s0 + $0xa4] ss:$16 sps:$4 sm:$0xff]  }
  0x14   :  { %1034 = vmatpush3.bf16.msra.mxu0 %v1207_v18  ;;  %v1253_v53 = vld [vmem:[%s1638_s0 + $0xac] ss:$16 sps:$4 sm:$0xff]   ;;  %v1255_v54 = vld [vmem:[%s1638_s0 + $0xa0] ss:$16 sps:$4 sm:$0xff]   ;;  %v1256_v55 = vld [vmem:[%s1638_s0 + $0xa8] ss:$16 sps:$4 sm:$0xff]  }
  0x15   :  { %1116 = vmatpush3.bf16.msra.mxu1 %v1208_v19  ;;  %1035 = vmatprep.subr.bf16.mxu0 %v1209_v20  ;;  %v1257_v56 = vld [vmem:[%s1638_s0 + $0xc4] ss:$16 sps:$4 sm:$0xff]   ;;  %v1259_v57 = vld [vmem:[%s1638_s0 + $0xcc] ss:$16 sps:$4 sm:$0xff]   ;;  %v1261_v58 = vld [vmem:[%s1638_s0 + $0xc0] ss:$16 sps:$4 sm:$0xff]  }
  0x16   :  { %1117 = vmatprep.subr.bf16.mxu1 %v1210_v21  ;;  %v1262_v59 = vld [vmem:[%s1638_s0 + $0xc8] ss:$16 sps:$4 sm:$0xff]   ;;  %v1263_v60 = vld [vmem:[%s1638_s0 + $0xe4] ss:$16 sps:$4 sm:$0xff]   ;;  %v1265_v61 = vld [vmem:[%s1638_s0 + $0xec] ss:$16 sps:$4 sm:$0xff]  }
  0x17   :  { %v1267_v62 = vld [vmem:[%s1638_s0 + $0xe0] ss:$16 sps:$4 sm:$0xff]   ;;  %v1268_v63 = vld [vmem:[%s1638_s0 + $0xe8] ss:$16 sps:$4 sm:$0xff]   ;;  %v1269_v0 = vld [vmem:[%s1638_s0 + $0x104] ss:$16 sps:$4 sm:$0xff]  }
  0x18   :  { %1036 = vmatpush3.bf16.msra.mxu0 %v1211_v22  ;;  %v1271_v1 = vld [vmem:[%s1638_s0 + $0x10c] ss:$16 sps:$4 sm:$0xff]   ;;  %v1273_v2 = vld [vmem:[%s1638_s0 + $0x100] ss:$16 sps:$4 sm:$0xff]   ;;  %v1274_v3 = vld [vmem:[%s1638_s0 + $0x108] ss:$16 sps:$4 sm:$0xff]  }
  0x19   :  { %1118 = vmatpush3.bf16.msra.mxu1 %v1212_v23  ;;  %1037 = vmatprep.subr.bf16.mxu0 %v1213_v24  ;;  %v1275_v4 = vld [vmem:[%s1638_s0 + $0x124] ss:$16 sps:$4 sm:$0xff]   ;;  %v1277_v5 = vld [vmem:[%s1638_s0 + $0x12c] ss:$16 sps:$4 sm:$0xff]   ;;  %v1279_v8 = vld [vmem:[%s1638_s0 + $0x120] ss:$16 sps:$4 sm:$0xff]  }
  0x1a   :  { %1119 = vmatprep.subr.bf16.mxu1 %v1214_v25  ;;  %v55_v6 = vld [vmem:[%s1638_s0 + $0x140] sm:$0xff]  ;;  %v56_v7 = vld [vmem:[%s1638_s0 + $0x148] sm:$0xff] }
  0x1b   :  { %v1280_v9 = vld [vmem:[%s1638_s0 + $0x128] ss:$16 sps:$4 sm:$0xff]   ;;  %v948_v10 = vcombine.high %v55_v6, %v55_v6  ;;  %v950_v11 = vcombine.high %v56_v7, %v56_v7  ;;  %v947_v12 = vcombine.low %v55_v6, %v55_v6  ;;  %v949_v13 = vcombine.low %v56_v7, %v56_v7  ;;  %v1530_v16 = vld [vmem:[%s1639_s2] ss:$0 sm:$0xff] }
  0x1c   :  { %1038 = vmatpush3.bf16.msra.mxu0 %v1215_v26 }
  0x1d   :  { %1120 = vmatpush3.bf16.msra.mxu1 %v1216_v27  ;;  %1039 = vmatprep.subr.bf16.mxu0 %v1217_v28 }
  0x1e   :  { %1121 = vmatprep.subr.bf16.mxu1 %v1218_v29 }
  0x20   :  { %1040 = vmatpush3.bf16.msra.mxu0 %v1219_v30 }
  0x21   :  { %1122 = vmatpush3.bf16.msra.mxu1 %v1220_v31 }
  0x23   :  { %567 = vmatmul.mubr.bf16.vlgmr.msra.gmra.mxu0 %v1221_v32 }
  0x24   :  { %687 = vmatmul.mubr.bf16.vlgmr.msra.gmra.mxu1 %v1224_v34  ;;  %574 = vmatprep.mubr.bf16.mxu0 %v1227_v36 }
  0x25   :  { %694 = vmatprep.mubr.bf16.mxu1 %v1229_v37 }
  0x2b   :  { %575 = vmatmul.mubr.bf16.gmra.mxu0 %v1231_v38 }
  0x2c   :  { %695 = vmatmul.mubr.bf16.gmra.mxu1 %v1232_v39  ;;  %582 = vmatprep.mubr.bf16.mxu0 %v1233_v40 }
  0x2d   :  { %702 = vmatprep.mubr.bf16.mxu1 %v1235_v41 }
  0x33   :  { %583 = vmatmul.mubr.bf16.gmra.mxu0 %v1237_v42 }
  0x34   :  { %703 = vmatmul.mubr.bf16.gmra.mxu1 %v1238_v43  ;;  %590 = vmatprep.mubr.bf16.mxu0 %v1239_v44 }
  0x35   :  { %710 = vmatprep.mubr.bf16.mxu1 %v1241_v45 }
  0x3b   :  { %591 = vmatmul.mubr.bf16.gmra.mxu0 %v1243_v46 }
  0x3c   :  { %711 = vmatmul.mubr.bf16.gmra.mxu1 %v1244_v47  ;;  %598 = vmatprep.mubr.bf16.mxu0 %v1245_v48 }
  0x3d   :  { %718 = vmatprep.mubr.bf16.mxu1 %v1247_v49 }
  0x43   :  { %599 = vmatmul.mubr.bf16.gmra.mxu0 %v1249_v50 }
  0x44   :  { %719 = vmatmul.mubr.bf16.gmra.mxu1 %v1250_v51  ;;  %606 = vmatprep.mubr.bf16.mxu0 %v1251_v52 }
  0x45   :  { %726 = vmatprep.mubr.bf16.mxu1 %v1253_v53 }
  0x4b   :  { %607 = vmatmul.mubr.bf16.gmra.mxu0 %v1255_v54 }
  0x4c   :  { %727 = vmatmul.mubr.bf16.gmra.mxu1 %v1256_v55  ;;  %614 = vmatprep.mubr.bf16.mxu0 %v1257_v56 }
  0x4d   :  { %734 = vmatprep.mubr.bf16.mxu1 %v1259_v57 }
  0x53   :  { %615 = vmatmul.mubr.bf16.gmra.mxu0 %v1261_v58 }
  0x54   :  { %735 = vmatmul.mubr.bf16.gmra.mxu1 %v1262_v59  ;;  %622 = vmatprep.mubr.bf16.mxu0 %v1263_v60 }
  0x55   :  { %742 = vmatprep.mubr.bf16.mxu1 %v1265_v61 }
  0x5b   :  { %623 = vmatmul.mubr.bf16.gmra.mxu0 %v1267_v62 }
  0x5c   :  { %743 = vmatmul.mubr.bf16.gmra.mxu1 %v1268_v63  ;;  %630 = vmatprep.mubr.bf16.mxu0 %v1269_v0 }
  0x5d   :  { %750 = vmatprep.mubr.bf16.mxu1 %v1271_v1 }
  0x63   :  { %631 = vmatmul.mubr.bf16.gmra.mxu0 %v1273_v2 }
  0x64   :  { %751 = vmatmul.mubr.bf16.gmra.mxu1 %v1274_v3  ;;  %638 = vmatprep.mubr.bf16.mxu0 %v1275_v4 }
  0x65   :  { %758 = vmatprep.mubr.bf16.mxu1 %v1277_v5 }
  0x6b   :  { %639 = vmatmul.mubr.bf16.gmra.mxu0 %v1279_v8 }
  0x6c   :  { %759 = vmatmul.mubr.bf16.gmra.mxu1 %v1280_v9  ;;  %646 = vmatprep.mubr.bf16.mxu0 %v948_v10 }
  0x6d   :  { %766 = vmatprep.mubr.bf16.mxu1 %v950_v11 }
  0x73   :  { %647 = vmatmul.mubr.bf16.gmra.mxu0 %v947_v12 }
  0x74   :  { %767 = vmatmul.mubr.bf16.gmra.mxu1 %v949_v13 }
  0xe3   :  { %v1041_v14 = vpop.f32.mrf.mxu0 }
  0xe4   :  { %v1123_v15 = vpop.f32.mrf.mxu1 }
  0xe5   :  { %v1042_v17 = vpop.f32.mrf.mxu0 }
  0xe6   :  { %v1043_v18 = vadd.f32 %v1042_v17, %v1041_v14  ;;  %v1124_v19 = vpop.f32.mrf.mxu1 }
  0xe7   :  { %v1044_v20 = vpop.f32.mrf.mxu0  ;;  %v1125_v22 = vadd.f32 %v1124_v19, %v1123_v15 }
  0xe8   :  { %v569_v21 = vadd.f32 %v1043_v18, %v1530_v16  ;;  %v1126_v23 = vpop.f32.mrf.mxu1 }
  0xe9   :  { %v1045_v24 = vpop.f32.mrf.mxu0 }
  0xea   :  { %v689_v25 = vadd.f32 %v1125_v22, %v569_v21  ;;  %v1046_v26 = vadd.f32 %v1045_v24, %v1044_v20  ;;  %v1127_v27 = vpop.f32.mrf.mxu1 }
  0xeb   :  { %v1047_v28 = vpop.f32.mrf.mxu0  ;;  %v1128_v31 = vadd.f32 %v1127_v27, %v1126_v23 }
  0xec   :  { %v774_v29 = vmax.f32 %v689_v25, 0.0  ;;  %v572_v30 = vadd.f32 %v1046_v26, %v1530_v16  ;;  %v1129_v32 = vpop.f32.mrf.mxu1 }
  0xed   :  { %v1048_v33 = vpop.f32.mrf.mxu0 }
  0xee   :  { %v1004_v34 = vpack.c.bf16 %v774_v29, %v774_v29  ;;  %v692_v35 = vadd.f32 %v1128_v31, %v572_v30  ;;  %v1049_v36 = vadd.f32 %v1048_v33, %v1047_v28  ;;  %v1130_v37 = vpop.f32.mrf.mxu1 }
  0xef   :  { %v1050_v38 = vpop.f32.mrf.mxu0  ;;  %v1131_v41 = vadd.f32 %v1130_v37, %v1129_v32 }
  0xf0   :  { %881 = vst.msk [vmem:[%s1640_s3] sm:$0xf] %vm880_vm0, %v1004_v34  ;;  %v775_v39 = vmax.f32 %v692_v35, 0.0  ;;  %v577_v40 = vadd.f32 %v1049_v36, %v1530_v16  ;;  %v1132_v42 = vpop.f32.mrf.mxu1 }
  0xf1   :  { %v1051_v43 = vpop.f32.mrf.mxu0 }
  0xf2   :  { %v1005_v44 = vpack.c.bf16 %v775_v39, %v775_v39  ;;  %v697_v45 = vadd.f32 %v1131_v41, %v577_v40  ;;  %v1052_v46 = vadd.f32 %v1051_v43, %v1050_v38  ;;  %v1133_v47 = vpop.f32.mrf.mxu1 }
  0xf3   :  { %v1053_v48 = vpop.f32.mrf.mxu0  ;;  %v1134_v51 = vadd.f32 %v1133_v47, %v1132_v42 }
  0xf4   :  { %882 = vst.msk [vmem:[%s1640_s3 + $0x4] sm:$0xf] %vm880_vm0, %v1005_v44  ;;  %v776_v49 = vmax.f32 %v697_v45, 0.0  ;;  %v580_v50 = vadd.f32 %v1052_v46, %v1530_v16  ;;  %v1135_v52 = vpop.f32.mrf.mxu1 }
  0xf5   :  { %v1054_v53 = vpop.f32.mrf.mxu0 }
  0xf6   :  { %v1006_v54 = vpack.c.bf16 %v776_v49, %v776_v49  ;;  %v700_v55 = vadd.f32 %v1134_v51, %v580_v50  ;;  %v1055_v56 = vadd.f32 %v1054_v53, %v1053_v48  ;;  %v1136_v57 = vpop.f32.mrf.mxu1 }
  0xf7   :  { %v1056_v58 = vpop.f32.mrf.mxu0  ;;  %v1137_v61 = vadd.f32 %v1136_v57, %v1135_v52 }
  0xf8   :  { %883 = vst.msk [vmem:[%s1640_s3 + $0x8] sm:$0xf] %vm880_vm0, %v1006_v54  ;;  %v777_v59 = vmax.f32 %v700_v55, 0.0  ;;  %v585_v60 = vadd.f32 %v1055_v56, %v1530_v16  ;;  %v1138_v62 = vpop.f32.mrf.mxu1 }
  0xf9   :  { %v1057_v63 = vpop.f32.mrf.mxu0 }
  0xfa   :  { %v1007_v0 = vpack.c.bf16 %v777_v59, %v777_v59  ;;  %v705_v1 = vadd.f32 %v1137_v61, %v585_v60  ;;  %v1058_v2 = vadd.f32 %v1057_v63, %v1056_v58  ;;  %v1139_v3 = vpop.f32.mrf.mxu1 }
  0xfb   :  { %v1059_v4 = vpop.f32.mrf.mxu0  ;;  %v1140_v7 = vadd.f32 %v1139_v3, %v1138_v62 }
  0xfc   :  { %884 = vst.msk [vmem:[%s1640_s3 + $0xc] sm:$0xf] %vm880_vm0, %v1007_v0  ;;  %v778_v5 = vmax.f32 %v705_v1, 0.0  ;;  %v588_v6 = vadd.f32 %v1058_v2, %v1530_v16  ;;  %v1141_v8 = vpop.f32.mrf.mxu1 }
  0xfd   :  { %v1060_v9 = vpop.f32.mrf.mxu0 }
  0xfe   :  { %v1008_v10 = vpack.c.bf16 %v778_v5, %v778_v5  ;;  %v708_v11 = vadd.f32 %v1140_v7, %v588_v6  ;;  %v1061_v12 = vadd.f32 %v1060_v9, %v1059_v4  ;;  %v1142_v13 = vpop.f32.mrf.mxu1 }
  0xff   :  { %v1062_v14 = vpop.f32.mrf.mxu0  ;;  %v1143_v18 = vadd.f32 %v1142_v13, %v1141_v8 }
 0x100   :  { %885 = vst.msk [vmem:[%s1640_s3 + $0x10] sm:$0xf] %vm880_vm0, %v1008_v10  ;;  %v779_v15 = vmax.f32 %v708_v11, 0.0  ;;  %v593_v17 = vadd.f32 %v1061_v12, %v1530_v16  ;;  %v1144_v19 = vpop.f32.mrf.mxu1 }
 0x101   :  { %v1063_v20 = vpop.f32.mrf.mxu0 }
 0x102   :  { %v1009_v21 = vpack.c.bf16 %v779_v15, %v779_v15  ;;  %v713_v22 = vadd.f32 %v1143_v18, %v593_v17  ;;  %v1064_v23 = vadd.f32 %v1063_v20, %v1062_v14  ;;  %v1145_v24 = vpop.f32.mrf.mxu1 }
 0x103   :  { %v1065_v25 = vpop.f32.mrf.mxu0  ;;  %v1146_v28 = vadd.f32 %v1145_v24, %v1144_v19 }
 0x104   :  { %886 = vst.msk [vmem:[%s1640_s3 + $0x14] sm:$0xf] %vm880_vm0, %v1009_v21  ;;  %v780_v26 = vmax.f32 %v713_v22, 0.0  ;;  %v596_v27 = vadd.f32 %v1064_v23, %v1530_v16  ;;  %v1147_v29 = vpop.f32.mrf.mxu1 }
 0x105   :  { %v1066_v30 = vpop.f32.mrf.mxu0 }
 0x106   :  { %v1010_v31 = vpack.c.bf16 %v780_v26, %v780_v26  ;;  %v716_v32 = vadd.f32 %v1146_v28, %v596_v27  ;;  %v1067_v33 = vadd.f32 %v1066_v30, %v1065_v25  ;;  %v1148_v34 = vpop.f32.mrf.mxu1 }
 0x107   :  { %v1068_v35 = vpop.f32.mrf.mxu0  ;;  %v1149_v38 = vadd.f32 %v1148_v34, %v1147_v29 }
 0x108   :  { %887 = vst.msk [vmem:[%s1640_s3 + $0x18] sm:$0xf] %vm880_vm0, %v1010_v31  ;;  %v781_v36 = vmax.f32 %v716_v32, 0.0  ;;  %v601_v37 = vadd.f32 %v1067_v33, %v1530_v16  ;;  %v1150_v39 = vpop.f32.mrf.mxu1 }
 0x109   :  { %v1069_v40 = vpop.f32.mrf.mxu0 }
 0x10a   :  { %v1011_v41 = vpack.c.bf16 %v781_v36, %v781_v36  ;;  %v721_v42 = vadd.f32 %v1149_v38, %v601_v37  ;;  %v1070_v43 = vadd.f32 %v1069_v40, %v1068_v35  ;;  %v1151_v44 = vpop.f32.mrf.mxu1 }
 0x10b   :  { %v1071_v45 = vpop.f32.mrf.mxu0  ;;  %v1152_v48 = vadd.f32 %v1151_v44, %v1150_v39 }
 0x10c   :  { %888 = vst.msk [vmem:[%s1640_s3 + $0x1c] sm:$0xf] %vm880_vm0, %v1011_v41  ;;  %v782_v46 = vmax.f32 %v721_v42, 0.0  ;;  %v604_v47 = vadd.f32 %v1070_v43, %v1530_v16  ;;  %v1153_v49 = vpop.f32.mrf.mxu1 }
 0x10d   :  { %v1072_v50 = vpop.f32.mrf.mxu0 }
 0x10e   :  { %v1012_v51 = vpack.c.bf16 %v782_v46, %v782_v46  ;;  %v724_v52 = vadd.f32 %v1152_v48, %v604_v47  ;;  %v1073_v53 = vadd.f32 %v1072_v50, %v1071_v45  ;;  %v1154_v54 = vpop.f32.mrf.mxu1 }
 0x10f   :  { %v1074_v55 = vpop.f32.mrf.mxu0  ;;  %v1155_v58 = vadd.f32 %v1154_v54, %v1153_v49 }
 0x110   :  { %889 = vst.msk [vmem:[%s1640_s3 + $0x20] sm:$0xf] %vm880_vm0, %v1012_v51  ;;  %v783_v56 = vmax.f32 %v724_v52, 0.0  ;;  %v609_v57 = vadd.f32 %v1073_v53, %v1530_v16  ;;  %v1156_v59 = vpop.f32.mrf.mxu1 }
 0x111   :  { %v1075_v60 = vpop.f32.mrf.mxu0 }
 0x112   :  { %v1013_v61 = vpack.c.bf16 %v783_v56, %v783_v56  ;;  %v729_v62 = vadd.f32 %v1155_v58, %v609_v57  ;;  %v1076_v63 = vadd.f32 %v1075_v60, %v1074_v55  ;;  %v1157_v0 = vpop.f32.mrf.mxu1 }
 0x113   :  { %v1077_v1 = vpop.f32.mrf.mxu0  ;;  %v1158_v4 = vadd.f32 %v1157_v0, %v1156_v59 }
 0x114   :  { %890 = vst.msk [vmem:[%s1640_s3 + $0x24] sm:$0xf] %vm880_vm0, %v1013_v61  ;;  %v784_v2 = vmax.f32 %v729_v62, 0.0  ;;  %v612_v3 = vadd.f32 %v1076_v63, %v1530_v16  ;;  %v1159_v5 = vpop.f32.mrf.mxu1 }
 0x115   :  { %v1078_v6 = vpop.f32.mrf.mxu0 }
 0x116   :  { %v1014_v7 = vpack.c.bf16 %v784_v2, %v784_v2  ;;  %v732_v8 = vadd.f32 %v1158_v4, %v612_v3  ;;  %v1079_v9 = vadd.f32 %v1078_v6, %v1077_v1  ;;  %v1160_v10 = vpop.f32.mrf.mxu1 }
 0x117   :  { %v1080_v11 = vpop.f32.mrf.mxu0  ;;  %v1161_v14 = vadd.f32 %v1160_v10, %v1159_v5 }
 0x118   :  { %891 = vst.msk [vmem:[%s1640_s3 + $0x28] sm:$0xf] %vm880_vm0, %v1014_v7  ;;  %v785_v12 = vmax.f32 %v732_v8, 0.0  ;;  %v617_v13 = vadd.f32 %v1079_v9, %v1530_v16  ;;  %v1162_v15 = vpop.f32.mrf.mxu1 }
 0x119   :  { %v1081_v17 = vpop.f32.mrf.mxu0 }
 0x11a   :  { %v1015_v18 = vpack.c.bf16 %v785_v12, %v785_v12  ;;  %v737_v19 = vadd.f32 %v1161_v14, %v617_v13  ;;  %v1082_v20 = vadd.f32 %v1081_v17, %v1080_v11  ;;  %v1163_v21 = vpop.f32.mrf.mxu1 }
 0x11b   :  { %v1083_v22 = vpop.f32.mrf.mxu0  ;;  %v1164_v25 = vadd.f32 %v1163_v21, %v1162_v15 }
 0x11c   :  { %892 = vst.msk [vmem:[%s1640_s3 + $0x2c] sm:$0xf] %vm880_vm0, %v1015_v18  ;;  %v786_v23 = vmax.f32 %v737_v19, 0.0  ;;  %v620_v24 = vadd.f32 %v1082_v20, %v1530_v16  ;;  %v1165_v26 = vpop.f32.mrf.mxu1 }
 0x11d   :  { %v1084_v27 = vpop.f32.mrf.mxu0 }
 0x11e   :  { %v1016_v28 = vpack.c.bf16 %v786_v23, %v786_v23  ;;  %v740_v29 = vadd.f32 %v1164_v25, %v620_v24  ;;  %v1085_v30 = vadd.f32 %v1084_v27, %v1083_v22  ;;  %v1166_v31 = vpop.f32.mrf.mxu1 }
 0x11f   :  { %v1086_v32 = vpop.f32.mrf.mxu0  ;;  %v1167_v35 = vadd.f32 %v1166_v31, %v1165_v26 }
 0x120   :  { %893 = vst.msk [vmem:[%s1640_s3 + $0x30] sm:$0xf] %vm880_vm0, %v1016_v28  ;;  %v787_v33 = vmax.f32 %v740_v29, 0.0  ;;  %v625_v34 = vadd.f32 %v1085_v30, %v1530_v16  ;;  %v1168_v36 = vpop.f32.mrf.mxu1 }
 0x121   :  { %v1087_v37 = vpop.f32.mrf.mxu0 }
 0x122   :  { %v1017_v38 = vpack.c.bf16 %v787_v33, %v787_v33  ;;  %v745_v39 = vadd.f32 %v1167_v35, %v625_v34  ;;  %v1088_v40 = vadd.f32 %v1087_v37, %v1086_v32  ;;  %v1169_v41 = vpop.f32.mrf.mxu1 }
 0x123   :  { %v1089_v42 = vpop.f32.mrf.mxu0  ;;  %v1170_v45 = vadd.f32 %v1169_v41, %v1168_v36 }
 0x124   :  { %894 = vst.msk [vmem:[%s1640_s3 + $0x34] sm:$0xf] %vm880_vm0, %v1017_v38  ;;  %v788_v43 = vmax.f32 %v745_v39, 0.0  ;;  %v628_v44 = vadd.f32 %v1088_v40, %v1530_v16  ;;  %v1171_v46 = vpop.f32.mrf.mxu1 }
 0x125   :  { %v1090_v47 = vpop.f32.mrf.mxu0 }
 0x126   :  { %v1018_v48 = vpack.c.bf16 %v788_v43, %v788_v43  ;;  %v748_v49 = vadd.f32 %v1170_v45, %v628_v44  ;;  %v1091_v50 = vadd.f32 %v1090_v47, %v1089_v42  ;;  %v1172_v51 = vpop.f32.mrf.mxu1 }
 0x127   :  { %v1092_v52 = vpop.f32.mrf.mxu0  ;;  %v1173_v55 = vadd.f32 %v1172_v51, %v1171_v46 }
 0x128   :  { %895 = vst.msk [vmem:[%s1640_s3 + $0x38] sm:$0xf] %vm880_vm0, %v1018_v48  ;;  %v789_v53 = vmax.f32 %v748_v49, 0.0  ;;  %v633_v54 = vadd.f32 %v1091_v50, %v1530_v16  ;;  %v1174_v56 = vpop.f32.mrf.mxu1 }
 0x129   :  { %v1093_v57 = vpop.f32.mrf.mxu0 }
 0x12a   :  { %v1019_v58 = vpack.c.bf16 %v789_v53, %v789_v53  ;;  %v753_v59 = vadd.f32 %v1173_v55, %v633_v54  ;;  %v1094_v60 = vadd.f32 %v1093_v57, %v1092_v52  ;;  %v1175_v61 = vpop.f32.mrf.mxu1 }
 0x12b   :  { %v1095_v62 = vpop.f32.mrf.mxu0  ;;  %v1176_v1 = vadd.f32 %v1175_v61, %v1174_v56 }
 0x12c   :  { %896 = vst.msk [vmem:[%s1640_s3 + $0x3c] sm:$0xf] %vm880_vm0, %v1019_v58  ;;  %v790_v63 = vmax.f32 %v753_v59, 0.0  ;;  %v636_v0 = vadd.f32 %v1094_v60, %v1530_v16  ;;  %v1177_v2 = vpop.f32.mrf.mxu1 }
 0x12d   :  { %v1096_v3 = vpop.f32.mrf.mxu0 }
 0x12e   :  { %v1020_v4 = vpack.c.bf16 %v790_v63, %v790_v63  ;;  %v756_v5 = vadd.f32 %v1176_v1, %v636_v0  ;;  %v1097_v6 = vadd.f32 %v1096_v3, %v1095_v62  ;;  %v1178_v7 = vpop.f32.mrf.mxu1 }
 0x12f   :  { %v1098_v8 = vpop.f32.mrf.mxu0  ;;  %v1179_v11 = vadd.f32 %v1178_v7, %v1177_v2 }
 0x130   :  { %897 = vst.msk [vmem:[%s1640_s3 + $0x40] sm:$0xf] %vm880_vm0, %v1020_v4  ;;  %v791_v9 = vmax.f32 %v756_v5, 0.0  ;;  %v641_v10 = vadd.f32 %v1097_v6, %v1530_v16  ;;  %v1180_v12 = vpop.f32.mrf.mxu1 }
 0x131   :  { %v1099_v13 = vpop.f32.mrf.mxu0 }
 0x132   :  { %v1021_v14 = vpack.c.bf16 %v791_v9, %v791_v9  ;;  %v761_v15 = vadd.f32 %v1179_v11, %v641_v10  ;;  %v1100_v17 = vadd.f32 %v1099_v13, %v1098_v8  ;;  %v1181_v18 = vpop.f32.mrf.mxu1 }
 0x133   :  { %v1101_v19 = vpop.f32.mrf.mxu0  ;;  %v1182_v22 = vadd.f32 %v1181_v18, %v1180_v12 }
 0x134   :  { %898 = vst.msk [vmem:[%s1640_s3 + $0x44] sm:$0xf] %vm880_vm0, %v1021_v14  ;;  %v792_v20 = vmax.f32 %v761_v15, 0.0  ;;  %v644_v21 = vadd.f32 %v1100_v17, %v1530_v16  ;;  %v1183_v23 = vpop.f32.mrf.mxu1 }
 0x135   :  { %v1102_v24 = vpop.f32.mrf.mxu0 }
 0x136   :  { %v1022_v25 = vpack.c.bf16 %v792_v20, %v792_v20  ;;  %v764_v26 = vadd.f32 %v1182_v22, %v644_v21  ;;  %v1103_v27 = vadd.f32 %v1102_v24, %v1101_v19  ;;  %v1184_v28 = vpop.f32.mrf.mxu1 }
 0x137   :  { %v1104_v29 = vpop.f32.mrf.mxu0  ;;  %v1185_v32 = vadd.f32 %v1184_v28, %v1183_v23 }
 0x138   :  { %899 = vst.msk [vmem:[%s1640_s3 + $0x48] sm:$0xf] %vm880_vm0, %v1022_v25  ;;  %v793_v30 = vmax.f32 %v764_v26, 0.0  ;;  %v649_v31 = vadd.f32 %v1103_v27, %v1530_v16  ;;  %v1186_v33 = vpop.f32.mrf.mxu1 }
 0x139   :  { %v1105_v34 = vpop.f32.mrf.mxu0 }
 0x13a   :  { %v1023_v35 = vpack.c.bf16 %v793_v30, %v793_v30  ;;  %v769_v36 = vadd.f32 %v1185_v32, %v649_v31  ;;  %v1187_v37 = vpop.f32.mrf.mxu1 }
 0x13c   :  { %900 = vst.msk [vmem:[%s1640_s3 + $0x4c] sm:$0xf] %vm880_vm0, %v1023_v35  ;;  %v794_v38 = vmax.f32 %v769_v36, 0.0 }
 0x13e   :  { %v1024_v39 = vpack.c.bf16 %v794_v38, %v794_v38 }
 0x140   :  { %901 = vst.msk [vmem:[%s1640_s3 + $0x50] sm:$0xf] %vm880_vm0, %v1024_v39 }

// kernel: qnetwork_cnn_forward.6
= control target key start
LH: loop header
LB: loop body
LE: loop exit
PB: predicated region body
PF: predicated region fallthrough
CT: control target
= control target key end

     0   :  { %v1247_v34 = vmov 0.0   ;;  %vm1248_vm0 = vmmov 0   ;;  %vm516_vm1 = vcmask 523264   ;;  %vm868_vm2 = vcmask 519168   ;;  %s1647_s1 = inlined_call_operand.vmem [shape: bf16[576,64], index: 1, kind: input, shape index: {}]   ;;  %s1648_s0 = inlined_call_operand.vmem [shape: bf16[104,576], index: 0, kind: input, shape index: {}]   ;;  %s1649_s2 = inlined_call_operand.vmem [shape: f32[1,64], index: 2, kind: input, shape index: {}]   ;;  %s1650_s3 = inlined_call_operand.vmem [shape: bf16[104,64], index: 3, kind: output, shape index: {}]  }
   0x1   :  { %v1164_v0 = vld [vmem:[%s1647_s1 + $0x78] sm:$0xff]   ;;  %v1168_v4 = vld [vmem:[%s1647_s1 + $0x70] sm:$0xff]   ;;  %v1172_v8 = vld [vmem:[%s1647_s1 + $0x68] sm:$0xff]  }
   0x2   :  { %v1165_v1 = vld [vmem:[%s1647_s1 + $0xf8] sm:$0xff]   ;;  %991 = vmatprep.subr.bf16.mxu0 %v1164_v0  ;;  %v1169_v5 = vld [vmem:[%s1647_s1 + $0xf0] sm:$0xff]   ;;  %v1173_v9 = vld [vmem:[%s1647_s1 + $0xe8] sm:$0xff]  }
   0x3   :  { %v1166_v2 = vld [vmem:[%s1647_s1 + $0x38] sm:$0xff]   ;;  %1049 = vmatprep.subr.bf16.mxu1 %v1165_v1  ;;  %v1170_v6 = vld [vmem:[%s1647_s1 + $0x30] sm:$0xff]   ;;  %v1174_v10 = vld [vmem:[%s1647_s1 + $0x28] sm:$0xff]  }
   0x4   :  { %v1167_v3 = vld [vmem:[%s1647_s1 + $0xb8] sm:$0xff]   ;;  %992 = vmatpush3.bf16.msra.mxu0 %v1166_v2  ;;  %v1171_v7 = vld [vmem:[%s1647_s1 + $0xb0] sm:$0xff]   ;;  %v1175_v11 = vld [vmem:[%s1647_s1 + $0xa8] sm:$0xff]  }
   0x5   :  { %1050 = vmatpush3.bf16.msra.mxu1 %v1167_v3  ;;  %993 = vmatprep.subr.bf16.mxu0 %v1168_v4  ;;  %v1176_v12 = vld [vmem:[%s1647_s1 + $0x60] sm:$0xff]   ;;  %v1180_v16 = vld [vmem:[%s1647_s1 + $0x58] sm:$0xff]   ;;  %v1184_v20 = vld [vmem:[%s1647_s1 + $0x50] sm:$0xff]  }
   0x6   :  { %1051 = vmatprep.subr.bf16.mxu1 %v1169_v5  ;;  %v1177_v13 = vld [vmem:[%s1647_s1 + $0xe0] sm:$0xff]   ;;  %v1181_v17 = vld [vmem:[%s1647_s1 + $0xd8] sm:$0xff]   ;;  %v1185_v21 = vld [vmem:[%s1647_s1 + $0xd0] sm:$0xff]  }
   0x7   :  { %v1178_v14 = vld [vmem:[%s1647_s1 + $0x20] sm:$0xff]   ;;  %v1182_v18 = vld [vmem:[%s1647_s1 + $0x18] sm:$0xff]   ;;  %v1186_v22 = vld [vmem:[%s1647_s1 + $0x10] sm:$0xff]  }
   0x8   :  { %994 = vmatpush3.bf16.msra.mxu0 %v1170_v6  ;;  %v1179_v15 = vld [vmem:[%s1647_s1 + $0xa0] sm:$0xff]   ;;  %v1183_v19 = vld [vmem:[%s1647_s1 + $0x98] sm:$0xff]   ;;  %v1187_v23 = vld [vmem:[%s1647_s1 + $0x90] sm:$0xff]  }
   0x9   :  { %1052 = vmatpush3.bf16.msra.mxu1 %v1171_v7  ;;  %995 = vmatprep.subr.bf16.mxu0 %v1172_v8  ;;  %v1188_v24 = vld [vmem:[%s1647_s1 + $0x48] sm:$0xff]   ;;  %v1192_v28 = vld [vmem:[%s1647_s1 + $0x40] sm:$0xff]   ;;  %v1202_v37 = vld [vmem:[%s1647_s1 + $0x118] sm:$0xff]  }
   0xa   :  { %1053 = vmatprep.subr.bf16.mxu1 %v1173_v9  ;;  %v1189_v25 = vld [vmem:[%s1647_s1 + $0xc8] sm:$0xff]   ;;  %v1193_v29 = vld [vmem:[%s1647_s1 + $0xc0] sm:$0xff]   ;;  %v1213_v43 = vld [vmem:[%s1647_s1 + $0x110] sm:$0xff]  }
   0xb   :  { %v1190_v26 = vld [vmem:[%s1647_s1 + $0x8] sm:$0xff]   ;;  %v1194_v30 = vld [vmem:[%s1647_s1] sm:$0xff]   ;;  %v1211_v44 = vld [vmem:[%s1648_s0 + $0x5c] ss:$20 sps:$4 sm:$0xff]  }
   0xc   :  { %996 = vmatpush3.bf16.msra.mxu0 %v1174_v10  ;;  %v1191_v27 = vld [vmem:[%s1647_s1 + $0x88] sm:$0xff]   ;;  %v1195_v31 = vld [vmem:[%s1647_s1 + $0x80] sm:$0xff]   ;;  %v1216_v48 = vld [vmem:[%s1648_s0 + $0x7c] ss:$20 sps:$4 sm:$0xff]  }
   0xd   :  { %1054 = vmatpush3.bf16.msra.mxu1 %v1175_v11  ;;  %997 = vmatprep.subr.bf16.mxu0 %v1176_v12  ;;  %v1196_v32 = vld [vmem:[%s1648_s0] ss:$20 sps:$4 sm:$0xff]   ;;  %v1198_v33 = vld [vmem:[%s1648_s0 + $0x4] ss:$20 sps:$4 sm:$0xff]   ;;  %v1199_v35 = vld [vmem:[%s1648_s0 + $0x8] ss:$20 sps:$4 sm:$0xff]  }
   0xe   :  { %1055 = vmatprep.subr.bf16.mxu1 %v1177_v13  ;;  %v1201_v36 = vld [vmem:[%s1648_s0 + $0xc] ss:$20 sps:$4 sm:$0xff]   ;;  %570 = vmatprep.mubr.bf16.mxu0 %v1198_v33  ;;  %v1205_v39 = vld [vmem:[%s1648_s0 + $0x34] ss:$20 sps:$4 sm:$0xff]   ;;  %v1208_v41 = vld [vmem:[%s1648_s0 + $0x30] ss:$20 sps:$4 sm:$0xff]  }
   0xf   :  { %658 = vmatprep.mubr.bf16.mxu1 %v1201_v36  ;;  %v1203_v38 = vld [vmem:[%s1648_s0 + $0x2c] ss:$20 sps:$4 sm:$0xff]   ;;  %v1207_v40 = vld [vmem:[%s1648_s0 + $0x28] ss:$20 sps:$4 sm:$0xff]   ;;  %v1214_v46 = vld [vmem:[%s1648_s0 + $0x50] ss:$20 sps:$4 sm:$0xff]  }
  0x10   :  { %998 = vmatpush3.bf16.msra.mxu0 %v1178_v14  ;;  %v1209_v42 = vld [vmem:[%s1648_s0 + $0x54] ss:$20 sps:$4 sm:$0xff]   ;;  %v1215_v47 = vld [vmem:[%s1648_s0 + $0x58] ss:$20 sps:$4 sm:$0xff]   ;;  %v1235_v50 = vld [vmem:[%s1647_s1 + $0x100] sm:$0xff]  }
  0x11   :  { %1056 = vmatpush3.bf16.msra.mxu1 %v1179_v15  ;;  %999 = vmatprep.subr.bf16.mxu0 %v1180_v16  ;;  %v1222_v45 = vld [vmem:[%s1647_s1 + $0x108] sm:$0xff]   ;;  %v1218_v49 = vld [vmem:[%s1648_s0 + $0x84] ss:$20 sps:$4 sm:$0xff]   ;;  %v1221_v52 = vld [vmem:[%s1648_s0 + $0x80] ss:$20 sps:$4 sm:$0xff]  }
  0x12   :  { %1057 = vmatprep.subr.bf16.mxu1 %v1181_v17  ;;  %v1220_v51 = vld [vmem:[%s1648_s0 + $0x78] ss:$20 sps:$4 sm:$0xff]   ;;  %v1227_v55 = vld [vmem:[%s1648_s0 + $0xa0] ss:$20 sps:$4 sm:$0xff]   ;;  %v1228_v56 = vld [vmem:[%s1648_s0 + $0xa8] ss:$20 sps:$4 sm:$0xff]  }
  0x13   :  { %v1223_v53 = vld [vmem:[%s1648_s0 + $0xa4] ss:$20 sps:$4 sm:$0xff]   ;;  %v1225_v54 = vld [vmem:[%s1648_s0 + $0xac] ss:$20 sps:$4 sm:$0xff]   ;;  %v1231_v58 = vld [vmem:[%s1648_s0 + $0xd4] ss:$20 sps:$4 sm:$0xff]  }
  0x14   :  { %1000 = vmatpush3.bf16.msra.mxu0 %v1182_v18  ;;  %v1229_v57 = vld [vmem:[%s1648_s0 + $0xcc] ss:$20 sps:$4 sm:$0xff]   ;;  %v51_v59 = vld [vmem:[%s1648_s0 + $0xf0] sm:$0xff]  ;;  %v52_v60 = vld [vmem:[%s1648_s0 + $0xf8] sm:$0xff] }
  0x15   :  { %1058 = vmatpush3.bf16.msra.mxu1 %v1183_v19  ;;  %1001 = vmatprep.subr.bf16.mxu0 %v1184_v20  ;;  %v1233_v61 = vld [vmem:[%s1648_s0 + $0xc8] ss:$20 sps:$4 sm:$0xff]   ;;  %v1234_v62 = vld [vmem:[%s1648_s0 + $0xd0] ss:$20 sps:$4 sm:$0xff]   ;;  %v918_v63 = vcombine.high %v51_v59, %v51_v59  ;;  %v920_v0 = vcombine.high %v52_v60, %v52_v60  ;;  %v917_v1 = vcombine.low %v51_v59, %v51_v59  ;;  %v1242_v5 = vld [vmem:[%s1648_s0 + $0x38] ss:$20 sps:$4 sm:$0xff]  }
  0x16   :  { %1059 = vmatprep.subr.bf16.mxu1 %v1185_v21  ;;  %v919_v2 = vcombine.low %v52_v60, %v52_v60  ;;  %v1240_v3 = vld [vmem:[%s1648_s0 + $0x10] ss:$20 sps:$4 sm:$0xff]   ;;  %v1243_v6 = vld [vmem:[%s1648_s0 + $0xd8] ss:$20 sps:$4 sm:$0xff]   ;;  %v1244_v7 = vld [vmem:[%s1648_s0 + $0x60] ss:$20 sps:$4 sm:$0xff]  }
  0x17   :  { %v1241_v4 = vld [vmem:[%s1648_s0 + $0xb0] ss:$20 sps:$4 sm:$0xff]   ;;  %v1245_v8 = vld [vmem:[%s1648_s0 + $0x100] ss:$0 sps:$4 sm:$0xff]   ;;  %v1246_v9 = vld [vmem:[%s1648_s0 + $0x88] ss:$20 sps:$4 sm:$0xff]  }
  0x18   :  { %1002 = vmatpush3.bf16.msra.mxu0 %v1186_v22  ;;  %v1552_v59 = vld [vmem:[%s1649_s2] ss:$0 sm:$0xff] }
  0x19   :  { %1060 = vmatpush3.bf16.msra.mxu1 %v1187_v23  ;;  %1003 = vmatprep.subr.bf16.mxu0 %v1188_v24 }
  0x1a   :  { %1061 = vmatprep.subr.bf16.mxu1 %v1189_v25 }
  0x1c   :  { %1004 = vmatpush3.bf16.msra.mxu0 %v1190_v26 }
  0x1d   :  { %1062 = vmatpush3.bf16.msra.mxu1 %v1191_v27  ;;  %1005 = vmatprep.subr.bf16.mxu0 %v1192_v28 }
  0x1e   :  { %1063 = vmatprep.subr.bf16.mxu1 %v1193_v29 }
  0x20   :  { %1006 = vmatpush3.bf16.msra.mxu0 %v1194_v30 }
  0x21   :  { %1064 = vmatpush3.bf16.msra.mxu1 %v1195_v31  ;;  %1118 = vmatprep.subr.bf16.mxu0 %v1247_v34 }
  0x22   :  { %1154 = vmatprep.subr.bf16.mxu1 %v1247_v34 }
  0x23   :  { %571 = vmatmul.mubr.bf16.vlgmr.msra.gmra.mxu0 %v1196_v32 }
  0x24   :  { %659 = vmatmul.mubr.bf16.vlgmr.msra.gmra.mxu1 %v1199_v35  ;;  %1119 = vmatpush3.bf16.msra.mxu0 %v1202_v37 }
  0x25   :  { %578 = vmatprep.mubr.bf16.mxu0 %v1203_v38  ;;  %1158 = vmatpush3.bf16.msra.mxu1 %v1202_v37 }
  0x26   :  { %666 = vmatprep.mubr.bf16.mxu1 %v1205_v39  ;;  %1120 = vmatprep.subr.bf16.mxu0 %v1247_v34 }
  0x27   :  { %1155 = vmatprep.subr.bf16.mxu1 %v1247_v34 }
  0x28   :  { %1121 = vmatpush3.bf16.msra.mxu0 %v1213_v43 }
  0x29   :  { %1159 = vmatpush3.bf16.msra.mxu1 %v1213_v43  ;;  %1122 = vmatprep.subr.bf16.mxu0 %v1247_v34 }
  0x2a   :  { %1156 = vmatprep.subr.bf16.mxu1 %v1247_v34 }
  0x2b   :  { %579 = vmatmul.mubr.bf16.gmra.mxu0 %v1207_v40 }
  0x2c   :  { %667 = vmatmul.mubr.bf16.gmra.mxu1 %v1208_v41  ;;  %586 = vmatprep.mubr.bf16.mxu0 %v1209_v42 }
  0x2d   :  { %674 = vmatprep.mubr.bf16.mxu1 %v1211_v44  ;;  %1123 = vmatpush3.bf16.msra.mxu0 %v1222_v45 }
  0x2e   :  { %1160 = vmatpush3.bf16.msra.mxu1 %v1222_v45  ;;  %1124 = vmatprep.subr.bf16.mxu0 %v1247_v34 }
  0x2f   :  { %1157 = vmatprep.subr.bf16.mxu1 %v1247_v34 }
  0x31   :  { %1125 = vmatpush3.bf16.msra.mxu0 %v1235_v50 }
  0x32   :  { %1161 = vmatpush3.bf16.msra.mxu1 %v1235_v50 }
  0x33   :  { %587 = vmatmul.mubr.bf16.gmra.mxu0 %v1214_v46 }
  0x34   :  { %675 = vmatmul.mubr.bf16.gmra.mxu1 %v1215_v47  ;;  %594 = vmatprep.mubr.bf16.mxu0 %v1216_v48 }
  0x35   :  { %682 = vmatprep.mubr.bf16.mxu1 %v1218_v49 }
  0x3b   :  { %595 = vmatmul.mubr.bf16.gmra.mxu0 %v1220_v51 }
  0x3c   :  { %683 = vmatmul.mubr.bf16.gmra.mxu1 %v1221_v52  ;;  %602 = vmatprep.mubr.bf16.mxu0 %v1223_v53 }
  0x3d   :  { %690 = vmatprep.mubr.bf16.mxu1 %v1225_v54 }
  0x43   :  { %603 = vmatmul.mubr.bf16.gmra.mxu0 %v1227_v55 }
  0x44   :  { %691 = vmatmul.mubr.bf16.gmra.mxu1 %v1228_v56  ;;  %610 = vmatprep.mubr.bf16.mxu0 %v1229_v57 }
  0x45   :  { %698 = vmatprep.mubr.bf16.mxu1 %v1231_v58 }
  0x4b   :  { %611 = vmatmul.mubr.bf16.gmra.mxu0 %v1233_v61 }
  0x4c   :  { %699 = vmatmul.mubr.bf16.gmra.mxu1 %v1234_v62  ;;  %618 = vmatprep.mubr.bf16.mxu0 %v918_v63 }
  0x4d   :  { %706 = vmatprep.mubr.bf16.mxu1 %v920_v0 }
  0x53   :  { %619 = vmatmul.mubr.bf16.gmra.mxu0 %v917_v1 }
  0x54   :  { %707 = vmatmul.mubr.bf16.gmra.mxu1 %v919_v2  ;;  %1126 = vmatprep.mubr.msk.bf16.mxu0 %vm1248_vm0, %v1247_v34 }
  0x55   :  { %1142 = vmatprep.mubr.msk.bf16.mxu1 %vm1248_vm0, %v1247_v34 }
  0x5b   :  { %1127 = vmatmul.mubr.msk.bf16.vlgmr.msra.gmra.mxu0 %vm516_vm1, %v1240_v3 }
  0x5c   :  { %1143 = vmatmul.mubr.msk.bf16.vlgmr.msra.gmra.mxu1 %vm516_vm1, %v1241_v4  ;;  %1130 = vmatprep.mubr.msk.bf16.mxu0 %vm1248_vm0, %v1247_v34 }
  0x5d   :  { %1146 = vmatprep.mubr.msk.bf16.mxu1 %vm1248_vm0, %v1247_v34 }
  0x63   :  { %1131 = vmatmul.mubr.msk.bf16.gmra.mxu0 %vm516_vm1, %v1242_v5 }
  0x64   :  { %1147 = vmatmul.mubr.msk.bf16.gmra.mxu1 %vm516_vm1, %v1243_v6  ;;  %1134 = vmatprep.mubr.msk.bf16.mxu0 %vm1248_vm0, %v1247_v34 }
  0x65   :  { %1150 = vmatprep.mubr.msk.bf16.mxu1 %vm1248_vm0, %v1247_v34 }
  0x6b   :  { %1135 = vmatmul.mubr.msk.bf16.gmra.mxu0 %vm516_vm1, %v1244_v7 }
  0x6c   :  { %1151 = vmatmul.mubr.msk.bf16.gmra.mxu1 %vm516_vm1, %v1245_v8  ;;  %1138 = vmatprep.mubr.msk.bf16.mxu0 %vm1248_vm0, %v1247_v34 }
  0x73   :  { %1139 = vmatmul.mubr.msk.bf16.gmra.mxu0 %vm516_vm1, %v1246_v9 }
  0xe3   :  { %v1007_v10 = vpop.f32.mrf.mxu0 }
  0xe4   :  { %v1065_v11 = vpop.f32.mrf.mxu1 }
  0xe5   :  { %v1008_v12 = vpop.f32.mrf.mxu0 }
  0xe6   :  { %v1066_v13 = vpop.f32.mrf.mxu1  ;;  %v1009_v57 = vadd.f32 %v1008_v12, %v1007_v10 }
  0xe7   :  { %v1010_v14 = vpop.f32.mrf.mxu0  ;;  %v1067_v2 = vadd.f32 %v1066_v13, %v1065_v11 }
  0xe8   :  { %v1068_v15 = vpop.f32.mrf.mxu1  ;;  %v573_v1 = vadd.f32 %v1009_v57, %v1552_v59 }
  0xe9   :  { %v1011_v16 = vpop.f32.mrf.mxu0 }
  0xea   :  { %v1069_v17 = vpop.f32.mrf.mxu1  ;;  %v1012_v63 = vadd.f32 %v1011_v16, %v1010_v14  ;;  %v661_v14 = vadd.f32 %v1067_v2, %v573_v1 }
  0xeb   :  { %v1013_v18 = vpop.f32.mrf.mxu0  ;;  %v1070_v10 = vadd.f32 %v1069_v17, %v1068_v15 }
  0xec   :  { %v1505_v19 = vpop.f32.mrf.mxu1  ;;  %v576_v9 = vadd.f32 %v1012_v63, %v1552_v59 }
  0xed   :  { %v1014_v20 = vpop.f32.mrf.mxu0 }
  0xee   :  { %v1507_v21 = vpop.f32.mrf.mxu1  ;;  %v1015_v12 = vadd.f32 %v1014_v20, %v1013_v18  ;;  %v664_v15 = vadd.f32 %v1070_v10, %v576_v9 }
  0xef   :  { %v1509_v22 = vpop.f32.mrf.mxu0 }
  0xf0   :  { %v1511_v23 = vpop.f32.mrf.mxu1 }
  0xf1   :  { %v1513_v24 = vpop.f32.mrf.mxu0 }
  0xf2   :  { %v1515_v25 = vpop.f32.mrf.mxu1  ;;  %v1018_v17 = vadd.f32 %v1513_v24, %v1509_v22 }
  0xf3   :  { %v1517_v26 = vpop.f32.mrf.mxu0 }
  0xf4   :  { %v1519_v27 = vpop.f32.mrf.mxu1  ;;  %v584_v24 = vadd.f32 %v1018_v17, %v1552_v59 }
  0xf5   :  { %v1521_v28 = vpop.f32.mrf.mxu0 }
  0xf6   :  { %v1523_v29 = vpop.f32.mrf.mxu1 }
  0xf7   :  { %v1525_v30 = vpop.f32.mrf.mxu0 }
  0xf8   :  { %v1527_v31 = vpop.f32.mrf.mxu1 }
  0xf9   :  { %v1529_v32 = vpop.f32.mrf.mxu0 }
  0xfa   :  { %v1531_v33 = vpop.f32.mrf.mxu1 }
  0xfb   :  { %v1533_v34 = vpop.f32.mrf.mxu0 }
  0xfc   :  { %v1535_v35 = vpop.f32.mrf.mxu1 }
  0xfd   :  { %v1537_v36 = vpop.f32.mrf.mxu0 }
  0xfe   :  { %v1539_v37 = vpop.f32.mrf.mxu1 }
  0xff   :  { %v1541_v38 = vpop.f32.mrf.mxu0 }
 0x100   :  { %v1543_v39 = vpop.f32.mrf.mxu1 }
 0x101   :  { %1651 = vst [vmem:[#allocation2_spill] sm:$0xff] %v1543_v39  ;;  %v1545_v40 = vpop.f32.mrf.mxu0 }
 0x102   :  { %1652 = vst [vmem:[#allocation3_spill] sm:$0xff] %v1545_v40  ;;  %v1547_v41 = vpop.f32.mrf.mxu1 }
 0x103   :  { %1653 = vst [vmem:[#allocation4_spill] sm:$0xff] %v1547_v41  ;;  %v1031_v42 = vpop.f32.mrf.mxu0 }
 0x104   :  { %v1089_v43 = vpop.f32.mrf.mxu1 }
 0x105   :  { %v1032_v44 = vpop.f32.mrf.mxu0 }
 0x106   :  { %v1090_v45 = vpop.f32.mrf.mxu1  ;;  %v1033_v60 = vadd.f32 %v1032_v44, %v1031_v42 }
 0x107   :  { %v1034_v46 = vpop.f32.mrf.mxu0  ;;  %v1091_v5 = vadd.f32 %v1090_v45, %v1089_v43  ;;  %v581_v43 = vadd.f32 %v1015_v12, %v1552_v59  ;;  %v1073_v45 = vadd.f32 %v1507_v21, %v1505_v19  ;;  %v1076_v19 = vadd.f32 %v1515_v25, %v1511_v23 }
 0x108   :  { %v1092_v47 = vpop.f32.mrf.mxu1  ;;  %v605_v4 = vadd.f32 %v1033_v60, %v1552_v59 }
 0x109   :  { %v1035_v48 = vpop.f32.mrf.mxu0  ;;  %v669_v22 = vadd.f32 %v1073_v45, %v581_v43 }
 0x10a   :  { %v1093_v49 = vpop.f32.mrf.mxu1  ;;  %v1036_v6 = vadd.f32 %v1035_v48, %v1034_v46  ;;  %v693_v13 = vadd.f32 %v1091_v5, %v605_v4 }
 0x10b   :  { %v1037_v50 = vpop.f32.mrf.mxu0  ;;  %v1094_v57 = vadd.f32 %v1093_v49, %v1092_v47 }
 0x10c   :  { %v1095_v51 = vpop.f32.mrf.mxu1  ;;  %v608_v16 = vadd.f32 %v1036_v6, %v1552_v59 }
 0x10d   :  { %v1038_v52 = vpop.f32.mrf.mxu0 }
 0x10e   :  { %v1096_v53 = vpop.f32.mrf.mxu1  ;;  %v1039_v44 = vadd.f32 %v1038_v52, %v1037_v50  ;;  %v696_v60 = vadd.f32 %v1094_v57, %v608_v16 }
 0x10f   :  { %v1040_v54 = vpop.f32.mrf.mxu0  ;;  %v1097_v20 = vadd.f32 %v1096_v53, %v1095_v51 }
 0x110   :  { %v1098_v55 = vpop.f32.mrf.mxu1  ;;  %v613_v18 = vadd.f32 %v1039_v44, %v1552_v59 }
 0x111   :  { %v1041_v56 = vpop.f32.mrf.mxu0 }
 0x112   :  { %v1099_v58 = vpop.f32.mrf.mxu1  ;;  %v1042_v49 = vadd.f32 %v1041_v56, %v1040_v54  ;;  %v701_v54 = vadd.f32 %v1097_v20, %v613_v18 }
 0x113   :  { %v1043_v61 = vpop.f32.mrf.mxu0  ;;  %v1100_v23 = vadd.f32 %v1099_v58, %v1098_v55  ;;  %v1079_v55 = vadd.f32 %v1523_v29, %v1519_v27 }
 0x114   :  { %v1554_v62 = vpop.f32.mrf.mxu1  ;;  %v616_v56 = vadd.f32 %v1042_v49, %v1552_v59 }
 0x115   :  { %v1044_v0 = vpop.f32.mrf.mxu0 }
 0x116   :  { %v1557_v3 = vpop.f32.mrf.mxu1  ;;  %v1045_v25 = vadd.f32 %v1044_v0, %v1043_v61  ;;  %v672_v0 = vadd.f32 %v1076_v19, %v584_v24  ;;  %v704_v29 = vadd.f32 %v1100_v23, %v616_v56  ;;  %v1655_v24 = vld [vmem:[#allocation2_spill] sm:$0xff] }
 0x117   :  { %v1046_v7 = vpop.f32.mrf.mxu0 }
 0x118   :  { %v1104_v8 = vpop.f32.mrf.mxu1  ;;  %v621_v44 = vadd.f32 %v1045_v25, %v1552_v59 }
 0x119   :  { %v1047_v42 = vpop.f32.mrf.mxu0  ;;  %v1024_v8 = vadd.f32 %v1529_v32, %v1525_v30  ;;  %v1103_v30 = vadd.f32 %v1557_v3, %v1554_v62  ;;  %v1027_v62 = vadd.f32 %v1537_v36, %v1533_v34 }
 0x11a   :  { %v1105_v41 = vpop.f32.mrf.mxu1 }
 0x11b   :  { %v748_v11 = vpop.f32.mrf.mxu0  ;;  %v709_v17 = vadd.f32 %v1103_v30, %v621_v44 }
 0x11c   :  { %v749_v39 = vadd.f32 %v748_v11, %v661_v14  ;;  %v780_v40 = vpop.f32.mrf.mxu1  ;;  %v592_v11 = vadd.f32 %v1024_v8, %v1552_v59 }
 0x11d   :  { %v781_v46 = vadd.f32 %v780_v40, %v693_v13  ;;  %v1128_v48 = vpop.f32.mrf.mxu0  ;;  %v1082_v13 = vadd.f32 %v1531_v33, %v1527_v31 }
 0x11e   :  { %v802_v41 = vmax.f32 %v749_v39, 0.0  ;;  %v1144_v47 = vpop.f32.mrf.mxu1  ;;  %v1021_v39 = vadd.f32 %v1521_v28, %v1517_v26 }
 0x11f   :  { %v810_v50 = vmax.f32 %v781_v46, 0.0  ;;  %v751_v52 = vpop.f32.mrf.mxu0  ;;  %v680_v49 = vadd.f32 %v1082_v13, %v592_v11 }
 0x120   :  { %v978_v63 = vpack.c.bf16 %v802_v41, %v802_v41  ;;  %v752_v1 = vadd.f32 %v751_v52, %v664_v15  ;;  %v783_v2 = vpop.f32.mrf.mxu1  ;;  %v589_v42 = vadd.f32 %v1021_v39, %v1552_v59  ;;  %v1085_v52 = vadd.f32 %v1539_v37, %v1535_v35  ;;  %v1656_v39 = vld [vmem:[#allocation4_spill] sm:$0xff] }
 0x121   :  { %v986_v21 = vpack.c.bf16 %v810_v50, %v810_v50  ;;  %v784_v40 = vadd.f32 %v783_v2, %v696_v60  ;;  %v1129_v4 = vpop.f32.mrf.mxu0  ;;  %v597_v50 = vadd.f32 %v1027_v62, %v1552_v59  ;;  %v1654_v60 = vld [vmem:[#allocation3_spill] sm:$0xff] }
 0x122   :  { %869 = vst.msk [vmem:[%s1650_s3] sm:$0xf] %vm868_vm2, %v978_v63  ;;  %v803_v51 = vmax.f32 %v752_v1, 0.0  ;;  %v1145_v53 = vpop.f32.mrf.mxu1  ;;  %v677_v15 = vadd.f32 %v1079_v55, %v589_v42  ;;  %v1030_v63 = vadd.f32 %v1654_v60, %v1541_v38 }
 0x123   :  { %877 = vst.msk [vmem:[%s1650_s3 + $0x20] sm:$0xf] %vm868_vm2, %v986_v21  ;;  %v811_v5 = vmax.f32 %v784_v40, 0.0  ;;  %v756_v6 = vpop.f32.mrf.mxu0 }
 0x124   :  { %v979_v26 = vpack.c.bf16 %v803_v51, %v803_v51  ;;  %v757_v28 = vadd.f32 %v756_v6, %v669_v22  ;;  %v788_v7 = vpop.f32.mrf.mxu1  ;;  %v600_v38 = vadd.f32 %v1030_v63, %v1552_v59  ;;  %v1088_v51 = vadd.f32 %v1656_v39, %v1655_v24 }
 0x125   :  { %v987_v9 = vpack.c.bf16 %v811_v5, %v811_v5  ;;  %v789_v10 = vadd.f32 %v788_v7, %v701_v54  ;;  %v1132_v12 = vpop.f32.mrf.mxu0  ;;  %v685_v54 = vadd.f32 %v1085_v52, %v597_v50 }
 0x126   :  { %870 = vst.msk [vmem:[%s1650_s3 + $0x4] sm:$0xf] %vm868_vm2, %v979_v26  ;;  %v804_v58 = vmax.f32 %v757_v28, 0.0  ;;  %v1148_v61 = vpop.f32.mrf.mxu1  ;;  %v688_v26 = vadd.f32 %v1088_v51, %v600_v38 }
 0x127   :  { %878 = vst.msk [vmem:[%s1650_s3 + $0x24] sm:$0xf] %vm868_vm2, %v987_v9  ;;  %v812_v32 = vmax.f32 %v789_v10, 0.0  ;;  %v759_v27 = vpop.f32.mrf.mxu0 }
 0x128   :  { %v980_v14 = vpack.c.bf16 %v804_v58, %v804_v58  ;;  %v760_v16 = vadd.f32 %v759_v27, %v672_v0  ;;  %v791_v57 = vpop.f32.mrf.mxu1 }
 0x129   :  { %v988_v43 = vpack.c.bf16 %v812_v32, %v812_v32  ;;  %v792_v45 = vadd.f32 %v791_v57, %v704_v29  ;;  %v1133_v46 = vpop.f32.mrf.mxu0 }
 0x12a   :  { %871 = vst.msk [vmem:[%s1650_s3 + $0x8] sm:$0xf] %vm868_vm2, %v980_v14  ;;  %v805_v3 = vmax.f32 %v760_v16, 0.0  ;;  %v1149_v48 = vpop.f32.mrf.mxu1 }
 0x12b   :  { %879 = vst.msk [vmem:[%s1650_s3 + $0x28] sm:$0xf] %vm868_vm2, %v988_v43  ;;  %v813_v31 = vmax.f32 %v792_v45, 0.0  ;;  %v764_v33 = vpop.f32.mrf.mxu0 }
 0x12c   :  { %v981_v18 = vpack.c.bf16 %v805_v3, %v805_v3  ;;  %v765_v20 = vadd.f32 %v764_v33, %v677_v15  ;;  %v796_v41 = vpop.f32.mrf.mxu1 }
 0x12d   :  { %v989_v34 = vpack.c.bf16 %v813_v31, %v813_v31  ;;  %v797_v36 = vadd.f32 %v796_v41, %v709_v17  ;;  %v1136_v47 = vpop.f32.mrf.mxu0 }
 0x12e   :  { %872 = vst.msk [vmem:[%s1650_s3 + $0xc] sm:$0xf] %vm868_vm2, %v981_v18  ;;  %v806_v1 = vmax.f32 %v765_v20, 0.0  ;;  %v1152_v2 = vpop.f32.mrf.mxu1 }
 0x12f   :  { %880 = vst.msk [vmem:[%s1650_s3 + $0x2c] sm:$0xf] %vm868_vm2, %v989_v34  ;;  %v814_v19 = vmax.f32 %v797_v36, 0.0  ;;  %v767_v21 = vpop.f32.mrf.mxu0 }
 0x130   :  { %v982_v40 = vpack.c.bf16 %v806_v1, %v806_v1  ;;  %v768_v4 = vadd.f32 %v767_v21, %v680_v49  ;;  %v799_v35 = vpop.f32.mrf.mxu1 }
 0x131   :  { %v990_v37 = vpack.c.bf16 %v814_v19, %v814_v19  ;;  %v1137_v22 = vpop.f32.mrf.mxu0 }
 0x132   :  { %873 = vst.msk [vmem:[%s1650_s3 + $0x10] sm:$0xf] %vm868_vm2, %v982_v40  ;;  %v807_v53 = vmax.f32 %v768_v4, 0.0  ;;  %v1153_v56 = vpop.f32.mrf.mxu1 }
 0x133   :  { %881 = vst.msk [vmem:[%s1650_s3 + $0x30] sm:$0xf] %vm868_vm2, %v990_v37  ;;  %v772_v23 = vpop.f32.mrf.mxu0 }
 0x134   :  { %v983_v25 = vpack.c.bf16 %v807_v53, %v807_v53  ;;  %v773_v5 = vadd.f32 %v772_v23, %v685_v54 }
 0x135   :  { %v1140_v59 = vpop.f32.mrf.mxu0 }
 0x136   :  { %874 = vst.msk [vmem:[%s1650_s3 + $0x14] sm:$0xf] %vm868_vm2, %v983_v25  ;;  %v808_v6 = vmax.f32 %v773_v5, 0.0 }
 0x137   :  { %v775_v28 = vpop.f32.mrf.mxu0 }
 0x138   :  { %v984_v7 = vpack.c.bf16 %v808_v6, %v808_v6  ;;  %v776_v8 = vadd.f32 %v775_v28, %v688_v26 }
 0x139   :  { %v1141_v9 = vpop.f32.mrf.mxu0 }
 0x13a   :  { %875 = vst.msk [vmem:[%s1650_s3 + $0x18] sm:$0xf] %vm868_vm2, %v984_v7  ;;  %v809_v10 = vmax.f32 %v776_v8, 0.0 }
 0x13c   :  { %v985_v12 = vpack.c.bf16 %v809_v10, %v809_v10 }
 0x13e   :  { %876 = vst.msk [vmem:[%s1650_s3 + $0x1c] sm:$0xf] %vm868_vm2, %v985_v12 }

// kernel: qnetwork_cnn_forward.7
= control target key start
LH: loop header
LB: loop body
LE: loop exit
PB: predicated region body
PF: predicated region fallthrough
CT: control target
= control target key end

     0   :  { %vm4847_vm0 = vcmask 523264   ;;  %vm6268_vm1 = vcmask 31744   ;;  %s11145_s1 = inlined_call_operand.vmem [shape: bf16[3136,512], index: 1, kind: input, shape index: {}]   ;;  %s11146_s0 = inlined_call_operand.vmem [shape: bf16[8,3136], index: 0, kind: input, shape index: {}]   ;;  %s11147_s2 = inlined_call_operand.vmem [shape: f32[1,512], index: 2, kind: input, shape index: {}]   ;;  %s11148_s3 = inlined_call_operand.vmem [shape: bf16[512,4], index: 3, kind: input, shape index: {}]   ;;  %s11149_s4 = inlined_call_operand.vmem [shape: f32[1,4], index: 4, kind: input, shape index: {}]   ;;  %s11150_s5 = inlined_call_operand.vmem [shape: f32[8,4], index: 5, kind: output, shape index: {}]  }
   0x1   :  { %v7163_v0 = vld [vmem:[%s11145_s1 + $0xe4] ss:$16 sps:$4 sm:$0xff]   ;;  %v7167_v2 = vld [vmem:[%s11145_s1 + $0xe0] ss:$16 sps:$4 sm:$0xff]   ;;  %v22_v48 = vld [vmem:[%s11146_s0 + $0x8] sm:$0xff] }
   0x2   :  { %v7165_v1 = vld [vmem:[%s11145_s1 + $0x2e4] ss:$16 sps:$4 sm:$0xff]   ;;  %4851 = vmatprep.subr.bf16.mxu0 %v7163_v0  ;;  %v7168_v3 = vld [vmem:[%s11145_s1 + $0x2e0] ss:$16 sps:$4 sm:$0xff]   ;;  %v8581_v51 = vcombine.high %v22_v48, %v22_v48 }
   0x3   :  { %4892 = vmatprep.subr.bf16.mxu1 %v7165_v1  ;;  %v7169_v4 = vld [vmem:[%s11145_s1 + $0xc4] ss:$16 sps:$4 sm:$0xff]   ;;  %4852 = vmatpush1.bf16.msra.mxu0 %v7167_v2  ;;  %v7173_v6 = vld [vmem:[%s11145_s1 + $0xc0] ss:$16 sps:$4 sm:$0xff]  }
   0x4   :  { %4893 = vmatpush1.bf16.msra.mxu1 %v7168_v3  ;;  %v7171_v5 = vld [vmem:[%s11145_s1 + $0x2c4] ss:$16 sps:$4 sm:$0xff]   ;;  %4853 = vmatprep.subr.bf16.mxu0 %v7169_v4  ;;  %v7174_v7 = vld [vmem:[%s11145_s1 + $0x2c0] ss:$16 sps:$4 sm:$0xff]  }
   0x5   :  { %4894 = vmatprep.subr.bf16.mxu1 %v7171_v5  ;;  %v7175_v8 = vld [vmem:[%s11145_s1 + $0xa4] ss:$16 sps:$4 sm:$0xff]   ;;  %v7179_v10 = vld [vmem:[%s11145_s1 + $0xa0] ss:$16 sps:$4 sm:$0xff]   ;;  %4924 = vmatprep.mubr.bf16.mxu1 %v8581_v51 }
   0x6   :  { %v7177_v9 = vld [vmem:[%s11145_s1 + $0x2a4] ss:$16 sps:$4 sm:$0xff]   ;;  %v7180_v11 = vld [vmem:[%s11145_s1 + $0x2a0] ss:$16 sps:$4 sm:$0xff]  }
   0x7   :  { %4854 = vmatpush1.bf16.msra.mxu0 %v7173_v6  ;;  %v7181_v12 = vld [vmem:[%s11145_s1 + $0x84] ss:$16 sps:$4 sm:$0xff]   ;;  %v7185_v14 = vld [vmem:[%s11145_s1 + $0x80] ss:$16 sps:$4 sm:$0xff]  }
   0x8   :  { %4895 = vmatpush1.bf16.msra.mxu1 %v7174_v7  ;;  %4855 = vmatprep.subr.bf16.mxu0 %v7175_v8  ;;  %v7183_v13 = vld [vmem:[%s11145_s1 + $0x284] ss:$16 sps:$4 sm:$0xff]   ;;  %v7186_v15 = vld [vmem:[%s11145_s1 + $0x280] ss:$16 sps:$4 sm:$0xff]   ;;  %v8641_v7 = vcombine.low %v22_v48, %v22_v48 }
   0x9   :  { %4896 = vmatprep.subr.bf16.mxu1 %v7177_v9  ;;  %v7187_v16 = vld [vmem:[%s11145_s1 + $0x64] ss:$16 sps:$4 sm:$0xff]   ;;  %v7191_v18 = vld [vmem:[%s11145_s1 + $0x60] ss:$16 sps:$4 sm:$0xff]  }
   0xa   :  { %v7189_v17 = vld [vmem:[%s11145_s1 + $0x264] ss:$16 sps:$4 sm:$0xff]   ;;  %v7192_v19 = vld [vmem:[%s11145_s1 + $0x260] ss:$16 sps:$4 sm:$0xff]  }
   0xb   :  { %4856 = vmatpush1.bf16.msra.mxu0 %v7179_v10  ;;  %v7193_v20 = vld [vmem:[%s11145_s1 + $0x44] ss:$16 sps:$4 sm:$0xff]   ;;  %v7197_v22 = vld [vmem:[%s11145_s1 + $0x40] ss:$16 sps:$4 sm:$0xff]  }
   0xc   :  { %4897 = vmatpush1.bf16.msra.mxu1 %v7180_v11  ;;  %4857 = vmatprep.subr.bf16.mxu0 %v7181_v12  ;;  %v7195_v21 = vld [vmem:[%s11145_s1 + $0x244] ss:$16 sps:$4 sm:$0xff]   ;;  %v7198_v23 = vld [vmem:[%s11145_s1 + $0x240] ss:$16 sps:$4 sm:$0xff]  }
   0xd   :  { %4898 = vmatprep.subr.bf16.mxu1 %v7183_v13  ;;  %v7199_v24 = vld [vmem:[%s11145_s1 + $0x24] ss:$16 sps:$4 sm:$0xff]   ;;  %v7203_v26 = vld [vmem:[%s11145_s1 + $0x20] ss:$16 sps:$4 sm:$0xff]  }
   0xe   :  { %v7201_v25 = vld [vmem:[%s11145_s1 + $0x224] ss:$16 sps:$4 sm:$0xff]   ;;  %v7204_v27 = vld [vmem:[%s11145_s1 + $0x220] ss:$16 sps:$4 sm:$0xff]  }
   0xf   :  { %4858 = vmatpush1.bf16.msra.mxu0 %v7185_v14  ;;  %v7205_v28 = vld [vmem:[%s11145_s1 + $0x4] ss:$16 sps:$4 sm:$0xff]   ;;  %v7209_v30 = vld [vmem:[%s11145_s1] ss:$16 sps:$4 sm:$0xff]  }
  0x10   :  { %4899 = vmatpush1.bf16.msra.mxu1 %v7186_v15  ;;  %4859 = vmatprep.subr.bf16.mxu0 %v7187_v16  ;;  %v7207_v29 = vld [vmem:[%s11145_s1 + $0x204] ss:$16 sps:$4 sm:$0xff]   ;;  %v7210_v31 = vld [vmem:[%s11145_s1 + $0x200] ss:$16 sps:$4 sm:$0xff]  }
  0x11   :  { %4900 = vmatprep.subr.bf16.mxu1 %v7189_v17  ;;  %v7211_v32 = vld [vmem:[%s11145_s1 + $0x1e4] ss:$16 sps:$4 sm:$0xff]   ;;  %v7215_v34 = vld [vmem:[%s11145_s1 + $0x1e0] ss:$16 sps:$4 sm:$0xff]  }
  0x12   :  { %v7213_v33 = vld [vmem:[%s11145_s1 + $0x3e4] ss:$16 sps:$4 sm:$0xff]   ;;  %v7216_v35 = vld [vmem:[%s11145_s1 + $0x3e0] ss:$16 sps:$4 sm:$0xff]  }
  0x13   :  { %4860 = vmatpush1.bf16.msra.mxu0 %v7191_v18  ;;  %v7217_v36 = vld [vmem:[%s11145_s1 + $0x1c4] ss:$16 sps:$4 sm:$0xff]   ;;  %v7221_v38 = vld [vmem:[%s11145_s1 + $0x1c0] ss:$16 sps:$4 sm:$0xff]  }
  0x14   :  { %4901 = vmatpush1.bf16.msra.mxu1 %v7192_v19  ;;  %4861 = vmatprep.subr.bf16.mxu0 %v7193_v20  ;;  %v7219_v37 = vld [vmem:[%s11145_s1 + $0x3c4] ss:$16 sps:$4 sm:$0xff]   ;;  %v7222_v39 = vld [vmem:[%s11145_s1 + $0x3c0] ss:$16 sps:$4 sm:$0xff]  }
  0x15   :  { %4902 = vmatprep.subr.bf16.mxu1 %v7195_v21  ;;  %v7223_v40 = vld [vmem:[%s11145_s1 + $0x1a4] ss:$16 sps:$4 sm:$0xff]   ;;  %v7227_v42 = vld [vmem:[%s11145_s1 + $0x1a0] ss:$16 sps:$4 sm:$0xff]  }
  0x16   :  { %v7225_v41 = vld [vmem:[%s11145_s1 + $0x3a4] ss:$16 sps:$4 sm:$0xff]   ;;  %v7228_v43 = vld [vmem:[%s11145_s1 + $0x3a0] ss:$16 sps:$4 sm:$0xff]  }
  0x17   :  { %4862 = vmatpush1.bf16.msra.mxu0 %v7197_v22  ;;  %v7229_v44 = vld [vmem:[%s11145_s1 + $0x184] ss:$16 sps:$4 sm:$0xff]   ;;  %v7233_v49 = vld [vmem:[%s11145_s1 + $0x180] ss:$16 sps:$4 sm:$0xff]  }
  0x18   :  { %4903 = vmatpush1.bf16.msra.mxu1 %v7198_v23  ;;  %4863 = vmatprep.subr.bf16.mxu0 %v7199_v24  ;;  %v7231_v45 = vld [vmem:[%s11145_s1 + $0x384] ss:$16 sps:$4 sm:$0xff]   ;;  %v7234_v50 = vld [vmem:[%s11145_s1 + $0x380] ss:$16 sps:$4 sm:$0xff]  }
  0x19   :  { %4904 = vmatprep.subr.bf16.mxu1 %v7201_v25  ;;  %v21_v46 = vld [vmem:[%s11146_s0] sm:$0xff] }
  0x1a   :  { %v8570_v47 = vcombine.high %v21_v46, %v21_v46  ;;  %v7235_v52 = vld [vmem:[%s11145_s1 + $0x164] ss:$16 sps:$4 sm:$0xff]   ;;  %v7239_v54 = vld [vmem:[%s11145_s1 + $0x160] ss:$16 sps:$4 sm:$0xff]   ;;  %v8639_v6 = vcombine.low %v21_v46, %v21_v46 }
  0x1b   :  { %4864 = vmatpush1.bf16.msra.mxu0 %v7203_v26  ;;  %v7237_v53 = vld [vmem:[%s11145_s1 + $0x364] ss:$16 sps:$4 sm:$0xff]   ;;  %v7240_v55 = vld [vmem:[%s11145_s1 + $0x360] ss:$16 sps:$4 sm:$0xff]  }
  0x1c   :  { %4905 = vmatpush1.bf16.msra.mxu1 %v7204_v27  ;;  %4865 = vmatprep.subr.bf16.mxu0 %v7205_v28  ;;  %v7241_v56 = vld [vmem:[%s11145_s1 + $0x144] ss:$16 sps:$4 sm:$0xff]   ;;  %v7245_v58 = vld [vmem:[%s11145_s1 + $0x140] ss:$16 sps:$4 sm:$0xff]  }
  0x1d   :  { %4906 = vmatprep.subr.bf16.mxu1 %v7207_v29  ;;  %4883 = vmatprep.mubr.bf16.mxu0 %v8570_v47  ;;  %v7243_v57 = vld [vmem:[%s11145_s1 + $0x344] ss:$16 sps:$4 sm:$0xff]   ;;  %v7246_v59 = vld [vmem:[%s11145_s1 + $0x340] ss:$16 sps:$4 sm:$0xff]  }
  0x1e   :  { %v7247_v60 = vld [vmem:[%s11145_s1 + $0x124] ss:$16 sps:$4 sm:$0xff]   ;;  %v7251_v62 = vld [vmem:[%s11145_s1 + $0x120] ss:$16 sps:$4 sm:$0xff]  }
  0x1f   :  { %4866 = vmatpush1.bf16.msra.mxu0 %v7209_v30  ;;  %v7249_v61 = vld [vmem:[%s11145_s1 + $0x324] ss:$16 sps:$4 sm:$0xff]   ;;  %v7252_v63 = vld [vmem:[%s11145_s1 + $0x320] ss:$16 sps:$4 sm:$0xff]  }
  0x20   :  { %4907 = vmatpush1.bf16.msra.mxu1 %v7210_v31  ;;  %4867 = vmatprep.subr.bf16.mxu0 %v7211_v32  ;;  %v7253_v0 = vld [vmem:[%s11145_s1 + $0x104] ss:$16 sps:$4 sm:$0xff]   ;;  %v7257_v2 = vld [vmem:[%s11145_s1 + $0x100] ss:$16 sps:$4 sm:$0xff]  }
  0x21   :  { %4908 = vmatprep.subr.bf16.mxu1 %v7213_v33  ;;  %v7255_v1 = vld [vmem:[%s11145_s1 + $0x304] ss:$16 sps:$4 sm:$0xff]   ;;  %v7258_v3 = vld [vmem:[%s11145_s1 + $0x300] ss:$16 sps:$4 sm:$0xff]   ;;  %v8725_v33 = vld [vmem:[%s11146_s0 + $0x18] sm:$0xff] }
  0x22   :  { %v7265_v4 = vld [vmem:[%s11145_s1 + $0x4e4] ss:$16 sps:$4 sm:$0xff]   ;;  %v7263_v8 = vld [vmem:[%s11145_s1 + $0x4e0] ss:$16 sps:$4 sm:$0xff]  }
  0x23   :  { %4868 = vmatpush2.bf16.msra.mxu0 %v7215_v34  ;;  %v7268_v5 = vld [vmem:[%s11145_s1 + $0x6e4] ss:$16 sps:$4 sm:$0xff]   ;;  %v7266_v9 = vld [vmem:[%s11145_s1 + $0x6e0] ss:$16 sps:$4 sm:$0xff]  }
  0x24   :  { %4909 = vmatpush2.bf16.msra.mxu1 %v7216_v35  ;;  %4869 = vmatprep.subr.bf16.mxu0 %v7217_v36  ;;  %v7271_v10 = vld [vmem:[%s11145_s1 + $0x4c4] ss:$16 sps:$4 sm:$0xff]   ;;  %v7269_v12 = vld [vmem:[%s11145_s1 + $0x4c0] ss:$16 sps:$4 sm:$0xff]  }
  0x25   :  { %4910 = vmatprep.subr.bf16.mxu1 %v7219_v37  ;;  %v7274_v11 = vld [vmem:[%s11145_s1 + $0x6c4] ss:$16 sps:$4 sm:$0xff]   ;;  %v7272_v13 = vld [vmem:[%s11145_s1 + $0x6c0] ss:$16 sps:$4 sm:$0xff]   ;;  %v8739_v37 = vcombine.high %v8725_v33, %v8725_v33 }
  0x26   :  { %v7277_v14 = vld [vmem:[%s11145_s1 + $0x4a4] ss:$16 sps:$4 sm:$0xff]   ;;  %v7275_v16 = vld [vmem:[%s11145_s1 + $0x4a0] ss:$16 sps:$4 sm:$0xff]  }
  0x27   :  { %4870 = vmatpush2.bf16.msra.mxu0 %v7221_v38  ;;  %v7280_v15 = vld [vmem:[%s11145_s1 + $0x6a4] ss:$16 sps:$4 sm:$0xff]   ;;  %v7278_v17 = vld [vmem:[%s11145_s1 + $0x6a0] ss:$16 sps:$4 sm:$0xff]  }
  0x28   :  { %4911 = vmatpush2.bf16.msra.mxu1 %v7222_v39  ;;  %4871 = vmatprep.subr.bf16.mxu0 %v7223_v40  ;;  %v7283_v18 = vld [vmem:[%s11145_s1 + $0x484] ss:$16 sps:$4 sm:$0xff]   ;;  %v7281_v20 = vld [vmem:[%s11145_s1 + $0x480] ss:$16 sps:$4 sm:$0xff]  }
  0x29   :  { %4912 = vmatprep.subr.bf16.mxu1 %v7225_v41  ;;  %v7286_v19 = vld [vmem:[%s11145_s1 + $0x684] ss:$16 sps:$4 sm:$0xff]   ;;  %v7284_v21 = vld [vmem:[%s11145_s1 + $0x680] ss:$16 sps:$4 sm:$0xff]  }
  0x2a   :  { %v7289_v22 = vld [vmem:[%s11145_s1 + $0x464] ss:$16 sps:$4 sm:$0xff]   ;;  %v7287_v24 = vld [vmem:[%s11145_s1 + $0x460] ss:$16 sps:$4 sm:$0xff]  }
  0x2b   :  { %4872 = vmatpush2.bf16.msra.mxu0 %v7227_v42  ;;  %v7292_v23 = vld [vmem:[%s11145_s1 + $0x664] ss:$16 sps:$4 sm:$0xff]   ;;  %v7290_v25 = vld [vmem:[%s11145_s1 + $0x660] ss:$16 sps:$4 sm:$0xff]  }
  0x2c   :  { %4913 = vmatpush2.bf16.msra.mxu1 %v7228_v43  ;;  %4873 = vmatprep.subr.bf16.mxu0 %v7229_v44  ;;  %v7295_v26 = vld [vmem:[%s11145_s1 + $0x444] ss:$16 sps:$4 sm:$0xff]   ;;  %v7293_v28 = vld [vmem:[%s11145_s1 + $0x440] ss:$16 sps:$4 sm:$0xff]  }
  0x2d   :  { %4914 = vmatprep.subr.bf16.mxu1 %v7231_v45  ;;  %v7298_v27 = vld [vmem:[%s11145_s1 + $0x644] ss:$16 sps:$4 sm:$0xff]   ;;  %v7296_v29 = vld [vmem:[%s11145_s1 + $0x640] ss:$16 sps:$4 sm:$0xff]  }
  0x2e   :  { %v7301_v30 = vld [vmem:[%s11145_s1 + $0x424] ss:$16 sps:$4 sm:$0xff]   ;;  %v7299_v34 = vld [vmem:[%s11145_s1 + $0x420] ss:$16 sps:$4 sm:$0xff]  }
  0x2f   :  { %4874 = vmatpush2.bf16.msra.mxu0 %v7233_v49  ;;  %v7304_v31 = vld [vmem:[%s11145_s1 + $0x624] ss:$16 sps:$4 sm:$0xff]   ;;  %v7302_v35 = vld [vmem:[%s11145_s1 + $0x620] ss:$16 sps:$4 sm:$0xff]  }
  0x30   :  { %4915 = vmatpush2.bf16.msra.mxu1 %v7234_v50  ;;  %4875 = vmatprep.subr.bf16.mxu0 %v7235_v52  ;;  %v8720_v32 = vld [vmem:[%s11146_s0 + $0x10] sm:$0xff] }
  0x31   :  { %4916 = vmatprep.subr.bf16.mxu1 %v7237_v53  ;;  %v8735_v36 = vcombine.high %v8720_v32, %v8720_v32  ;;  %v7307_v38 = vld [vmem:[%s11145_s1 + $0x404] ss:$16 sps:$4 sm:$0xff]   ;;  %v7305_v40 = vld [vmem:[%s11145_s1 + $0x400] ss:$16 sps:$4 sm:$0xff]  }
  0x32   :  { %v7310_v39 = vld [vmem:[%s11145_s1 + $0x604] ss:$16 sps:$4 sm:$0xff]   ;;  %v7308_v41 = vld [vmem:[%s11145_s1 + $0x600] ss:$16 sps:$4 sm:$0xff]  }
  0x33   :  { %4876 = vmatpush2.bf16.msra.mxu0 %v7239_v54  ;;  %v7313_v42 = vld [vmem:[%s11145_s1 + $0x5e4] ss:$16 sps:$4 sm:$0xff]   ;;  %v7311_v44 = vld [vmem:[%s11145_s1 + $0x5e0] ss:$16 sps:$4 sm:$0xff]  }
  0x34   :  { %4917 = vmatpush2.bf16.msra.mxu1 %v7240_v55  ;;  %4877 = vmatprep.subr.bf16.mxu0 %v7241_v56  ;;  %v7316_v43 = vld [vmem:[%s11145_s1 + $0x7e4] ss:$16 sps:$4 sm:$0xff]   ;;  %v7314_v45 = vld [vmem:[%s11145_s1 + $0x7e0] ss:$16 sps:$4 sm:$0xff]  }
  0x35   :  { %4918 = vmatprep.subr.bf16.mxu1 %v7243_v57  ;;  %v7319_v46 = vld [vmem:[%s11145_s1 + $0x5c4] ss:$16 sps:$4 sm:$0xff]   ;;  %v7317_v49 = vld [vmem:[%s11145_s1 + $0x5c0] ss:$16 sps:$4 sm:$0xff]  }
  0x36   :  { %v7322_v48 = vld [vmem:[%s11145_s1 + $0x7c4] ss:$16 sps:$4 sm:$0xff]   ;;  %v7320_v50 = vld [vmem:[%s11145_s1 + $0x7c0] ss:$16 sps:$4 sm:$0xff]  }
  0x37   :  { %4878 = vmatpush2.bf16.msra.mxu0 %v7245_v58  ;;  %v7325_v52 = vld [vmem:[%s11145_s1 + $0x5a4] ss:$16 sps:$4 sm:$0xff]   ;;  %v7323_v54 = vld [vmem:[%s11145_s1 + $0x5a0] ss:$16 sps:$4 sm:$0xff]  }
  0x38   :  { %4919 = vmatpush2.bf16.msra.mxu1 %v7246_v59  ;;  %4879 = vmatprep.subr.bf16.mxu0 %v7247_v60  ;;  %v7328_v53 = vld [vmem:[%s11145_s1 + $0x7a4] ss:$16 sps:$4 sm:$0xff]   ;;  %v7326_v55 = vld [vmem:[%s11145_s1 + $0x7a0] ss:$16 sps:$4 sm:$0xff]  }
  0x39   :  { %4920 = vmatprep.subr.bf16.mxu1 %v7249_v61  ;;  %v7331_v56 = vld [vmem:[%s11145_s1 + $0x584] ss:$16 sps:$4 sm:$0xff]   ;;  %v7329_v58 = vld [vmem:[%s11145_s1 + $0x580] ss:$16 sps:$4 sm:$0xff]  }
  0x3a   :  { %v7334_v57 = vld [vmem:[%s11145_s1 + $0x784] ss:$16 sps:$4 sm:$0xff]   ;;  %v7332_v59 = vld [vmem:[%s11145_s1 + $0x780] ss:$16 sps:$4 sm:$0xff]  }
  0x3b   :  { %4880 = vmatpush2.bf16.msra.mxu0 %v7251_v62  ;;  %v7337_v60 = vld [vmem:[%s11145_s1 + $0x564] ss:$16 sps:$4 sm:$0xff]   ;;  %v7335_v62 = vld [vmem:[%s11145_s1 + $0x560] ss:$16 sps:$4 sm:$0xff]  }
  0x3c   :  { %4921 = vmatpush2.bf16.msra.mxu1 %v7252_v63  ;;  %4881 = vmatprep.subr.bf16.mxu0 %v7253_v0  ;;  %v7340_v61 = vld [vmem:[%s11145_s1 + $0x764] ss:$16 sps:$4 sm:$0xff]   ;;  %v7338_v63 = vld [vmem:[%s11145_s1 + $0x760] ss:$16 sps:$4 sm:$0xff]  }
  0x3d   :  { %4922 = vmatprep.subr.bf16.mxu1 %v7255_v1  ;;  %v7343_v0 = vld [vmem:[%s11145_s1 + $0x544] ss:$16 sps:$4 sm:$0xff]  }
  0x3e   :  { %v7346_v1 = vld [vmem:[%s11145_s1 + $0x744] ss:$16 sps:$4 sm:$0xff]  }
  0x3f   :  { %4882 = vmatpush2.bf16.msra.mxu0 %v7257_v2  ;;  %v7341_v2 = vld [vmem:[%s11145_s1 + $0x540] ss:$16 sps:$4 sm:$0xff]  }
  0x40   :  { %4923 = vmatpush2.bf16.msra.mxu1 %v7258_v3  ;;  %4933 = vmatprep.subr.bf16.mxu0 %v7265_v4  ;;  %v7344_v3 = vld [vmem:[%s11145_s1 + $0x740] ss:$16 sps:$4 sm:$0xff]   ;;  %v7349_v4 = vld [vmem:[%s11145_s1 + $0x524] ss:$16 sps:$4 sm:$0xff]  }
  0x41   :  { %4974 = vmatprep.subr.bf16.mxu1 %v7268_v5  ;;  %v7352_v5 = vld [vmem:[%s11145_s1 + $0x724] ss:$16 sps:$4 sm:$0xff]  }
  0x42   :  { %4884 = vmatmul.mubr.bf16.vlgmr.msra.gmra.mxu0 %v8639_v6 }
  0x43   :  { %4925 = vmatmul.mubr.bf16.vlgmr.msra.gmra.mxu1 %v8641_v7  ;;  %4934 = vmatpush1.bf16.msra.mxu0 %v7263_v8  ;;  %v7347_v8 = vld [vmem:[%s11145_s1 + $0x520] ss:$16 sps:$4 sm:$0xff]  }
  0x44   :  { %4975 = vmatpush1.bf16.msra.mxu1 %v7266_v9  ;;  %4935 = vmatprep.subr.bf16.mxu0 %v7271_v10  ;;  %v7350_v9 = vld [vmem:[%s11145_s1 + $0x720] ss:$16 sps:$4 sm:$0xff]   ;;  %v7355_v10 = vld [vmem:[%s11145_s1 + $0x504] ss:$16 sps:$4 sm:$0xff]  }
  0x45   :  { %4976 = vmatprep.subr.bf16.mxu1 %v7274_v11  ;;  %4965 = vmatprep.mubr.bf16.mxu0 %v8735_v36  ;;  %v7358_v11 = vld [vmem:[%s11145_s1 + $0x704] ss:$16 sps:$4 sm:$0xff]  }
  0x46   :  { %5006 = vmatprep.mubr.bf16.mxu1 %v8739_v37 }
  0x47   :  { %4936 = vmatpush1.bf16.msra.mxu0 %v7269_v12  ;;  %v7353_v12 = vld [vmem:[%s11145_s1 + $0x500] ss:$16 sps:$4 sm:$0xff]  }
  0x48   :  { %4977 = vmatpush1.bf16.msra.mxu1 %v7272_v13  ;;  %4937 = vmatprep.subr.bf16.mxu0 %v7277_v14  ;;  %v7356_v13 = vld [vmem:[%s11145_s1 + $0x700] ss:$16 sps:$4 sm:$0xff]   ;;  %v7365_v14 = vld [vmem:[%s11145_s1 + $0x8e4] ss:$16 sps:$4 sm:$0xff]  }
  0x49   :  { %4978 = vmatprep.subr.bf16.mxu1 %v7280_v15  ;;  %v7368_v15 = vld [vmem:[%s11145_s1 + $0xae4] ss:$16 sps:$4 sm:$0xff]  }
  0x4b   :  { %4938 = vmatpush1.bf16.msra.mxu0 %v7275_v16  ;;  %v8859_v16 = vcombine.low %v8720_v32, %v8720_v32  ;;  %v7383_v32 = vld [vmem:[%s11145_s1 + $0x884] ss:$16 sps:$4 sm:$0xff]  }
  0x4c   :  { %4979 = vmatpush1.bf16.msra.mxu1 %v7278_v17  ;;  %4939 = vmatprep.subr.bf16.mxu0 %v7283_v18  ;;  %v8863_v17 = vcombine.low %v8725_v33, %v8725_v33  ;;  %v7363_v18 = vld [vmem:[%s11145_s1 + $0x8e0] ss:$16 sps:$4 sm:$0xff]   ;;  %v7386_v33 = vld [vmem:[%s11145_s1 + $0xa84] ss:$16 sps:$4 sm:$0xff]  }
  0x4d   :  { %4980 = vmatprep.subr.bf16.mxu1 %v7286_v19  ;;  %v7366_v19 = vld [vmem:[%s11145_s1 + $0xae0] ss:$16 sps:$4 sm:$0xff]  }
  0x4f   :  { %4940 = vmatpush1.bf16.msra.mxu0 %v7281_v20  ;;  %v7371_v20 = vld [vmem:[%s11145_s1 + $0x8c4] ss:$16 sps:$4 sm:$0xff]  }
  0x50   :  { %4981 = vmatpush1.bf16.msra.mxu1 %v7284_v21  ;;  %4941 = vmatprep.subr.bf16.mxu0 %v7289_v22  ;;  %v7374_v21 = vld [vmem:[%s11145_s1 + $0xac4] ss:$16 sps:$4 sm:$0xff]  }
  0x51   :  { %4982 = vmatprep.subr.bf16.mxu1 %v7292_v23  ;;  %v8880_v22 = vld [vmem:[%s11146_s0 + $0x20] sm:$0xff]  ;;  %v8885_v23 = vld [vmem:[%s11146_s0 + $0x28] sm:$0xff] }
  0x53   :  { %4942 = vmatpush1.bf16.msra.mxu0 %v7287_v24  ;;  %v8889_v24 = vcombine.high %v8880_v22, %v8880_v22 }
  0x54   :  { %4983 = vmatpush1.bf16.msra.mxu1 %v7290_v25  ;;  %4943 = vmatprep.subr.bf16.mxu0 %v7295_v26  ;;  %v8893_v25 = vcombine.high %v8885_v23, %v8885_v23  ;;  %v7369_v26 = vld [vmem:[%s11145_s1 + $0x8c0] ss:$16 sps:$4 sm:$0xff]  }
  0x55   :  { %4984 = vmatprep.subr.bf16.mxu1 %v7298_v27  ;;  %v7372_v27 = vld [vmem:[%s11145_s1 + $0xac0] ss:$16 sps:$4 sm:$0xff]  }
  0x57   :  { %4944 = vmatpush1.bf16.msra.mxu0 %v7293_v28  ;;  %v7377_v28 = vld [vmem:[%s11145_s1 + $0x8a4] ss:$16 sps:$4 sm:$0xff]  }
  0x58   :  { %4985 = vmatpush1.bf16.msra.mxu1 %v7296_v29  ;;  %4945 = vmatprep.subr.bf16.mxu0 %v7301_v30  ;;  %v7380_v29 = vld [vmem:[%s11145_s1 + $0xaa4] ss:$16 sps:$4 sm:$0xff]   ;;  %v7375_v30 = vld [vmem:[%s11145_s1 + $0x8a0] ss:$16 sps:$4 sm:$0xff]  }
  0x59   :  { %4986 = vmatprep.subr.bf16.mxu1 %v7304_v31  ;;  %v7378_v31 = vld [vmem:[%s11145_s1 + $0xaa0] ss:$16 sps:$4 sm:$0xff]  }
  0x5b   :  { %4946 = vmatpush1.bf16.msra.mxu0 %v7299_v34  ;;  %v7381_v34 = vld [vmem:[%s11145_s1 + $0x880] ss:$16 sps:$4 sm:$0xff]  }
  0x5c   :  { %4987 = vmatpush1.bf16.msra.mxu1 %v7302_v35  ;;  %4947 = vmatprep.subr.bf16.mxu0 %v7307_v38  ;;  %v7384_v35 = vld [vmem:[%s11145_s1 + $0xa80] ss:$16 sps:$4 sm:$0xff]   ;;  %v7389_v38 = vld [vmem:[%s11145_s1 + $0x864] ss:$16 sps:$4 sm:$0xff]  }
  0x5d   :  { %4988 = vmatprep.subr.bf16.mxu1 %v7310_v39  ;;  %v7392_v39 = vld [vmem:[%s11145_s1 + $0xa64] ss:$16 sps:$4 sm:$0xff]  }
  0x5f   :  { %4948 = vmatpush1.bf16.msra.mxu0 %v7305_v40  ;;  %v7387_v40 = vld [vmem:[%s11145_s1 + $0x860] ss:$16 sps:$4 sm:$0xff]  }
  0x60   :  { %4989 = vmatpush1.bf16.msra.mxu1 %v7308_v41  ;;  %4949 = vmatprep.subr.bf16.mxu0 %v7313_v42  ;;  %v7390_v41 = vld [vmem:[%s11145_s1 + $0xa60] ss:$16 sps:$4 sm:$0xff]   ;;  %v7395_v42 = vld [vmem:[%s11145_s1 + $0x844] ss:$16 sps:$4 sm:$0xff]  }
  0x61   :  { %4990 = vmatprep.subr.bf16.mxu1 %v7316_v43  ;;  %v7398_v43 = vld [vmem:[%s11145_s1 + $0xa44] ss:$16 sps:$4 sm:$0xff]  }
  0x63   :  { %4950 = vmatpush2.bf16.msra.mxu0 %v7311_v44  ;;  %v7393_v44 = vld [vmem:[%s11145_s1 + $0x840] ss:$16 sps:$4 sm:$0xff]  }
  0x64   :  { %4991 = vmatpush2.bf16.msra.mxu1 %v7314_v45  ;;  %4951 = vmatprep.subr.bf16.mxu0 %v7319_v46  ;;  %v7396_v45 = vld [vmem:[%s11145_s1 + $0xa40] ss:$16 sps:$4 sm:$0xff]   ;;  %v7401_v46 = vld [vmem:[%s11145_s1 + $0x824] ss:$16 sps:$4 sm:$0xff]  }
  0x65   :  { %4992 = vmatprep.subr.bf16.mxu1 %v7322_v48  ;;  %v7404_v48 = vld [vmem:[%s11145_s1 + $0xa24] ss:$16 sps:$4 sm:$0xff]  }
  0x67   :  { %4952 = vmatpush2.bf16.msra.mxu0 %v7317_v49  ;;  %v7399_v49 = vld [vmem:[%s11145_s1 + $0x820] ss:$16 sps:$4 sm:$0xff]  }
  0x68   :  { %4993 = vmatpush2.bf16.msra.mxu1 %v7320_v50  ;;  %4953 = vmatprep.subr.bf16.mxu0 %v7325_v52  ;;  %v7402_v50 = vld [vmem:[%s11145_s1 + $0xa20] ss:$16 sps:$4 sm:$0xff]   ;;  %v7407_v52 = vld [vmem:[%s11145_s1 + $0x804] ss:$16 sps:$4 sm:$0xff]  }
  0x69   :  { %4994 = vmatprep.subr.bf16.mxu1 %v7328_v53  ;;  %v7410_v53 = vld [vmem:[%s11145_s1 + $0xa04] ss:$16 sps:$4 sm:$0xff]  }
  0x6b   :  { %4954 = vmatpush2.bf16.msra.mxu0 %v7323_v54  ;;  %v7405_v54 = vld [vmem:[%s11145_s1 + $0x800] ss:$16 sps:$4 sm:$0xff]  }
  0x6c   :  { %4995 = vmatpush2.bf16.msra.mxu1 %v7326_v55  ;;  %4955 = vmatprep.subr.bf16.mxu0 %v7331_v56  ;;  %v7408_v55 = vld [vmem:[%s11145_s1 + $0xa00] ss:$16 sps:$4 sm:$0xff]   ;;  %v7413_v56 = vld [vmem:[%s11145_s1 + $0x9e4] ss:$16 sps:$4 sm:$0xff]  }
  0x6d   :  { %4996 = vmatprep.subr.bf16.mxu1 %v7334_v57  ;;  %v7416_v57 = vld [vmem:[%s11145_s1 + $0xbe4] ss:$16 sps:$4 sm:$0xff]  }
  0x6f   :  { %4956 = vmatpush2.bf16.msra.mxu0 %v7329_v58  ;;  %v7411_v58 = vld [vmem:[%s11145_s1 + $0x9e0] ss:$16 sps:$4 sm:$0xff]  }
  0x70   :  { %4997 = vmatpush2.bf16.msra.mxu1 %v7332_v59  ;;  %4957 = vmatprep.subr.bf16.mxu0 %v7337_v60  ;;  %v7414_v59 = vld [vmem:[%s11145_s1 + $0xbe0] ss:$16 sps:$4 sm:$0xff]   ;;  %v7419_v60 = vld [vmem:[%s11145_s1 + $0x9c4] ss:$16 sps:$4 sm:$0xff]  }
  0x71   :  { %4998 = vmatprep.subr.bf16.mxu1 %v7340_v61  ;;  %v7422_v61 = vld [vmem:[%s11145_s1 + $0xbc4] ss:$16 sps:$4 sm:$0xff]  }
  0x73   :  { %4958 = vmatpush2.bf16.msra.mxu0 %v7335_v62  ;;  %v7417_v62 = vld [vmem:[%s11145_s1 + $0x9c0] ss:$16 sps:$4 sm:$0xff]  }
  0x74   :  { %4999 = vmatpush2.bf16.msra.mxu1 %v7338_v63  ;;  %4959 = vmatprep.subr.bf16.mxu0 %v7343_v0  ;;  %v7420_v63 = vld [vmem:[%s11145_s1 + $0xbc0] ss:$16 sps:$4 sm:$0xff]   ;;  %v7425_v0 = vld [vmem:[%s11145_s1 + $0x9a4] ss:$16 sps:$4 sm:$0xff]  }
  0x75   :  { %5000 = vmatprep.subr.bf16.mxu1 %v7346_v1  ;;  %v7428_v1 = vld [vmem:[%s11145_s1 + $0xba4] ss:$16 sps:$4 sm:$0xff]  }
  0x77   :  { %4960 = vmatpush2.bf16.msra.mxu0 %v7341_v2  ;;  %v7423_v2 = vld [vmem:[%s11145_s1 + $0x9a0] ss:$16 sps:$4 sm:$0xff]  }
  0x78   :  { %5001 = vmatpush2.bf16.msra.mxu1 %v7344_v3  ;;  %4961 = vmatprep.subr.bf16.mxu0 %v7349_v4  ;;  %v7426_v3 = vld [vmem:[%s11145_s1 + $0xba0] ss:$16 sps:$4 sm:$0xff]   ;;  %v7431_v4 = vld [vmem:[%s11145_s1 + $0x984] ss:$16 sps:$4 sm:$0xff]  }
  0x79   :  { %5002 = vmatprep.subr.bf16.mxu1 %v7352_v5  ;;  %v7434_v5 = vld [vmem:[%s11145_s1 + $0xb84] ss:$16 sps:$4 sm:$0xff]  }
  0x7b   :  { %4962 = vmatpush2.bf16.msra.mxu0 %v7347_v8  ;;  %v7429_v8 = vld [vmem:[%s11145_s1 + $0x980] ss:$16 sps:$4 sm:$0xff]  }
  0x7c   :  { %5003 = vmatpush2.bf16.msra.mxu1 %v7350_v9  ;;  %4963 = vmatprep.subr.bf16.mxu0 %v7355_v10  ;;  %v7432_v9 = vld [vmem:[%s11145_s1 + $0xb80] ss:$16 sps:$4 sm:$0xff]   ;;  %v7437_v10 = vld [vmem:[%s11145_s1 + $0x964] ss:$16 sps:$4 sm:$0xff]  }
  0x7d   :  { %5004 = vmatprep.subr.bf16.mxu1 %v7358_v11  ;;  %v7440_v11 = vld [vmem:[%s11145_s1 + $0xb64] ss:$16 sps:$4 sm:$0xff]  }
  0x7f   :  { %4964 = vmatpush2.bf16.msra.mxu0 %v7353_v12  ;;  %v7435_v12 = vld [vmem:[%s11145_s1 + $0x960] ss:$16 sps:$4 sm:$0xff]  }
  0x80   :  { %5005 = vmatpush2.bf16.msra.mxu1 %v7356_v13  ;;  %5015 = vmatprep.subr.bf16.mxu0 %v7365_v14  ;;  %v7438_v13 = vld [vmem:[%s11145_s1 + $0xb60] ss:$16 sps:$4 sm:$0xff]   ;;  %v7443_v14 = vld [vmem:[%s11145_s1 + $0x944] ss:$16 sps:$4 sm:$0xff]  }
  0x81   :  { %5056 = vmatprep.subr.bf16.mxu1 %v7368_v15  ;;  %v7446_v15 = vld [vmem:[%s11145_s1 + $0xb44] ss:$16 sps:$4 sm:$0xff]  }
  0x82   :  { %4966 = vmatmul.mubr.bf16.vlgmr.msra.gmra.mxu0 %v8859_v16 }
  0x83   :  { %5007 = vmatmul.mubr.bf16.vlgmr.msra.gmra.mxu1 %v8863_v17  ;;  %5016 = vmatpush1.bf16.msra.mxu0 %v7363_v18  ;;  %v7441_v18 = vld [vmem:[%s11145_s1 + $0x940] ss:$16 sps:$4 sm:$0xff]  }
  0x84   :  { %5057 = vmatpush1.bf16.msra.mxu1 %v7366_v19  ;;  %5017 = vmatprep.subr.bf16.mxu0 %v7371_v20  ;;  %v7444_v19 = vld [vmem:[%s11145_s1 + $0xb40] ss:$16 sps:$4 sm:$0xff]   ;;  %v7449_v20 = vld [vmem:[%s11145_s1 + $0x924] ss:$16 sps:$4 sm:$0xff]  }
  0x85   :  { %5058 = vmatprep.subr.bf16.mxu1 %v7374_v21  ;;  %5047 = vmatprep.mubr.bf16.mxu0 %v8889_v24  ;;  %v7452_v21 = vld [vmem:[%s11145_s1 + $0xb24] ss:$16 sps:$4 sm:$0xff]  }
  0x86   :  { %5088 = vmatprep.mubr.bf16.mxu1 %v8893_v25 }
  0x87   :  { %5018 = vmatpush1.bf16.msra.mxu0 %v7369_v26  ;;  %v7447_v26 = vld [vmem:[%s11145_s1 + $0x920] ss:$16 sps:$4 sm:$0xff]  }
  0x88   :  { %5059 = vmatpush1.bf16.msra.mxu1 %v7372_v27  ;;  %5019 = vmatprep.subr.bf16.mxu0 %v7377_v28  ;;  %v7450_v27 = vld [vmem:[%s11145_s1 + $0xb20] ss:$16 sps:$4 sm:$0xff]   ;;  %v7455_v28 = vld [vmem:[%s11145_s1 + $0x904] ss:$16 sps:$4 sm:$0xff]  }
  0x89   :  { %5060 = vmatprep.subr.bf16.mxu1 %v7380_v29  ;;  %v7458_v29 = vld [vmem:[%s11145_s1 + $0xb04] ss:$16 sps:$4 sm:$0xff]  }
  0x8b   :  { %5020 = vmatpush1.bf16.msra.mxu0 %v7375_v30  ;;  %v7453_v30 = vld [vmem:[%s11145_s1 + $0x900] ss:$16 sps:$4 sm:$0xff]  }
  0x8c   :  { %5061 = vmatpush1.bf16.msra.mxu1 %v7378_v31  ;;  %5021 = vmatprep.subr.bf16.mxu0 %v7383_v32  ;;  %v7456_v31 = vld [vmem:[%s11145_s1 + $0xb00] ss:$16 sps:$4 sm:$0xff]   ;;  %v7465_v32 = vld [vmem:[%s11145_s1 + $0xce4] ss:$16 sps:$4 sm:$0xff]  }
  0x8d   :  { %5062 = vmatprep.subr.bf16.mxu1 %v7386_v33  ;;  %v7468_v33 = vld [vmem:[%s11145_s1 + $0xee4] ss:$16 sps:$4 sm:$0xff]  }
  0x8f   :  { %5022 = vmatpush1.bf16.msra.mxu0 %v7381_v34  ;;  %v7463_v34 = vld [vmem:[%s11145_s1 + $0xce0] ss:$16 sps:$4 sm:$0xff]  }
  0x90   :  { %5063 = vmatpush1.bf16.msra.mxu1 %v7384_v35  ;;  %5023 = vmatprep.subr.bf16.mxu0 %v7389_v38  ;;  %v9085_v35 = vld [vmem:[%s11146_s0 + $0x30] sm:$0xff]  ;;  %v9089_v38 = vcombine.low %v8880_v22, %v8880_v22 }
  0x91   :  { %5064 = vmatprep.subr.bf16.mxu1 %v7392_v39  ;;  %v9093_v39 = vcombine.low %v8885_v23, %v8885_v23  ;;  %v7471_v22 = vld [vmem:[%s11145_s1 + $0xcc4] ss:$16 sps:$4 sm:$0xff]  }
  0x92   :  { %v7474_v23 = vld [vmem:[%s11145_s1 + $0xec4] ss:$16 sps:$4 sm:$0xff]  }
  0x93   :  { %5024 = vmatpush1.bf16.msra.mxu0 %v7387_v40  ;;  %v9098_v40 = vld [vmem:[%s11146_s0 + $0x38] sm:$0xff] }
  0x94   :  { %5065 = vmatpush1.bf16.msra.mxu1 %v7390_v41  ;;  %5025 = vmatprep.subr.bf16.mxu0 %v7395_v42  ;;  %v7466_v41 = vld [vmem:[%s11145_s1 + $0xee0] ss:$16 sps:$4 sm:$0xff]   ;;  %v9111_v42 = vcombine.high %v9085_v35, %v9085_v35 }
  0x95   :  { %5066 = vmatprep.subr.bf16.mxu1 %v7398_v43  ;;  %v9115_v43 = vcombine.high %v9098_v40, %v9098_v40 }
  0x97   :  { %5026 = vmatpush1.bf16.msra.mxu0 %v7393_v44  ;;  %v7469_v44 = vld [vmem:[%s11145_s1 + $0xcc0] ss:$16 sps:$4 sm:$0xff]  }
  0x98   :  { %5067 = vmatpush1.bf16.msra.mxu1 %v7396_v45  ;;  %5027 = vmatprep.subr.bf16.mxu0 %v7401_v46  ;;  %v7472_v45 = vld [vmem:[%s11145_s1 + $0xec0] ss:$16 sps:$4 sm:$0xff]   ;;  %v7477_v46 = vld [vmem:[%s11145_s1 + $0xca4] ss:$16 sps:$4 sm:$0xff]  }
  0x99   :  { %5068 = vmatprep.subr.bf16.mxu1 %v7404_v48  ;;  %v7480_v48 = vld [vmem:[%s11145_s1 + $0xea4] ss:$16 sps:$4 sm:$0xff]  }
  0x9b   :  { %5028 = vmatpush1.bf16.msra.mxu0 %v7399_v49  ;;  %v7475_v49 = vld [vmem:[%s11145_s1 + $0xca0] ss:$16 sps:$4 sm:$0xff]  }
  0x9c   :  { %5069 = vmatpush1.bf16.msra.mxu1 %v7402_v50  ;;  %5029 = vmatprep.subr.bf16.mxu0 %v7407_v52  ;;  %v7478_v50 = vld [vmem:[%s11145_s1 + $0xea0] ss:$16 sps:$4 sm:$0xff]   ;;  %v7483_v52 = vld [vmem:[%s11145_s1 + $0xc84] ss:$16 sps:$4 sm:$0xff]  }
  0x9d   :  { %5070 = vmatprep.subr.bf16.mxu1 %v7410_v53  ;;  %v7486_v53 = vld [vmem:[%s11145_s1 + $0xe84] ss:$16 sps:$4 sm:$0xff]  }
  0x9f   :  { %5030 = vmatpush1.bf16.msra.mxu0 %v7405_v54  ;;  %v7481_v54 = vld [vmem:[%s11145_s1 + $0xc80] ss:$16 sps:$4 sm:$0xff]  }
  0xa0   :  { %5071 = vmatpush1.bf16.msra.mxu1 %v7408_v55  ;;  %5031 = vmatprep.subr.bf16.mxu0 %v7413_v56  ;;  %v7484_v55 = vld [vmem:[%s11145_s1 + $0xe80] ss:$16 sps:$4 sm:$0xff]   ;;  %v7489_v56 = vld [vmem:[%s11145_s1 + $0xc64] ss:$16 sps:$4 sm:$0xff]  }
  0xa1   :  { %5072 = vmatprep.subr.bf16.mxu1 %v7416_v57  ;;  %v7492_v57 = vld [vmem:[%s11145_s1 + $0xe64] ss:$16 sps:$4 sm:$0xff]  }
  0xa3   :  { %5032 = vmatpush2.bf16.msra.mxu0 %v7411_v58  ;;  %v7487_v58 = vld [vmem:[%s11145_s1 + $0xc60] ss:$16 sps:$4 sm:$0xff]  }
  0xa4   :  { %5073 = vmatpush2.bf16.msra.mxu1 %v7414_v59  ;;  %5033 = vmatprep.subr.bf16.mxu0 %v7419_v60  ;;  %v7490_v59 = vld [vmem:[%s11145_s1 + $0xe60] ss:$16 sps:$4 sm:$0xff]   ;;  %v7495_v60 = vld [vmem:[%s11145_s1 + $0xc44] ss:$16 sps:$4 sm:$0xff]  }
  0xa5   :  { %5074 = vmatprep.subr.bf16.mxu1 %v7422_v61  ;;  %v7498_v61 = vld [vmem:[%s11145_s1 + $0xe44] ss:$16 sps:$4 sm:$0xff]  }
  0xa7   :  { %5034 = vmatpush2.bf16.msra.mxu0 %v7417_v62  ;;  %v7493_v62 = vld [vmem:[%s11145_s1 + $0xc40] ss:$16 sps:$4 sm:$0xff]  }
  0xa8   :  { %5075 = vmatpush2.bf16.msra.mxu1 %v7420_v63  ;;  %5035 = vmatprep.subr.bf16.mxu0 %v7425_v0  ;;  %v7496_v63 = vld [vmem:[%s11145_s1 + $0xe40] ss:$16 sps:$4 sm:$0xff]   ;;  %v7501_v0 = vld [vmem:[%s11145_s1 + $0xc24] ss:$16 sps:$4 sm:$0xff]  }
  0xa9   :  { %5076 = vmatprep.subr.bf16.mxu1 %v7428_v1  ;;  %v7504_v1 = vld [vmem:[%s11145_s1 + $0xe24] ss:$16 sps:$4 sm:$0xff]  }
  0xab   :  { %5036 = vmatpush2.bf16.msra.mxu0 %v7423_v2  ;;  %v7499_v2 = vld [vmem:[%s11145_s1 + $0xc20] ss:$16 sps:$4 sm:$0xff]  }
  0xac   :  { %5077 = vmatpush2.bf16.msra.mxu1 %v7426_v3  ;;  %5037 = vmatprep.subr.bf16.mxu0 %v7431_v4  ;;  %v7502_v3 = vld [vmem:[%s11145_s1 + $0xe20] ss:$16 sps:$4 sm:$0xff]   ;;  %v7507_v4 = vld [vmem:[%s11145_s1 + $0xc04] ss:$16 sps:$4 sm:$0xff]  }
  0xad   :  { %5078 = vmatprep.subr.bf16.mxu1 %v7434_v5  ;;  %v7510_v5 = vld [vmem:[%s11145_s1 + $0xe04] ss:$16 sps:$4 sm:$0xff]  }
  0xaf   :  { %5038 = vmatpush2.bf16.msra.mxu0 %v7429_v8  ;;  %v7505_v8 = vld [vmem:[%s11145_s1 + $0xc00] ss:$16 sps:$4 sm:$0xff]  }
  0xb0   :  { %5079 = vmatpush2.bf16.msra.mxu1 %v7432_v9  ;;  %5039 = vmatprep.subr.bf16.mxu0 %v7437_v10  ;;  %v7508_v9 = vld [vmem:[%s11145_s1 + $0xe00] ss:$16 sps:$4 sm:$0xff]   ;;  %v7513_v10 = vld [vmem:[%s11145_s1 + $0xde4] ss:$16 sps:$4 sm:$0xff]  }
  0xb1   :  { %5080 = vmatprep.subr.bf16.mxu1 %v7440_v11  ;;  %v7516_v11 = vld [vmem:[%s11145_s1 + $0xfe4] ss:$16 sps:$4 sm:$0xff]  }
  0xb3   :  { %5040 = vmatpush2.bf16.msra.mxu0 %v7435_v12  ;;  %v7511_v12 = vld [vmem:[%s11145_s1 + $0xde0] ss:$16 sps:$4 sm:$0xff]  }
  0xb4   :  { %5081 = vmatpush2.bf16.msra.mxu1 %v7438_v13  ;;  %5041 = vmatprep.subr.bf16.mxu0 %v7443_v14  ;;  %v7514_v13 = vld [vmem:[%s11145_s1 + $0xfe0] ss:$16 sps:$4 sm:$0xff]   ;;  %v7519_v14 = vld [vmem:[%s11145_s1 + $0xdc4] ss:$16 sps:$4 sm:$0xff]  }
  0xb5   :  { %5082 = vmatprep.subr.bf16.mxu1 %v7446_v15  ;;  %v7522_v15 = vld [vmem:[%s11145_s1 + $0xfc4] ss:$16 sps:$4 sm:$0xff]  }
  0xb7   :  { %5042 = vmatpush2.bf16.msra.mxu0 %v7441_v18  ;;  %v7517_v18 = vld [vmem:[%s11145_s1 + $0xdc0] ss:$16 sps:$4 sm:$0xff]  }
  0xb8   :  { %5083 = vmatpush2.bf16.msra.mxu1 %v7444_v19  ;;  %5043 = vmatprep.subr.bf16.mxu0 %v7449_v20  ;;  %v7520_v19 = vld [vmem:[%s11145_s1 + $0xfc0] ss:$16 sps:$4 sm:$0xff]   ;;  %v7525_v20 = vld [vmem:[%s11145_s1 + $0xda4] ss:$16 sps:$4 sm:$0xff]  }
  0xb9   :  { %5084 = vmatprep.subr.bf16.mxu1 %v7452_v21  ;;  %v7528_v21 = vld [vmem:[%s11145_s1 + $0xfa4] ss:$16 sps:$4 sm:$0xff]  }
  0xbb   :  { %5044 = vmatpush2.bf16.msra.mxu0 %v7447_v26  ;;  %v7523_v26 = vld [vmem:[%s11145_s1 + $0xda0] ss:$16 sps:$4 sm:$0xff]  }
  0xbc   :  { %5085 = vmatpush2.bf16.msra.mxu1 %v7450_v27  ;;  %5045 = vmatprep.subr.bf16.mxu0 %v7455_v28  ;;  %v7526_v27 = vld [vmem:[%s11145_s1 + $0xfa0] ss:$16 sps:$4 sm:$0xff]   ;;  %v7531_v28 = vld [vmem:[%s11145_s1 + $0xd84] ss:$16 sps:$4 sm:$0xff]  }
  0xbd   :  { %5086 = vmatprep.subr.bf16.mxu1 %v7458_v29  ;;  %v7534_v29 = vld [vmem:[%s11145_s1 + $0xf84] ss:$16 sps:$4 sm:$0xff]  }
  0xbf   :  { %5046 = vmatpush2.bf16.msra.mxu0 %v7453_v30  ;;  %v7529_v30 = vld [vmem:[%s11145_s1 + $0xd80] ss:$16 sps:$4 sm:$0xff]  }
  0xc0   :  { %5087 = vmatpush2.bf16.msra.mxu1 %v7456_v31  ;;  %5097 = vmatprep.subr.bf16.mxu0 %v7465_v32  ;;  %v7532_v31 = vld [vmem:[%s11145_s1 + $0xf80] ss:$16 sps:$4 sm:$0xff]   ;;  %v7537_v32 = vld [vmem:[%s11145_s1 + $0xd64] ss:$16 sps:$4 sm:$0xff]  }
  0xc1   :  { %5138 = vmatprep.subr.bf16.mxu1 %v7468_v33  ;;  %v7540_v33 = vld [vmem:[%s11145_s1 + $0xf64] ss:$16 sps:$4 sm:$0xff]  }
  0xc2   :  { %5048 = vmatmul.mubr.bf16.vlgmr.msra.gmra.mxu0 %v9089_v38 }
  0xc3   :  { %5089 = vmatmul.mubr.bf16.vlgmr.msra.gmra.mxu1 %v9093_v39  ;;  %5098 = vmatpush1.bf16.msra.mxu0 %v7463_v34  ;;  %v7535_v34 = vld [vmem:[%s11145_s1 + $0xd60] ss:$16 sps:$4 sm:$0xff]  }
  0xc4   :  { %5139 = vmatpush1.bf16.msra.mxu1 %v7466_v41  ;;  %5099 = vmatprep.subr.bf16.mxu0 %v7471_v22  ;;  %v7538_v41 = vld [vmem:[%s11145_s1 + $0xf60] ss:$16 sps:$4 sm:$0xff]   ;;  %v7543_v22 = vld [vmem:[%s11145_s1 + $0xd44] ss:$16 sps:$4 sm:$0xff]  }
  0xc5   :  { %5140 = vmatprep.subr.bf16.mxu1 %v7474_v23  ;;  %5129 = vmatprep.mubr.bf16.mxu0 %v9111_v42  ;;  %v7546_v23 = vld [vmem:[%s11145_s1 + $0xf44] ss:$16 sps:$4 sm:$0xff]  }
  0xc6   :  { %5170 = vmatprep.mubr.bf16.mxu1 %v9115_v43 }
  0xc7   :  { %5100 = vmatpush1.bf16.msra.mxu0 %v7469_v44  ;;  %v7541_v44 = vld [vmem:[%s11145_s1 + $0xd40] ss:$16 sps:$4 sm:$0xff]  }
  0xc8   :  { %5141 = vmatpush1.bf16.msra.mxu1 %v7472_v45  ;;  %5101 = vmatprep.subr.bf16.mxu0 %v7477_v46  ;;  %v7544_v45 = vld [vmem:[%s11145_s1 + $0xf40] ss:$16 sps:$4 sm:$0xff]   ;;  %v7549_v46 = vld [vmem:[%s11145_s1 + $0xd24] ss:$16 sps:$4 sm:$0xff]  }
  0xc9   :  { %5142 = vmatprep.subr.bf16.mxu1 %v7480_v48  ;;  %v820_v48 = vlaneseq }
  0xcb   :  { %5102 = vmatpush1.bf16.msra.mxu0 %v7475_v49  ;;  %v7552_v49 = vld [vmem:[%s11145_s1 + $0xf24] ss:$16 sps:$4 sm:$0xff]  }
  0xcc   :  { %5143 = vmatpush1.bf16.msra.mxu1 %v7478_v50  ;;  %5103 = vmatprep.subr.bf16.mxu0 %v7483_v52  ;;  %v7547_v50 = vld [vmem:[%s11145_s1 + $0xd20] ss:$16 sps:$4 sm:$0xff]  }
  0xcd   :  { %5144 = vmatprep.subr.bf16.mxu1 %v7486_v53  ;;  %v7550_v52 = vld [vmem:[%s11145_s1 + $0xf20] ss:$16 sps:$4 sm:$0xff]   ;;  %v7555_v53 = vld [vmem:[%s11145_s1 + $0xd04] ss:$16 sps:$4 sm:$0xff]  }
  0xcf   :  { %5104 = vmatpush1.bf16.msra.mxu0 %v7481_v54  ;;  %v9286_v54 = vshrl.u32 %v820_v48, 7  ;;  %v7587_v48 = vld [vmem:[%s11145_s1 + $0x1060] ss:$16 sps:$4 sm:$0xff]  }
  0xd0   :  { %5145 = vmatpush1.bf16.msra.mxu1 %v7484_v55  ;;  %5105 = vmatprep.subr.bf16.mxu0 %v7489_v56  ;;  %v7558_v55 = vld [vmem:[%s11145_s1 + $0xf04] ss:$16 sps:$4 sm:$0xff]   ;;  %v7553_v56 = vld [vmem:[%s11145_s1 + $0xd00] ss:$16 sps:$4 sm:$0xff]  }
  0xd1   :  { %5146 = vmatprep.subr.bf16.mxu1 %v7492_v57  ;;  %v7556_v57 = vld [vmem:[%s11145_s1 + $0xf00] ss:$16 sps:$4 sm:$0xff]  }
  0xd3   :  { %5106 = vmatpush1.bf16.msra.mxu0 %v7487_v58  ;;  %v818_v58 = vld [vmem:[%s11147_s2] sm:$0xf] }
  0xd4   :  { %5147 = vmatpush1.bf16.msra.mxu1 %v7490_v59  ;;  %5107 = vmatprep.subr.bf16.mxu0 %v7495_v60  ;;  %v822_v59 = vsub.s32 0, %v9286_v54  ;;  %v7565_v60 = vld [vmem:[%s11145_s1 + $0x10e4] ss:$16 sps:$4 sm:$0xff]  }
  0xd5   :  { %5148 = vmatprep.subr.bf16.mxu1 %v7498_v61  ;;  %v7568_v61 = vld [vmem:[%s11145_s1 + $0x12e4] ss:$16 sps:$4 sm:$0xff]  }
  0xd7   :  { %5108 = vmatpush1.bf16.msra.mxu0 %v7493_v62  ;;  %v7563_v62 = vld [vmem:[%s11145_s1 + $0x10e0] ss:$16 sps:$4 sm:$0xff]  }
  0xd8   :  { %5149 = vmatpush1.bf16.msra.mxu1 %v7496_v63  ;;  %5109 = vmatprep.subr.bf16.mxu0 %v7501_v0  ;;  %v826_v63 = vsub.s32 1, %v9286_v54  ;;  %v9313_v0 = vcombine.low %v9085_v35, %v9085_v35  ;;  %v7566_v35 = vld [vmem:[%s11145_s1 + $0x12e0] ss:$16 sps:$4 sm:$0xff]  }
  0xd9   :  { %5150 = vmatprep.subr.bf16.mxu1 %v7504_v1  ;;  %v9317_v1 = vcombine.low %v9098_v40, %v9098_v40  ;;  %v7571_v40 = vld [vmem:[%s11145_s1 + $0x10c4] ss:$16 sps:$4 sm:$0xff]  }
  0xdb   :  { %5110 = vmatpush1.bf16.msra.mxu0 %v7499_v2  ;;  %v9322_v2 = vld [vmem:[%s11146_s0 + $0x40] sm:$0xff] }
  0xdc   :  { %5151 = vmatpush1.bf16.msra.mxu1 %v7502_v3  ;;  %5111 = vmatprep.subr.bf16.mxu0 %v7507_v4  ;;  %v9327_v3 = vld [vmem:[%s11146_s0 + $0x48] sm:$0xff]  ;;  %v823_v4 = vrot.slane %v818_v58, %v822_v59  ;;  %v7602_v59 = vld [vmem:[%s11145_s1 + $0x1220] ss:$16 sps:$4 sm:$0xff]  }
  0xdd   :  { %5152 = vmatprep.subr.bf16.mxu1 %v7510_v5  ;;  %v7574_v5 = vld [vmem:[%s11145_s1 + $0x12c4] ss:$16 sps:$4 sm:$0xff]  }
  0xdf   :  { %5112 = vmatpush1.bf16.msra.mxu0 %v7505_v8  ;;  %v827_v8 = vrot.slane %v818_v58, %v826_v63  ;;  %v7599_v58 = vld [vmem:[%s11145_s1 + $0x1020] ss:$16 sps:$4 sm:$0xff]  }
  0xe0   :  { %5153 = vmatpush1.bf16.msra.mxu1 %v7508_v9  ;;  %5113 = vmatprep.subr.bf16.mxu0 %v7513_v10  ;;  %v9340_v9 = vcombine.high %v9322_v2, %v9322_v2  ;;  %v9344_v10 = vcombine.high %v9327_v3, %v9327_v3  ;;  %v7608_v63 = vld [vmem:[%s11145_s1 + $0x1200] ss:$16 sps:$4 sm:$0xff]  }
  0xe1   :  { %5154 = vmatprep.subr.bf16.mxu1 %v7516_v11 }
  0xe3   :  { %5114 = vmatpush2.bf16.msra.mxu0 %v7511_v12 }
  0xe4   :  { %5155 = vmatpush2.bf16.msra.mxu1 %v7514_v13  ;;  %5115 = vmatprep.subr.bf16.mxu0 %v7519_v14  ;;  %v7569_v13 = vld [vmem:[%s11145_s1 + $0x10c0] ss:$16 sps:$4 sm:$0xff]  }
  0xe5   :  { %5156 = vmatprep.subr.bf16.mxu1 %v7522_v15  ;;  %v7572_v15 = vld [vmem:[%s11145_s1 + $0x12c0] ss:$16 sps:$4 sm:$0xff]  }
  0xe7   :  { %5116 = vmatpush2.bf16.msra.mxu0 %v7517_v18 }
  0xe8   :  { %5157 = vmatpush2.bf16.msra.mxu1 %v7520_v19  ;;  %5117 = vmatprep.subr.bf16.mxu0 %v7525_v20  ;;  %v7577_v20 = vld [vmem:[%s11145_s1 + $0x10a4] ss:$16 sps:$4 sm:$0xff]  }
  0xe9   :  { %5158 = vmatprep.subr.bf16.mxu1 %v7528_v21  ;;  %v7580_v21 = vld [vmem:[%s11145_s1 + $0x12a4] ss:$16 sps:$4 sm:$0xff]  }
  0xeb   :  { %5118 = vmatpush2.bf16.msra.mxu0 %v7523_v26 }
  0xec   :  { %5159 = vmatpush2.bf16.msra.mxu1 %v7526_v27  ;;  %5119 = vmatprep.subr.bf16.mxu0 %v7531_v28 }
  0xed   :  { %5160 = vmatprep.subr.bf16.mxu1 %v7534_v29 }
  0xef   :  { %5120 = vmatpush2.bf16.msra.mxu0 %v7529_v30  ;;  %v7575_v30 = vld [vmem:[%s11145_s1 + $0x10a0] ss:$16 sps:$4 sm:$0xff]  }
  0xf0   :  { %5161 = vmatpush2.bf16.msra.mxu1 %v7532_v31  ;;  %5121 = vmatprep.subr.bf16.mxu0 %v7537_v32  ;;  %v7578_v32 = vld [vmem:[%s11145_s1 + $0x12a0] ss:$16 sps:$4 sm:$0xff]  }
  0xf1   :  { %5162 = vmatprep.subr.bf16.mxu1 %v7540_v33 }
  0xf3   :  { %5122 = vmatpush2.bf16.msra.mxu0 %v7535_v34 }
  0xf4   :  { %5163 = vmatpush2.bf16.msra.mxu1 %v7538_v41  ;;  %5123 = vmatprep.subr.bf16.mxu0 %v7543_v22  ;;  %v7583_v41 = vld [vmem:[%s11145_s1 + $0x1084] ss:$16 sps:$4 sm:$0xff]  }
  0xf5   :  { %5164 = vmatprep.subr.bf16.mxu1 %v7546_v23  ;;  %v7586_v22 = vld [vmem:[%s11145_s1 + $0x1284] ss:$16 sps:$4 sm:$0xff]   ;;  %v7581_v23 = vld [vmem:[%s11145_s1 + $0x1080] ss:$16 sps:$4 sm:$0xff]  }
  0xf7   :  { %5124 = vmatpush2.bf16.msra.mxu0 %v7541_v44  ;;  %v7584_v44 = vld [vmem:[%s11145_s1 + $0x1280] ss:$16 sps:$4 sm:$0xff]  }
  0xf8   :  { %5165 = vmatpush2.bf16.msra.mxu1 %v7544_v45  ;;  %5125 = vmatprep.subr.bf16.mxu0 %v7549_v46  ;;  %v7589_v45 = vld [vmem:[%s11145_s1 + $0x1064] ss:$16 sps:$4 sm:$0xff]  }
  0xf9   :  { %5166 = vmatprep.subr.bf16.mxu1 %v7552_v49  ;;  %v7592_v46 = vld [vmem:[%s11145_s1 + $0x1264] ss:$16 sps:$4 sm:$0xff]   ;;  %v7590_v49 = vld [vmem:[%s11145_s1 + $0x1260] ss:$16 sps:$4 sm:$0xff]  }
  0xfb   :  { %5126 = vmatpush2.bf16.msra.mxu0 %v7547_v50  ;;  %v7595_v50 = vld [vmem:[%s11145_s1 + $0x1044] ss:$16 sps:$4 sm:$0xff]  }
  0xfc   :  { %5167 = vmatpush2.bf16.msra.mxu1 %v7550_v52  ;;  %5127 = vmatprep.subr.bf16.mxu0 %v7555_v53  ;;  %v7598_v52 = vld [vmem:[%s11145_s1 + $0x1244] ss:$16 sps:$4 sm:$0xff]   ;;  %v7593_v53 = vld [vmem:[%s11145_s1 + $0x1040] ss:$16 sps:$4 sm:$0xff]  }
  0xfd   :  { %5168 = vmatprep.subr.bf16.mxu1 %v7558_v55  ;;  %v7596_v55 = vld [vmem:[%s11145_s1 + $0x1240] ss:$16 sps:$4 sm:$0xff]  }
  0xff   :  { %5128 = vmatpush2.bf16.msra.mxu0 %v7553_v56  ;;  %v7601_v56 = vld [vmem:[%s11145_s1 + $0x1024] ss:$16 sps:$4 sm:$0xff]  }
 0x100   :  { %5169 = vmatpush2.bf16.msra.mxu1 %v7556_v57  ;;  %5179 = vmatprep.subr.bf16.mxu0 %v7565_v60  ;;  %v7604_v57 = vld [vmem:[%s11145_s1 + $0x1224] ss:$16 sps:$4 sm:$0xff]  }
 0x101   :  { %5220 = vmatprep.subr.bf16.mxu1 %v7568_v61  ;;  %v7607_v60 = vld [vmem:[%s11145_s1 + $0x1004] ss:$16 sps:$4 sm:$0xff]  }
 0x102   :  { %v4885_v11 = vpop.f32.mrf.mxu0  ;;  %5130 = vmatmul.mubr.bf16.vlgmr.msra.gmra.mxu0 %v9313_v0  ;;  %v7610_v61 = vld [vmem:[%s11145_s1 + $0x1204] ss:$16 sps:$4 sm:$0xff]  }
 0x103   :  { %v4926_v12 = vpop.f32.mrf.mxu1  ;;  %5171 = vmatmul.mubr.bf16.vlgmr.msra.gmra.mxu1 %v9317_v1  ;;  %v4886_v14 = vadd.f32 %v4885_v11, %v823_v4  ;;  %5180 = vmatpush1.bf16.msra.mxu0 %v7563_v62  ;;  %v7605_v62 = vld [vmem:[%s11145_s1 + $0x1000] ss:$16 sps:$4 sm:$0xff]   ;;  %v7613_v4 = vld [vmem:[%s11145_s1 + $0x11e4] ss:$16 sps:$4 sm:$0xff]  }
 0x104   :  { %5221 = vmatpush1.bf16.msra.mxu1 %v7566_v35  ;;  %v4887_v18 = vpop.f32.mrf.mxu0  ;;  %5181 = vmatprep.subr.bf16.mxu0 %v7571_v40  ;;  %v7616_v35 = vld [vmem:[%s11145_s1 + $0x13e4] ss:$16 sps:$4 sm:$0xff]   ;;  %v7611_v40 = vld [vmem:[%s11145_s1 + $0x11e0] ss:$16 sps:$4 sm:$0xff]  }
 0x105   :  { %v4928_v19 = vpop.f32.mrf.mxu1  ;;  %5222 = vmatprep.subr.bf16.mxu1 %v7574_v5  ;;  %v9360_v26 = vadd.f32 %v4926_v12, %v4886_v14  ;;  %v4888_v27 = vadd.f32 %v4887_v18, %v827_v8  ;;  %5211 = vmatprep.mubr.bf16.mxu0 %v9340_v9  ;;  %v7614_v5 = vld [vmem:[%s11145_s1 + $0x13e0] ss:$16 sps:$4 sm:$0xff]   ;;  %v7619_v8 = vld [vmem:[%s11145_s1 + $0x11c4] ss:$16 sps:$4 sm:$0xff]  }
 0x106   :  { %5252 = vmatprep.mubr.bf16.mxu1 %v9344_v10  ;;  %v4889_v28 = vpop.f32.mrf.mxu0  ;;  %v7622_v11 = vld [vmem:[%s11145_s1 + $0x13c4] ss:$16 sps:$4 sm:$0xff]   ;;  %v7617_v12 = vld [vmem:[%s11145_s1 + $0x11c0] ss:$16 sps:$4 sm:$0xff]  }
 0x107   :  { %v4930_v29 = vpop.f32.mrf.mxu1  ;;  %v9367_v31 = vadd.f32 %v4928_v19, %v4888_v27  ;;  %5182 = vmatpush1.bf16.msra.mxu0 %v7569_v13  ;;  %v7620_v13 = vld [vmem:[%s11145_s1 + $0x13c0] ss:$16 sps:$4 sm:$0xff]   ;;  %v7625_v14 = vld [vmem:[%s11145_s1 + $0x11a4] ss:$16 sps:$4 sm:$0xff]  }
 0x108   :  { %5223 = vmatpush1.bf16.msra.mxu1 %v7572_v15  ;;  %v4890_v33 = vpop.f32.mrf.mxu0  ;;  %5183 = vmatprep.subr.bf16.mxu0 %v7577_v20  ;;  %v7628_v15 = vld [vmem:[%s11145_s1 + $0x13a4] ss:$16 sps:$4 sm:$0xff]   ;;  %v7623_v18 = vld [vmem:[%s11145_s1 + $0x11a0] ss:$16 sps:$4 sm:$0xff]  }
 0x109   :  { %v4931_v34 = vpop.f32.mrf.mxu1  ;;  %5224 = vmatprep.subr.bf16.mxu1 %v7580_v21  ;;  %v7626_v19 = vld [vmem:[%s11145_s1 + $0x13a0] ss:$16 sps:$4 sm:$0xff]   ;;  %v7631_v20 = vld [vmem:[%s11145_s1 + $0x1184] ss:$16 sps:$4 sm:$0xff]  }
 0x10a   :  { %v7634_v21 = vld [vmem:[%s11145_s1 + $0x1384] ss:$16 sps:$4 sm:$0xff]   ;;  %v7629_v27 = vld [vmem:[%s11145_s1 + $0x1180] ss:$16 sps:$4 sm:$0xff]  }
 0x10b   :  { %5184 = vmatpush1.bf16.msra.mxu0 %v7575_v30  ;;  %v7632_v28 = vld [vmem:[%s11145_s1 + $0x1380] ss:$16 sps:$4 sm:$0xff]   ;;  %v7637_v29 = vld [vmem:[%s11145_s1 + $0x1164] ss:$16 sps:$4 sm:$0xff]  }
 0x10c   :  { %5225 = vmatpush1.bf16.msra.mxu1 %v7578_v32  ;;  %5185 = vmatprep.subr.bf16.mxu0 %v7583_v41  ;;  %v7640_v30 = vld [vmem:[%s11145_s1 + $0x1364] ss:$16 sps:$4 sm:$0xff]   ;;  %v7635_v32 = vld [vmem:[%s11145_s1 + $0x1160] ss:$16 sps:$4 sm:$0xff]  }
 0x10d   :  { %5226 = vmatprep.subr.bf16.mxu1 %v7586_v22  ;;  %v7638_v33 = vld [vmem:[%s11145_s1 + $0x1360] ss:$16 sps:$4 sm:$0xff]   ;;  %v7643_v34 = vld [vmem:[%s11145_s1 + $0x1144] ss:$16 sps:$4 sm:$0xff]  }
 0x10e   :  { %v7646_v41 = vld [vmem:[%s11145_s1 + $0x1344] ss:$16 sps:$4 sm:$0xff]   ;;  %v7641_v22 = vld [vmem:[%s11145_s1 + $0x1140] ss:$16 sps:$4 sm:$0xff]  }
 0x10f   :  { %5186 = vmatpush1.bf16.msra.mxu0 %v7581_v23  ;;  %v7644_v23 = vld [vmem:[%s11145_s1 + $0x1340] ss:$16 sps:$4 sm:$0xff]  }
 0x110   :  { %5227 = vmatpush1.bf16.msra.mxu1 %v7584_v44  ;;  %5187 = vmatprep.subr.bf16.mxu0 %v7589_v45  ;;  %v7649_v44 = vld [vmem:[%s11145_s1 + $0x1124] ss:$16 sps:$4 sm:$0xff]  }
 0x111   :  { %5228 = vmatprep.subr.bf16.mxu1 %v7592_v46  ;;  %v7652_v45 = vld [vmem:[%s11145_s1 + $0x1324] ss:$16 sps:$4 sm:$0xff]   ;;  %v7647_v46 = vld [vmem:[%s11145_s1 + $0x1120] ss:$16 sps:$4 sm:$0xff]  }
 0x113   :  { %5188 = vmatpush1.bf16.msra.mxu0 %v7587_v48  ;;  %v7650_v48 = vld [vmem:[%s11145_s1 + $0x1320] ss:$16 sps:$4 sm:$0xff]  }
 0x114   :  { %5229 = vmatpush1.bf16.msra.mxu1 %v7590_v49  ;;  %5189 = vmatprep.subr.bf16.mxu0 %v7595_v50  ;;  %v7655_v49 = vld [vmem:[%s11145_s1 + $0x1104] ss:$16 sps:$4 sm:$0xff]  }
 0x115   :  { %5230 = vmatprep.subr.bf16.mxu1 %v7598_v52  ;;  %v7658_v50 = vld [vmem:[%s11145_s1 + $0x1304] ss:$16 sps:$4 sm:$0xff]   ;;  %v7653_v52 = vld [vmem:[%s11145_s1 + $0x1100] ss:$16 sps:$4 sm:$0xff]  }
 0x117   :  { %5190 = vmatpush1.bf16.msra.mxu0 %v7593_v53  ;;  %v7656_v53 = vld [vmem:[%s11145_s1 + $0x1300] ss:$16 sps:$4 sm:$0xff]  }
 0x118   :  { %5231 = vmatpush1.bf16.msra.mxu1 %v7596_v55  ;;  %5191 = vmatprep.subr.bf16.mxu0 %v7601_v56  ;;  %v7665_v55 = vld [vmem:[%s11145_s1 + $0x14e4] ss:$16 sps:$4 sm:$0xff]  }
 0x119   :  { %5232 = vmatprep.subr.bf16.mxu1 %v7604_v57  ;;  %v7668_v56 = vld [vmem:[%s11145_s1 + $0x16e4] ss:$16 sps:$4 sm:$0xff]  }
 0x11a   :  { %v9537_v57 = vld [vmem:[%s11146_s0 + $0x50] sm:$0xff] }
 0x11b   :  { %5192 = vmatpush1.bf16.msra.mxu0 %v7599_v58  ;;  %v9542_v58 = vld [vmem:[%s11146_s0 + $0x58] sm:$0xff] }
 0x11c   :  { %5233 = vmatpush1.bf16.msra.mxu1 %v7602_v59  ;;  %5193 = vmatprep.subr.bf16.mxu0 %v7607_v60  ;;  %v7663_v59 = vld [vmem:[%s11145_s1 + $0x14e0] ss:$16 sps:$4 sm:$0xff]  }
 0x11d   :  { %5234 = vmatprep.subr.bf16.mxu1 %v7610_v61  ;;  %v7666_v60 = vld [vmem:[%s11145_s1 + $0x16e0] ss:$16 sps:$4 sm:$0xff]   ;;  %v9552_v61 = vcombine.low %v9322_v2, %v9322_v2 }
 0x11e   :  { %v7669_v2 = vld [vmem:[%s11145_s1 + $0x14c0] ss:$16 sps:$4 sm:$0xff]  }
 0x11f   :  { %5194 = vmatpush1.bf16.msra.mxu0 %v7605_v62  ;;  %v9556_v62 = vcombine.low %v9327_v3, %v9327_v3  ;;  %v7672_v3 = vld [vmem:[%s11145_s1 + $0x16c0] ss:$16 sps:$4 sm:$0xff]  }
 0x120   :  { %5235 = vmatpush1.bf16.msra.mxu1 %v7608_v63  ;;  %5195 = vmatprep.subr.bf16.mxu0 %v7613_v4  ;;  %v7671_v63 = vld [vmem:[%s11145_s1 + $0x14c4] ss:$16 sps:$4 sm:$0xff]  }
 0x121   :  { %5236 = vmatprep.subr.bf16.mxu1 %v7616_v35  ;;  %v7674_v4 = vld [vmem:[%s11145_s1 + $0x16c4] ss:$16 sps:$4 sm:$0xff]   ;;  %v9572_v35 = vcombine.high %v9537_v57, %v9537_v57 }
 0x123   :  { %5196 = vmatpush2.bf16.msra.mxu0 %v7611_v40  ;;  %v9576_v40 = vcombine.high %v9542_v58, %v9542_v58 }
 0x124   :  { %5237 = vmatpush2.bf16.msra.mxu1 %v7614_v5  ;;  %5197 = vmatprep.subr.bf16.mxu0 %v7619_v8 }
 0x125   :  { %5238 = vmatprep.subr.bf16.mxu1 %v7622_v11 }
 0x127   :  { %5198 = vmatpush2.bf16.msra.mxu0 %v7617_v12 }
 0x128   :  { %5239 = vmatpush2.bf16.msra.mxu1 %v7620_v13  ;;  %5199 = vmatprep.subr.bf16.mxu0 %v7625_v14  ;;  %v7677_v14 = vld [vmem:[%s11145_s1 + $0x14a4] ss:$16 sps:$4 sm:$0xff]  }
 0x129   :  { %5240 = vmatprep.subr.bf16.mxu1 %v7628_v15  ;;  %v7680_v15 = vld [vmem:[%s11145_s1 + $0x16a4] ss:$16 sps:$4 sm:$0xff]  }
 0x12b   :  { %5200 = vmatpush2.bf16.msra.mxu0 %v7623_v18 }
 0x12c   :  { %5241 = vmatpush2.bf16.msra.mxu1 %v7626_v19  ;;  %5201 = vmatprep.subr.bf16.mxu0 %v7631_v20  ;;  %v7678_v20 = vld [vmem:[%s11145_s1 + $0x16a0] ss:$16 sps:$4 sm:$0xff]  }
 0x12d   :  { %5242 = vmatprep.subr.bf16.mxu1 %v7634_v21 }
 0x12f   :  { %5202 = vmatpush2.bf16.msra.mxu0 %v7629_v27 }
 0x130   :  { %5243 = vmatpush2.bf16.msra.mxu1 %v7632_v28  ;;  %5203 = vmatprep.subr.bf16.mxu0 %v7637_v29 }
 0x131   :  { %5244 = vmatprep.subr.bf16.mxu1 %v7640_v30  ;;  %v7683_v30 = vld [vmem:[%s11145_s1 + $0x1484] ss:$16 sps:$4 sm:$0xff]  }
 0x133   :  { %5204 = vmatpush2.bf16.msra.mxu0 %v7635_v32  ;;  %v7686_v32 = vld [vmem:[%s11145_s1 + $0x1684] ss:$16 sps:$4 sm:$0xff]  }
 0x134   :  { %5245 = vmatpush2.bf16.msra.mxu1 %v7638_v33  ;;  %5205 = vmatprep.subr.bf16.mxu0 %v7643_v34  ;;  %v7681_v33 = vld [vmem:[%s11145_s1 + $0x1480] ss:$16 sps:$4 sm:$0xff]  }
 0x135   :  { %5246 = vmatprep.subr.bf16.mxu1 %v7646_v41  ;;  %v7684_v34 = vld [vmem:[%s11145_s1 + $0x1680] ss:$16 sps:$4 sm:$0xff]   ;;  %v7689_v41 = vld [vmem:[%s11145_s1 + $0x1464] ss:$16 sps:$4 sm:$0xff]  }
 0x137   :  { %5206 = vmatpush2.bf16.msra.mxu0 %v7641_v22  ;;  %v7692_v22 = vld [vmem:[%s11145_s1 + $0x1664] ss:$16 sps:$4 sm:$0xff]  }
 0x138   :  { %5247 = vmatpush2.bf16.msra.mxu1 %v7644_v23  ;;  %5207 = vmatprep.subr.bf16.mxu0 %v7649_v44  ;;  %v7687_v23 = vld [vmem:[%s11145_s1 + $0x1460] ss:$16 sps:$4 sm:$0xff]  }
 0x139   :  { %5248 = vmatprep.subr.bf16.mxu1 %v7652_v45  ;;  %v7690_v44 = vld [vmem:[%s11145_s1 + $0x1660] ss:$16 sps:$4 sm:$0xff]   ;;  %v7695_v45 = vld [vmem:[%s11145_s1 + $0x1444] ss:$16 sps:$4 sm:$0xff]  }
 0x13b   :  { %5208 = vmatpush2.bf16.msra.mxu0 %v7647_v46  ;;  %v7698_v46 = vld [vmem:[%s11145_s1 + $0x1644] ss:$16 sps:$4 sm:$0xff]  }
 0x13c   :  { %5249 = vmatpush2.bf16.msra.mxu1 %v7650_v48  ;;  %5209 = vmatprep.subr.bf16.mxu0 %v7655_v49  ;;  %v7693_v48 = vld [vmem:[%s11145_s1 + $0x1440] ss:$16 sps:$4 sm:$0xff]  }
 0x13d   :  { %5250 = vmatprep.subr.bf16.mxu1 %v7658_v50  ;;  %v7696_v49 = vld [vmem:[%s11145_s1 + $0x1640] ss:$16 sps:$4 sm:$0xff]   ;;  %v7701_v50 = vld [vmem:[%s11145_s1 + $0x1424] ss:$16 sps:$4 sm:$0xff]  }
 0x13f   :  { %5210 = vmatpush2.bf16.msra.mxu0 %v7653_v52  ;;  %v7704_v52 = vld [vmem:[%s11145_s1 + $0x1624] ss:$16 sps:$4 sm:$0xff]  }
 0x140   :  { %5251 = vmatpush2.bf16.msra.mxu1 %v7656_v53  ;;  %5261 = vmatprep.subr.bf16.mxu0 %v7665_v55  ;;  %v7699_v53 = vld [vmem:[%s11145_s1 + $0x1420] ss:$16 sps:$4 sm:$0xff]  }
 0x141   :  { %5302 = vmatprep.subr.bf16.mxu1 %v7668_v56  ;;  %v7702_v55 = vld [vmem:[%s11145_s1 + $0x1620] ss:$16 sps:$4 sm:$0xff]   ;;  %v7707_v56 = vld [vmem:[%s11145_s1 + $0x1404] ss:$16 sps:$4 sm:$0xff]  }
 0x142   :  { %v4967_v5 = vpop.f32.mrf.mxu0  ;;  %5212 = vmatmul.mubr.bf16.vlgmr.msra.gmra.mxu0 %v9552_v61 }
 0x143   :  { %v5008_v8 = vpop.f32.mrf.mxu1  ;;  %5253 = vmatmul.mubr.bf16.vlgmr.msra.gmra.mxu1 %v9556_v62  ;;  %v4968_v11 = vadd.f32 %v4967_v5, %v9360_v26  ;;  %5262 = vmatpush1.bf16.msra.mxu0 %v7663_v59  ;;  %v7675_v26 = vld [vmem:[%s11145_s1 + $0x14a0] ss:$16 sps:$4 sm:$0xff]   ;;  %v7710_v59 = vld [vmem:[%s11145_s1 + $0x1604] ss:$16 sps:$4 sm:$0xff]  }
 0x144   :  { %5303 = vmatpush1.bf16.msra.mxu1 %v7666_v60  ;;  %v4969_v12 = vpop.f32.mrf.mxu0  ;;  %5263 = vmatprep.subr.bf16.mxu0 %v7671_v63  ;;  %v7705_v60 = vld [vmem:[%s11145_s1 + $0x1400] ss:$16 sps:$4 sm:$0xff]  }
 0x145   :  { %v5010_v13 = vpop.f32.mrf.mxu1  ;;  %5304 = vmatprep.subr.bf16.mxu1 %v7674_v4  ;;  %v9587_v18 = vadd.f32 %v5008_v8, %v4968_v11  ;;  %v4970_v19 = vadd.f32 %v4969_v12, %v9367_v31  ;;  %5293 = vmatprep.mubr.bf16.mxu0 %v9572_v35  ;;  %v7708_v63 = vld [vmem:[%s11145_s1 + $0x1600] ss:$16 sps:$4 sm:$0xff]   ;;  %v7713_v4 = vld [vmem:[%s11145_s1 + $0x15e4] ss:$16 sps:$4 sm:$0xff]  }
 0x146   :  { %5334 = vmatprep.mubr.bf16.mxu1 %v9576_v40  ;;  %v4971_v21 = vpop.f32.mrf.mxu0  ;;  %v7714_v5 = vld [vmem:[%s11145_s1 + $0x17e0] ss:$16 sps:$4 sm:$0xff]   ;;  %v7719_v8 = vld [vmem:[%s11145_s1 + $0x15c4] ss:$16 sps:$4 sm:$0xff]  }
 0x147   :  { %v5012_v27 = vpop.f32.mrf.mxu1  ;;  %v9598_v28 = vadd.f32 %v5010_v13, %v4970_v19  ;;  %5264 = vmatpush1.bf16.msra.mxu0 %v7669_v2  ;;  %v7716_v2 = vld [vmem:[%s11145_s1 + $0x17e4] ss:$16 sps:$4 sm:$0xff]   ;;  %v7717_v12 = vld [vmem:[%s11145_s1 + $0x15c0] ss:$16 sps:$4 sm:$0xff]  }
 0x148   :  { %5305 = vmatpush1.bf16.msra.mxu1 %v7672_v3  ;;  %v4972_v29 = vpop.f32.mrf.mxu0  ;;  %5265 = vmatprep.subr.bf16.mxu0 %v7677_v14  ;;  %v7711_v3 = vld [vmem:[%s11145_s1 + $0x15e0] ss:$16 sps:$4 sm:$0xff]   ;;  %v7722_v11 = vld [vmem:[%s11145_s1 + $0x17c4] ss:$16 sps:$4 sm:$0xff]  }
 0x149   :  { %v5013_v31 = vpop.f32.mrf.mxu1  ;;  %5306 = vmatprep.subr.bf16.mxu1 %v7680_v15  ;;  %v7720_v13 = vld [vmem:[%s11145_s1 + $0x17c0] ss:$16 sps:$4 sm:$0xff]   ;;  %v7725_v14 = vld [vmem:[%s11145_s1 + $0x15a4] ss:$16 sps:$4 sm:$0xff]  }
 0x14a   :  { %v7728_v15 = vld [vmem:[%s11145_s1 + $0x17a4] ss:$16 sps:$4 sm:$0xff]   ;;  %v7723_v19 = vld [vmem:[%s11145_s1 + $0x15a0] ss:$16 sps:$4 sm:$0xff]  }
 0x14b   :  { %5266 = vmatpush1.bf16.msra.mxu0 %v7675_v26  ;;  %v7726_v26 = vld [vmem:[%s11145_s1 + $0x17a0] ss:$16 sps:$4 sm:$0xff]   ;;  %v7734_v21 = vld [vmem:[%s11145_s1 + $0x1784] ss:$16 sps:$4 sm:$0xff]  }
 0x14c   :  { %5307 = vmatpush1.bf16.msra.mxu1 %v7678_v20  ;;  %5267 = vmatprep.subr.bf16.mxu0 %v7683_v30  ;;  %v7731_v20 = vld [vmem:[%s11145_s1 + $0x1584] ss:$16 sps:$4 sm:$0xff]   ;;  %v7729_v27 = vld [vmem:[%s11145_s1 + $0x1580] ss:$16 sps:$4 sm:$0xff]  }
 0x14d   :  { %5308 = vmatprep.subr.bf16.mxu1 %v7686_v32  ;;  %v7732_v29 = vld [vmem:[%s11145_s1 + $0x1780] ss:$16 sps:$4 sm:$0xff]   ;;  %v7737_v31 = vld [vmem:[%s11145_s1 + $0x1564] ss:$16 sps:$4 sm:$0xff]  }
 0x14e   :  { %v7740_v30 = vld [vmem:[%s11145_s1 + $0x1764] ss:$16 sps:$4 sm:$0xff]   ;;  %v7735_v32 = vld [vmem:[%s11145_s1 + $0x1560] ss:$16 sps:$4 sm:$0xff]  }
 0x14f   :  { %5268 = vmatpush1.bf16.msra.mxu0 %v7681_v33  ;;  %v7738_v33 = vld [vmem:[%s11145_s1 + $0x1760] ss:$16 sps:$4 sm:$0xff]  }
 0x150   :  { %5309 = vmatpush1.bf16.msra.mxu1 %v7684_v34  ;;  %5269 = vmatprep.subr.bf16.mxu0 %v7689_v41  ;;  %v7743_v34 = vld [vmem:[%s11145_s1 + $0x1544] ss:$16 sps:$4 sm:$0xff]  }
 0x151   :  { %5310 = vmatprep.subr.bf16.mxu1 %v7692_v22  ;;  %v7746_v41 = vld [vmem:[%s11145_s1 + $0x1744] ss:$16 sps:$4 sm:$0xff]   ;;  %v7741_v22 = vld [vmem:[%s11145_s1 + $0x1540] ss:$16 sps:$4 sm:$0xff]  }
 0x153   :  { %5270 = vmatpush1.bf16.msra.mxu0 %v7687_v23  ;;  %v7744_v23 = vld [vmem:[%s11145_s1 + $0x1740] ss:$16 sps:$4 sm:$0xff]  }
 0x154   :  { %5311 = vmatpush1.bf16.msra.mxu1 %v7690_v44  ;;  %5271 = vmatprep.subr.bf16.mxu0 %v7695_v45  ;;  %v7749_v44 = vld [vmem:[%s11145_s1 + $0x1524] ss:$16 sps:$4 sm:$0xff]  }
 0x155   :  { %5312 = vmatprep.subr.bf16.mxu1 %v7698_v46  ;;  %v7752_v45 = vld [vmem:[%s11145_s1 + $0x1724] ss:$16 sps:$4 sm:$0xff]   ;;  %v7747_v46 = vld [vmem:[%s11145_s1 + $0x1520] ss:$16 sps:$4 sm:$0xff]  }
 0x157   :  { %5272 = vmatpush1.bf16.msra.mxu0 %v7693_v48  ;;  %v7750_v48 = vld [vmem:[%s11145_s1 + $0x1720] ss:$16 sps:$4 sm:$0xff]  }
 0x158   :  { %5313 = vmatpush1.bf16.msra.mxu1 %v7696_v49  ;;  %5273 = vmatprep.subr.bf16.mxu0 %v7701_v50  ;;  %v7755_v49 = vld [vmem:[%s11145_s1 + $0x1504] ss:$16 sps:$4 sm:$0xff]  }
 0x159   :  { %5314 = vmatprep.subr.bf16.mxu1 %v7704_v52  ;;  %v7758_v50 = vld [vmem:[%s11145_s1 + $0x1704] ss:$16 sps:$4 sm:$0xff]   ;;  %v7753_v52 = vld [vmem:[%s11145_s1 + $0x1500] ss:$16 sps:$4 sm:$0xff]  }
 0x15b   :  { %5274 = vmatpush1.bf16.msra.mxu0 %v7699_v53  ;;  %v7756_v53 = vld [vmem:[%s11145_s1 + $0x1700] ss:$16 sps:$4 sm:$0xff]  }
 0x15c   :  { %5315 = vmatpush1.bf16.msra.mxu1 %v7702_v55  ;;  %5275 = vmatprep.subr.bf16.mxu0 %v7707_v56  ;;  %v7765_v55 = vld [vmem:[%s11145_s1 + $0x1864] ss:$16 sps:$4 sm:$0xff]   ;;  %v7768_v56 = vld [vmem:[%s11145_s1 + $0xec] ss:$16 sps:$4 sm:$0xff]  }
 0x15d   :  { %5316 = vmatprep.subr.bf16.mxu1 %v7710_v59  ;;  %v7763_v59 = vld [vmem:[%s11145_s1 + $0x1860] ss:$16 sps:$4 sm:$0xff]  }
 0x15f   :  { %5276 = vmatpush1.bf16.msra.mxu0 %v7705_v60  ;;  %v7766_v60 = vld [vmem:[%s11145_s1 + $0xe8] ss:$16 sps:$4 sm:$0xff]  }
 0x160   :  { %5317 = vmatpush1.bf16.msra.mxu1 %v7708_v63  ;;  %5277 = vmatprep.subr.bf16.mxu0 %v7713_v4  ;;  %v9770_v63 = vcombine.low %v9537_v57, %v9537_v57  ;;  %v9774_v4 = vcombine.low %v9542_v58, %v9542_v58  ;;  %v7769_v57 = vld [vmem:[%s11145_s1 + $0x1840] ss:$16 sps:$4 sm:$0xff]   ;;  %v7772_v58 = vld [vmem:[%s11145_s1 + $0xc8] ss:$16 sps:$4 sm:$0xff]  }
 0x161   :  { %5318 = vmatprep.subr.bf16.mxu1 %v7716_v2  ;;  %v7771_v2 = vld [vmem:[%s11145_s1 + $0x1844] ss:$16 sps:$4 sm:$0xff]  }
 0x163   :  { %5278 = vmatpush2.bf16.msra.mxu0 %v7711_v3  ;;  %v7774_v3 = vld [vmem:[%s11145_s1 + $0xcc] ss:$16 sps:$4 sm:$0xff]  }
 0x164   :  { %5319 = vmatpush2.bf16.msra.mxu1 %v7714_v5  ;;  %5279 = vmatprep.subr.bf16.mxu0 %v7719_v8 }
 0x165   :  { %5320 = vmatprep.subr.bf16.mxu1 %v7722_v11 }
 0x167   :  { %5280 = vmatpush2.bf16.msra.mxu0 %v7717_v12 }
 0x168   :  { %5321 = vmatpush2.bf16.msra.mxu1 %v7720_v13  ;;  %5281 = vmatprep.subr.bf16.mxu0 %v7725_v14  ;;  %v7777_v14 = vld [vmem:[%s11145_s1 + $0x1824] ss:$16 sps:$4 sm:$0xff]  }
 0x169   :  { %5322 = vmatprep.subr.bf16.mxu1 %v7728_v15  ;;  %v7780_v15 = vld [vmem:[%s11145_s1 + $0xac] ss:$16 sps:$4 sm:$0xff]  }
 0x16b   :  { %5282 = vmatpush2.bf16.msra.mxu0 %v7723_v19 }
 0x16c   :  { %5323 = vmatpush2.bf16.msra.mxu1 %v7726_v26  ;;  %5283 = vmatprep.subr.bf16.mxu0 %v7731_v20  ;;  %v7778_v20 = vld [vmem:[%s11145_s1 + $0xa8] ss:$16 sps:$4 sm:$0xff]  }
 0x16d   :  { %5324 = vmatprep.subr.bf16.mxu1 %v7734_v21  ;;  %v8398_v21 = vmov 0  }
 0x16f   :  { %5284 = vmatpush2.bf16.msra.mxu0 %v7729_v27 }
 0x170   :  { %5325 = vmatpush2.bf16.msra.mxu1 %v7732_v29  ;;  %5285 = vmatprep.subr.bf16.mxu0 %v7737_v31 }
 0x171   :  { %5326 = vmatprep.subr.bf16.mxu1 %v7740_v30 }
 0x173   :  { %5286 = vmatpush2.bf16.msra.mxu0 %v7735_v32  ;;  %v7783_v32 = vld [vmem:[%s11145_s1 + $0x1804] ss:$16 sps:$4 sm:$0xff]  }
 0x174   :  { %5327 = vmatpush2.bf16.msra.mxu1 %v7738_v33  ;;  %5287 = vmatprep.subr.bf16.mxu0 %v7743_v34  ;;  %v7786_v33 = vld [vmem:[%s11145_s1 + $0x8c] ss:$16 sps:$4 sm:$0xff]   ;;  %v7784_v34 = vld [vmem:[%s11145_s1 + $0x88] ss:$16 sps:$4 sm:$0xff]  }
 0x175   :  { %5328 = vmatprep.subr.bf16.mxu1 %v7746_v41  ;;  %v7787_v41 = vld [vmem:[%s11146_s0 + $0x60] ss:$0 sps:$4 sm:$0xff]  }
 0x177   :  { %5288 = vmatpush2.bf16.msra.mxu0 %v7741_v22  ;;  %v7790_v22 = vld [vmem:[%s11145_s1 + $0x6c] ss:$16 sps:$4 sm:$0xff]  }
 0x178   :  { %5329 = vmatpush2.bf16.msra.mxu1 %v7744_v23  ;;  %5289 = vmatprep.subr.bf16.mxu0 %v7749_v44  ;;  %v7793_v23 = vld [vmem:[%s11145_s1 + $0x2ec] ss:$16 sps:$4 sm:$0xff]   ;;  %v7788_v44 = vld [vmem:[%s11145_s1 + $0x68] ss:$16 sps:$4 sm:$0xff]  }
 0x179   :  { %5330 = vmatprep.subr.bf16.mxu1 %v7752_v45  ;;  %v7791_v45 = vld [vmem:[%s11145_s1 + $0x2e8] ss:$16 sps:$4 sm:$0xff]  }
 0x17b   :  { %5290 = vmatpush2.bf16.msra.mxu0 %v7747_v46  ;;  %v7796_v46 = vld [vmem:[%s11145_s1 + $0x4c] ss:$16 sps:$4 sm:$0xff]  }
 0x17c   :  { %5331 = vmatpush2.bf16.msra.mxu1 %v7750_v48  ;;  %5291 = vmatprep.subr.bf16.mxu0 %v7755_v49  ;;  %v7799_v48 = vld [vmem:[%s11145_s1 + $0x2cc] ss:$16 sps:$4 sm:$0xff]   ;;  %v7794_v49 = vld [vmem:[%s11145_s1 + $0x48] ss:$16 sps:$4 sm:$0xff]  }
 0x17d   :  { %5332 = vmatprep.subr.bf16.mxu1 %v7758_v50  ;;  %v7797_v50 = vld [vmem:[%s11145_s1 + $0x2c8] ss:$16 sps:$4 sm:$0xff]  }
 0x17f   :  { %5292 = vmatpush2.bf16.msra.mxu0 %v7753_v52  ;;  %v7802_v52 = vld [vmem:[%s11145_s1 + $0x2c] ss:$16 sps:$4 sm:$0xff]  }
 0x180   :  { %5333 = vmatpush2.bf16.msra.mxu1 %v7756_v53  ;;  %5351 = vmatprep.subr.bf16.mxu0 %v7765_v55  ;;  %v7805_v53 = vld [vmem:[%s11145_s1 + $0x2ac] ss:$16 sps:$4 sm:$0xff]   ;;  %v7800_v55 = vld [vmem:[%s11145_s1 + $0x28] ss:$16 sps:$4 sm:$0xff]  }
 0x181   :  { %5384 = vmatprep.subr.bf16.mxu1 %v7768_v56  ;;  %v7803_v56 = vld [vmem:[%s11145_s1 + $0x2a8] ss:$16 sps:$4 sm:$0xff]  }
 0x182   :  { %v5049_v5 = vpop.f32.mrf.mxu0  ;;  %5294 = vmatmul.mubr.bf16.vlgmr.msra.gmra.mxu0 %v9770_v63 }
 0x183   :  { %v5090_v8 = vpop.f32.mrf.mxu1  ;;  %5335 = vmatmul.mubr.bf16.vlgmr.msra.gmra.mxu1 %v9774_v4  ;;  %v5050_v11 = vadd.f32 %v5049_v5, %v9587_v18  ;;  %5352 = vmatpush1.bf16.msra.mxu0 %v7763_v59  ;;  %v7775_v18 = vld [vmem:[%s11145_s1 + $0x1820] ss:$16 sps:$4 sm:$0xff]   ;;  %v7808_v59 = vld [vmem:[%s11145_s1 + $0xc] ss:$16 sps:$4 sm:$0xff]   ;;  %v7815_v5 = vld [vmem:[%s11145_s1 + $0x268] ss:$16 sps:$4 sm:$0xff]  }
 0x184   :  { %5385 = vmatpush1.bf16.msra.mxu1 %v7766_v60  ;;  %v5051_v12 = vpop.f32.mrf.mxu0  ;;  %5353 = vmatprep.subr.bf16.mxu0 %v7771_v2  ;;  %v7806_v60 = vld [vmem:[%s11145_s1 + $0x8] ss:$16 sps:$4 sm:$0xff]  }
 0x185   :  { %v5092_v13 = vpop.f32.mrf.mxu1  ;;  %5386 = vmatprep.subr.bf16.mxu1 %v7774_v3  ;;  %v9797_v19 = vadd.f32 %v5090_v8, %v5050_v11  ;;  %v5052_v26 = vadd.f32 %v5051_v12, %v9598_v28  ;;  %5375 = vmatprep.mubr.bf16.mxu0 %v8398_v21  ;;  %v7809_v2 = vld [vmem:[%s11145_s1 + $0x288] ss:$16 sps:$4 sm:$0xff]   ;;  %v7814_v3 = vld [vmem:[%s11145_s1 + $0x1ec] ss:$16 sps:$4 sm:$0xff]  }
 0x186   :  { %5416 = vmatprep.mubr.bf16.mxu1 %v8570_v47  ;;  %v5053_v27 = vpop.f32.mrf.mxu0  ;;  %v7781_v47 = vld [vmem:[%s11145_s1 + $0x1800] ss:$16 sps:$4 sm:$0xff]   ;;  %v7820_v8 = vld [vmem:[%s11145_s1 + $0x1cc] ss:$16 sps:$4 sm:$0xff]   ;;  %v7818_v12 = vld [vmem:[%s11145_s1 + $0x1c8] ss:$16 sps:$4 sm:$0xff]  }
 0x187   :  { %v5094_v29 = vpop.f32.mrf.mxu1  ;;  %v9808_v31 = vadd.f32 %v5092_v13, %v5052_v26  ;;  %5354 = vmatpush1.bf16.msra.mxu0 %v7769_v57  ;;  %v7817_v57 = vld [vmem:[%s11145_s1 + $0x26c] ss:$16 sps:$4 sm:$0xff]   ;;  %v7821_v13 = vld [vmem:[%s11145_s1 + $0x248] ss:$16 sps:$4 sm:$0xff]  }
 0x188   :  { %5387 = vmatpush1.bf16.msra.mxu1 %v7772_v58  ;;  %v5054_v28 = vpop.f32.mrf.mxu0  ;;  %5355 = vmatprep.subr.bf16.mxu0 %v7777_v14  ;;  %v7812_v58 = vld [vmem:[%s11145_s1 + $0x1e8] ss:$16 sps:$4 sm:$0xff]   ;;  %v7823_v11 = vld [vmem:[%s11145_s1 + $0x24c] ss:$16 sps:$4 sm:$0xff]  }
 0x189   :  { %v5095_v30 = vpop.f32.mrf.mxu1  ;;  %5388 = vmatprep.subr.bf16.mxu1 %v7780_v15  ;;  %v7826_v14 = vld [vmem:[%s11145_s1 + $0x1ac] ss:$16 sps:$4 sm:$0xff]   ;;  %v7824_v26 = vld [vmem:[%s11145_s1 + $0x1a8] ss:$16 sps:$4 sm:$0xff]  }
 0x18a   :  { %v7829_v15 = vld [vmem:[%s11145_s1 + $0x22c] ss:$16 sps:$4 sm:$0xff]   ;;  %v7830_v29 = vld [vmem:[%s11145_s1 + $0x188] ss:$16 sps:$4 sm:$0xff]  }
 0x18b   :  { %5356 = vmatpush1.bf16.msra.mxu0 %v7775_v18  ;;  %v7827_v18 = vld [vmem:[%s11145_s1 + $0x228] ss:$16 sps:$4 sm:$0xff]   ;;  %v7835_v27 = vld [vmem:[%s11145_s1 + $0x20c] ss:$16 sps:$4 sm:$0xff]  }
 0x18c   :  { %5389 = vmatpush1.bf16.msra.mxu1 %v7778_v20  ;;  %5357 = vmatprep.subr.bf16.mxu0 %v7783_v32  ;;  %v7832_v20 = vld [vmem:[%s11145_s1 + $0x18c] ss:$16 sps:$4 sm:$0xff]   ;;  %v7833_v28 = vld [vmem:[%s11145_s1 + $0x208] ss:$16 sps:$4 sm:$0xff]  }
 0x18d   :  { %5390 = vmatprep.subr.bf16.mxu1 %v7786_v33  ;;  %v7838_v30 = vld [vmem:[%s11145_s1 + $0x16c] ss:$16 sps:$4 sm:$0xff]   ;;  %v7836_v33 = vld [vmem:[%s11145_s1 + $0x168] ss:$16 sps:$4 sm:$0xff]  }
 0x18e   :  { %v7841_v32 = vld [vmem:[%s11145_s1 + $0x3ec] ss:$16 sps:$4 sm:$0xff]  }
 0x18f   :  { %5358 = vmatpush1.bf16.msra.mxu0 %v7781_v47  ;;  %v7839_v47 = vld [vmem:[%s11145_s1 + $0x3e8] ss:$16 sps:$4 sm:$0xff]  }
 0x190   :  { %5391 = vmatpush1.bf16.msra.mxu1 %v7784_v34  ;;  %5425 = vmatprep.subr.bf16.mxu0 %v7793_v23  ;;  %v7844_v34 = vld [vmem:[%s11145_s1 + $0x14c] ss:$16 sps:$4 sm:$0xff]   ;;  %v7845_v23 = vld [vmem:[%s11145_s1 + $0x3c8] ss:$16 sps:$4 sm:$0xff]  }
 0x191   :  { %5392 = vmatprep.subr.bf16.mxu1 %v7790_v22  ;;  %v7842_v22 = vld [vmem:[%s11145_s1 + $0x148] ss:$16 sps:$4 sm:$0xff]  }
 0x192   :  { %7083 = vmatmul.mubr.msk.bf16.vlgmr.msra.gmra.mxu0 %vm4847_vm0, %v7787_v41  ;;  %v7847_v41 = vld [vmem:[%s11145_s1 + $0x3cc] ss:$16 sps:$4 sm:$0xff]  }
 0x193   :  { %5426 = vmatpush1.bf16.msra.mxu0 %v7791_v45  ;;  %5457 = vmatprep.mubr.bf16.mxu0 %v8581_v51  ;;  %v7811_v51 = vld [vmem:[%s11145_s1 + $0x28c] ss:$16 sps:$4 sm:$0xff]  }
 0x194   :  { %5393 = vmatpush1.bf16.msra.mxu1 %v7788_v44  ;;  %5427 = vmatprep.subr.bf16.mxu0 %v7799_v48  ;;  %v7850_v44 = vld [vmem:[%s11145_s1 + $0x12c] ss:$16 sps:$4 sm:$0xff]   ;;  %v7851_v48 = vld [vmem:[%s11145_s1 + $0x3a8] ss:$16 sps:$4 sm:$0xff]  }
 0x195   :  { %5394 = vmatprep.subr.bf16.mxu1 %v7796_v46  ;;  %v7853_v45 = vld [vmem:[%s11145_s1 + $0x3ac] ss:$16 sps:$4 sm:$0xff]   ;;  %v7848_v46 = vld [vmem:[%s11145_s1 + $0x128] ss:$16 sps:$4 sm:$0xff]  }
 0x197   :  { %5428 = vmatpush1.bf16.msra.mxu0 %v7797_v50  ;;  %v7859_v50 = vld [vmem:[%s11145_s1 + $0x38c] ss:$16 sps:$4 sm:$0xff]  }
 0x198   :  { %5395 = vmatpush1.bf16.msra.mxu1 %v7794_v49  ;;  %5429 = vmatprep.subr.bf16.mxu0 %v7805_v53  ;;  %v7856_v49 = vld [vmem:[%s11145_s1 + $0x10c] ss:$16 sps:$4 sm:$0xff]   ;;  %v7857_v53 = vld [vmem:[%s11145_s1 + $0x388] ss:$16 sps:$4 sm:$0xff]  }
 0x199   :  { %5396 = vmatprep.subr.bf16.mxu1 %v7802_v52  ;;  %v7854_v52 = vld [vmem:[%s11145_s1 + $0x108] ss:$16 sps:$4 sm:$0xff]  }
 0x19b   :  { %5430 = vmatpush1.bf16.msra.mxu0 %v7803_v56  ;;  %v7865_v56 = vld [vmem:[%s11145_s1 + $0x4ec] ss:$16 sps:$4 sm:$0xff]  }
 0x19c   :  { %5397 = vmatpush1.bf16.msra.mxu1 %v7800_v55  ;;  %5431 = vmatprep.subr.bf16.mxu0 %v7811_v51  ;;  %v7862_v55 = vld [vmem:[%s11145_s1 + $0x36c] ss:$16 sps:$4 sm:$0xff]   ;;  %v7863_v51 = vld [vmem:[%s11145_s1 + $0x4e8] ss:$16 sps:$4 sm:$0xff]  }
 0x19d   :  { %5398 = vmatprep.subr.bf16.mxu1 %v7808_v59  ;;  %v7860_v59 = vld [vmem:[%s11145_s1 + $0x368] ss:$16 sps:$4 sm:$0xff]  }
 0x19f   :  { %5432 = vmatpush1.bf16.msra.mxu0 %v7809_v2  ;;  %v7871_v2 = vld [vmem:[%s11145_s1 + $0x4cc] ss:$16 sps:$4 sm:$0xff]  }
 0x1a0   :  { %5399 = vmatpush1.bf16.msra.mxu1 %v7806_v60  ;;  %5433 = vmatprep.subr.bf16.mxu0 %v7817_v57  ;;  %v7868_v60 = vld [vmem:[%s11145_s1 + $0x34c] ss:$16 sps:$4 sm:$0xff]   ;;  %v7869_v57 = vld [vmem:[%s11145_s1 + $0x4c8] ss:$16 sps:$4 sm:$0xff]  }
 0x1a1   :  { %5400 = vmatprep.subr.bf16.mxu1 %v7814_v3  ;;  %v7866_v3 = vld [vmem:[%s11145_s1 + $0x348] ss:$16 sps:$4 sm:$0xff]  }
 0x1a3   :  { %5434 = vmatpush1.bf16.msra.mxu0 %v7815_v5 }
 0x1a4   :  { %5401 = vmatpush2.bf16.msra.mxu1 %v7812_v58  ;;  %5435 = vmatprep.subr.bf16.mxu0 %v7823_v11 }
 0x1a5   :  { %5402 = vmatprep.subr.bf16.mxu1 %v7820_v8 }
 0x1a7   :  { %5436 = vmatpush1.bf16.msra.mxu0 %v7821_v13  ;;  %v7874_v13 = vld [vmem:[%s11145_s1 + $0x32c] ss:$16 sps:$4 sm:$0xff]  }
 0x1a8   :  { %5403 = vmatpush2.bf16.msra.mxu1 %v7818_v12  ;;  %5437 = vmatprep.subr.bf16.mxu0 %v7829_v15 }
 0x1a9   :  { %5404 = vmatprep.subr.bf16.mxu1 %v7826_v14  ;;  %v7877_v14 = vld [vmem:[%s11145_s1 + $0x4ac] ss:$16 sps:$4 sm:$0xff]  }
 0x1ab   :  { %5438 = vmatpush1.bf16.msra.mxu0 %v7827_v18 }
 0x1ac   :  { %5405 = vmatpush2.bf16.msra.mxu1 %v7824_v26  ;;  %5439 = vmatprep.subr.bf16.mxu0 %v7835_v27  ;;  %v7875_v26 = vld [vmem:[%s11145_s1 + $0x4a8] ss:$16 sps:$4 sm:$0xff]  }
 0x1ad   :  { %5406 = vmatprep.subr.bf16.mxu1 %v7832_v20 }
 0x1af   :  { %5440 = vmatpush1.bf16.msra.mxu0 %v7833_v28 }
 0x1b0   :  { %5407 = vmatpush2.bf16.msra.mxu1 %v7830_v29  ;;  %5441 = vmatprep.subr.bf16.mxu0 %v7841_v32  ;;  %v7881_v32 = vld [vmem:[%s11145_s1 + $0x488] ss:$16 sps:$4 sm:$0xff]  }
 0x1b1   :  { %5408 = vmatprep.subr.bf16.mxu1 %v7838_v30  ;;  %v7883_v30 = vld [vmem:[%s11145_s1 + $0x48c] ss:$16 sps:$4 sm:$0xff]  }
 0x1b3   :  { %5442 = vmatpush2.bf16.msra.mxu0 %v7839_v47  ;;  %v7889_v47 = vld [vmem:[%s11145_s1 + $0x6ec] ss:$16 sps:$4 sm:$0xff]  }
 0x1b4   :  { %5409 = vmatpush2.bf16.msra.mxu1 %v7836_v33  ;;  %5443 = vmatprep.subr.bf16.mxu0 %v7847_v41  ;;  %v7886_v33 = vld [vmem:[%s11145_s1 + $0x46c] ss:$16 sps:$4 sm:$0xff]   ;;  %v7887_v41 = vld [vmem:[%s11145_s1 + $0x6e8] ss:$16 sps:$4 sm:$0xff]  }
 0x1b5   :  { %5410 = vmatprep.subr.bf16.mxu1 %v7844_v34  ;;  %v7884_v34 = vld [vmem:[%s11145_s1 + $0x468] ss:$16 sps:$4 sm:$0xff]  }
 0x1b7   :  { %5444 = vmatpush2.bf16.msra.mxu0 %v7845_v23  ;;  %v7895_v23 = vld [vmem:[%s11145_s1 + $0x6cc] ss:$16 sps:$4 sm:$0xff]  }
 0x1b8   :  { %5411 = vmatpush2.bf16.msra.mxu1 %v7842_v22  ;;  %5445 = vmatprep.subr.bf16.mxu0 %v7853_v45  ;;  %v7892_v22 = vld [vmem:[%s11145_s1 + $0x44c] ss:$16 sps:$4 sm:$0xff]   ;;  %v7893_v45 = vld [vmem:[%s11145_s1 + $0x6c8] ss:$16 sps:$4 sm:$0xff]  }
 0x1b9   :  { %5412 = vmatprep.subr.bf16.mxu1 %v7850_v44  ;;  %v7890_v44 = vld [vmem:[%s11145_s1 + $0x448] ss:$16 sps:$4 sm:$0xff]  }
 0x1bb   :  { %5446 = vmatpush2.bf16.msra.mxu0 %v7851_v48  ;;  %v7896_v48 = vld [vmem:[%s11145_s1 + $0x428] ss:$16 sps:$4 sm:$0xff]  }
 0x1bc   :  { %5413 = vmatpush2.bf16.msra.mxu1 %v7848_v46  ;;  %5447 = vmatprep.subr.bf16.mxu0 %v7859_v50  ;;  %v7898_v46 = vld [vmem:[%s11145_s1 + $0x42c] ss:$16 sps:$4 sm:$0xff]  }
 0x1bd   :  { %5414 = vmatprep.subr.bf16.mxu1 %v7856_v49  ;;  %v7899_v49 = vld [vmem:[%s11145_s1 + $0x6a8] ss:$16 sps:$4 sm:$0xff]   ;;  %v7904_v50 = vld [vmem:[%s11145_s1 + $0x40c] ss:$16 sps:$4 sm:$0xff]  }
 0x1bf   :  { %5448 = vmatpush2.bf16.msra.mxu0 %v7857_v53  ;;  %v7905_v53 = vld [vmem:[%s11145_s1 + $0x688] ss:$16 sps:$4 sm:$0xff]  }
 0x1c0   :  { %5415 = vmatpush2.bf16.msra.mxu1 %v7854_v52  ;;  %5449 = vmatprep.subr.bf16.mxu0 %v7862_v55  ;;  %v7902_v52 = vld [vmem:[%s11145_s1 + $0x408] ss:$16 sps:$4 sm:$0xff]   ;;  %v7910_v55 = vld [vmem:[%s11145_s1 + $0x5ec] ss:$16 sps:$4 sm:$0xff]  }
 0x1c1   :  { %5466 = vmatprep.subr.bf16.mxu1 %v7865_v56  ;;  %v7913_v56 = vld [vmem:[%s11145_s1 + $0x66c] ss:$16 sps:$4 sm:$0xff]  }
 0x1c2   :  { %v5131_v58 = vpop.f32.mrf.mxu0 }
 0x1c3   :  { %v5172_v5 = vpop.f32.mrf.mxu1  ;;  %5417 = vmatmul.mubr.bf16.vlgmr.msra.gmra.mxu1 %v8639_v6  ;;  %v5132_v8 = vadd.f32 %v5131_v58, %v9797_v19  ;;  %5450 = vmatpush2.bf16.msra.mxu0 %v7860_v59  ;;  %v7872_v19 = vld [vmem:[%s11145_s1 + $0x328] ss:$16 sps:$4 sm:$0xff]   ;;  %v7922_v58 = vld [vmem:[%s11145_s1 + $0x5ac] ss:$16 sps:$4 sm:$0xff]  }
 0x1c4   :  { %5467 = vmatpush1.bf16.msra.mxu1 %v7863_v51  ;;  %v5133_v11 = vpop.f32.mrf.mxu0  ;;  %5451 = vmatprep.subr.bf16.mxu0 %v7868_v60  ;;  %v7908_v59 = vld [vmem:[%s11145_s1 + $0x5e8] ss:$16 sps:$4 sm:$0xff]   ;;  %v7916_v60 = vld [vmem:[%s11145_s1 + $0x5cc] ss:$16 sps:$4 sm:$0xff]  }
 0x1c5   :  { %v5174_v12 = vpop.f32.mrf.mxu1  ;;  %5468 = vmatprep.subr.bf16.mxu1 %v7871_v2  ;;  %v10003_v15 = vadd.f32 %v5172_v5, %v5132_v8  ;;  %v5134_v6 = vadd.f32 %v5133_v11, %v9808_v31  ;;  %5498 = vmatprep.mubr.bf16.mxu1 %v8735_v36  ;;  %v7880_v31 = vld [vmem:[%s11145_s1 + $0x30c] ss:$16 sps:$4 sm:$0xff]   ;;  %v7878_v36 = vld [vmem:[%s11145_s1 + $0x308] ss:$16 sps:$4 sm:$0xff]  }
 0x1c6   :  { %v5135_v18 = vpop.f32.mrf.mxu0  ;;  %v7911_v51 = vld [vmem:[%s11145_s1 + $0x668] ss:$16 sps:$4 sm:$0xff]   ;;  %v7919_v2 = vld [vmem:[%s11145_s1 + $0x64c] ss:$16 sps:$4 sm:$0xff]  }
 0x1c7   :  { %v5176_v20 = vpop.f32.mrf.mxu1  ;;  %v10013_v27 = vadd.f32 %v5174_v12, %v5134_v6  ;;  %5452 = vmatpush2.bf16.msra.mxu0 %v7866_v3  ;;  %v7914_v3 = vld [vmem:[%s11145_s1 + $0x5c8] ss:$16 sps:$4 sm:$0xff]   ;;  %v7925_v5 = vld [vmem:[%s11145_s1 + $0x62c] ss:$16 sps:$4 sm:$0xff]  }
 0x1c8   :  { %5469 = vmatpush1.bf16.msra.mxu1 %v7869_v57  ;;  %v5136_v29 = vpop.f32.mrf.mxu0  ;;  %5453 = vmatprep.subr.bf16.mxu0 %v7874_v13  ;;  %v7917_v57 = vld [vmem:[%s11145_s1 + $0x648] ss:$16 sps:$4 sm:$0xff]   ;;  %v7928_v12 = vld [vmem:[%s11145_s1 + $0x58c] ss:$16 sps:$4 sm:$0xff]  }
 0x1c9   :  { %v5177_v28 = vpop.f32.mrf.mxu1  ;;  %5470 = vmatprep.subr.bf16.mxu1 %v7877_v14  ;;  %v7920_v8 = vld [vmem:[%s11145_s1 + $0x5a8] ss:$16 sps:$4 sm:$0xff]   ;;  %v7931_v13 = vld [vmem:[%s11145_s1 + $0x60c] ss:$16 sps:$4 sm:$0xff]  }
 0x1ca   :  { %v7923_v11 = vld [vmem:[%s11145_s1 + $0x628] ss:$16 sps:$4 sm:$0xff]   ;;  %v7940_v29 = vld [vmem:[%s11145_s1 + $0x54c] ss:$16 sps:$4 sm:$0xff]  }
 0x1cb   :  { %5454 = vmatpush2.bf16.msra.mxu0 %v7872_v19  ;;  %v7926_v14 = vld [vmem:[%s11145_s1 + $0x588] ss:$16 sps:$4 sm:$0xff]   ;;  %v7934_v19 = vld [vmem:[%s11145_s1 + $0x56c] ss:$16 sps:$4 sm:$0xff]  }
 0x1cc   :  { %5471 = vmatpush1.bf16.msra.mxu1 %v7875_v26  ;;  %5455 = vmatprep.subr.bf16.mxu0 %v7880_v31  ;;  %v7929_v6 = vld [vmem:[%s11145_s1 + $0x608] ss:$16 sps:$4 sm:$0xff]   ;;  %v7937_v26 = vld [vmem:[%s11145_s1 + $0x7ec] ss:$16 sps:$4 sm:$0xff]  }
 0x1cd   :  { %5472 = vmatprep.subr.bf16.mxu1 %v7883_v30  ;;  %v7932_v18 = vld [vmem:[%s11145_s1 + $0x568] ss:$16 sps:$4 sm:$0xff]   ;;  %v7943_v28 = vld [vmem:[%s11145_s1 + $0x7cc] ss:$16 sps:$4 sm:$0xff]  }
 0x1ce   :  { %v7935_v20 = vld [vmem:[%s11145_s1 + $0x7e8] ss:$16 sps:$4 sm:$0xff]  }
 0x1cf   :  { %5456 = vmatpush2.bf16.msra.mxu0 %v7878_v36  ;;  %v7938_v31 = vld [vmem:[%s11145_s1 + $0x548] ss:$16 sps:$4 sm:$0xff]   ;;  %v7946_v36 = vld [vmem:[%s11145_s1 + $0x52c] ss:$16 sps:$4 sm:$0xff]  }
 0x1d0   :  { %5473 = vmatpush1.bf16.msra.mxu1 %v7881_v32  ;;  %5507 = vmatprep.subr.bf16.mxu0 %v7889_v47  ;;  %v7941_v30 = vld [vmem:[%s11145_s1 + $0x7c8] ss:$16 sps:$4 sm:$0xff]   ;;  %v7949_v32 = vld [vmem:[%s11145_s1 + $0x7ac] ss:$16 sps:$4 sm:$0xff]  }
 0x1d1   :  { %5474 = vmatprep.subr.bf16.mxu1 %v7886_v33  ;;  %v7944_v33 = vld [vmem:[%s11145_s1 + $0x528] ss:$16 sps:$4 sm:$0xff]  }
 0x1d2   :  { %5458 = vmatmul.mubr.bf16.vlgmr.msra.gmra.mxu0 %v8641_v7  ;;  %v7901_v7 = vld [vmem:[%s11145_s1 + $0x6ac] ss:$16 sps:$4 sm:$0xff]   ;;  %v7947_v47 = vld [vmem:[%s11145_s1 + $0x7a8] ss:$16 sps:$4 sm:$0xff]  }
 0x1d3   :  { %5508 = vmatpush1.bf16.msra.mxu0 %v7887_v41  ;;  %5539 = vmatprep.mubr.bf16.mxu0 %v8739_v37  ;;  %v7907_v37 = vld [vmem:[%s11145_s1 + $0x68c] ss:$16 sps:$4 sm:$0xff]  }
 0x1d4   :  { %5475 = vmatpush1.bf16.msra.mxu1 %v7884_v34  ;;  %5509 = vmatprep.subr.bf16.mxu0 %v7895_v23  ;;  %v7952_v34 = vld [vmem:[%s11145_s1 + $0x50c] ss:$16 sps:$4 sm:$0xff]   ;;  %v7953_v23 = vld [vmem:[%s11145_s1 + $0x788] ss:$16 sps:$4 sm:$0xff]  }
 0x1d5   :  { %5476 = vmatprep.subr.bf16.mxu1 %v7892_v22  ;;  %v7955_v41 = vld [vmem:[%s11145_s1 + $0x78c] ss:$16 sps:$4 sm:$0xff]   ;;  %v7950_v22 = vld [vmem:[%s11145_s1 + $0x508] ss:$16 sps:$4 sm:$0xff]  }
 0x1d7   :  { %5510 = vmatpush1.bf16.msra.mxu0 %v7893_v45  ;;  %v7961_v45 = vld [vmem:[%s11145_s1 + $0x8ec] ss:$16 sps:$4 sm:$0xff]  }
 0x1d8   :  { %5477 = vmatpush1.bf16.msra.mxu1 %v7890_v44  ;;  %5511 = vmatprep.subr.bf16.mxu0 %v7901_v7  ;;  %v7958_v44 = vld [vmem:[%s11145_s1 + $0x76c] ss:$16 sps:$4 sm:$0xff]   ;;  %v7959_v7 = vld [vmem:[%s11145_s1 + $0x8e8] ss:$16 sps:$4 sm:$0xff]  }
 0x1d9   :  { %5478 = vmatprep.subr.bf16.mxu1 %v7898_v46  ;;  %v7956_v46 = vld [vmem:[%s11145_s1 + $0x768] ss:$16 sps:$4 sm:$0xff]  }
 0x1db   :  { %5512 = vmatpush1.bf16.msra.mxu0 %v7899_v49  ;;  %v7967_v49 = vld [vmem:[%s11145_s1 + $0x8cc] ss:$16 sps:$4 sm:$0xff]  }
 0x1dc   :  { %5479 = vmatpush1.bf16.msra.mxu1 %v7896_v48  ;;  %5513 = vmatprep.subr.bf16.mxu0 %v7907_v37  ;;  %v7964_v48 = vld [vmem:[%s11145_s1 + $0x74c] ss:$16 sps:$4 sm:$0xff]  }
 0x1dd   :  { %5480 = vmatprep.subr.bf16.mxu1 %v7904_v50 }
 0x1df   :  { %5514 = vmatpush1.bf16.msra.mxu0 %v7905_v53  ;;  %v7962_v53 = vld [vmem:[%s11145_s1 + $0x748] ss:$16 sps:$4 sm:$0xff]  }
 0x1e0   :  { %5481 = vmatpush1.bf16.msra.mxu1 %v7902_v52  ;;  %5515 = vmatprep.subr.bf16.mxu0 %v7913_v56 }
 0x1e1   :  { %5482 = vmatprep.subr.bf16.mxu1 %v7910_v55  ;;  %v7965_v55 = vld [vmem:[%s11145_s1 + $0x8c8] ss:$16 sps:$4 sm:$0xff]  }
 0x1e3   :  { %5516 = vmatpush1.bf16.msra.mxu0 %v7911_v51 }
 0x1e4   :  { %5483 = vmatpush2.bf16.msra.mxu1 %v7908_v59  ;;  %5517 = vmatprep.subr.bf16.mxu0 %v7919_v2 }
 0x1e5   :  { %5484 = vmatprep.subr.bf16.mxu1 %v7916_v60 }
 0x1e7   :  { %5518 = vmatpush1.bf16.msra.mxu0 %v7917_v57 }
 0x1e8   :  { %5485 = vmatpush2.bf16.msra.mxu1 %v7914_v3  ;;  %5519 = vmatprep.subr.bf16.mxu0 %v7925_v5  ;;  %v7971_v5 = vld [vmem:[%s11145_s1 + $0x8a8] ss:$16 sps:$4 sm:$0xff]  }
 0x1e9   :  { %5486 = vmatprep.subr.bf16.mxu1 %v7922_v58  ;;  %v7968_v58 = vld [vmem:[%s11145_s1 + $0x728] ss:$16 sps:$4 sm:$0xff]  }
 0x1eb   :  { %5520 = vmatpush1.bf16.msra.mxu0 %v7923_v11 }
 0x1ec   :  { %5487 = vmatpush2.bf16.msra.mxu1 %v7920_v8  ;;  %5521 = vmatprep.subr.bf16.mxu0 %v7931_v13  ;;  %v7977_v13 = vld [vmem:[%s11145_s1 + $0x888] ss:$16 sps:$4 sm:$0xff]  }
 0x1ed   :  { %5488 = vmatprep.subr.bf16.mxu1 %v7928_v12  ;;  %v7974_v12 = vld [vmem:[%s11145_s1 + $0x708] ss:$16 sps:$4 sm:$0xff]  }
 0x1ef   :  { %5522 = vmatpush1.bf16.msra.mxu0 %v7929_v6  ;;  %v7985_v6 = vld [vmem:[%s11145_s1 + $0xaec] ss:$16 sps:$4 sm:$0xff]  }
 0x1f0   :  { %5489 = vmatpush2.bf16.msra.mxu1 %v7926_v14  ;;  %5523 = vmatprep.subr.bf16.mxu0 %v7937_v26  ;;  %v7982_v14 = vld [vmem:[%s11145_s1 + $0x86c] ss:$16 sps:$4 sm:$0xff]   ;;  %v7983_v26 = vld [vmem:[%s11145_s1 + $0xae8] ss:$16 sps:$4 sm:$0xff]  }
 0x1f1   :  { %5490 = vmatprep.subr.bf16.mxu1 %v7934_v19  ;;  %v7980_v19 = vld [vmem:[%s11145_s1 + $0x868] ss:$16 sps:$4 sm:$0xff]  }
 0x1f3   :  { %5524 = vmatpush2.bf16.msra.mxu0 %v7935_v20  ;;  %v7991_v20 = vld [vmem:[%s11145_s1 + $0xacc] ss:$16 sps:$4 sm:$0xff]  }
 0x1f4   :  { %5491 = vmatpush2.bf16.msra.mxu1 %v7932_v18  ;;  %5525 = vmatprep.subr.bf16.mxu0 %v7943_v28  ;;  %v7988_v18 = vld [vmem:[%s11145_s1 + $0x84c] ss:$16 sps:$4 sm:$0xff]   ;;  %v7989_v28 = vld [vmem:[%s11145_s1 + $0xac8] ss:$16 sps:$4 sm:$0xff]  }
 0x1f5   :  { %5492 = vmatprep.subr.bf16.mxu1 %v7940_v29  ;;  %v7986_v29 = vld [vmem:[%s11145_s1 + $0x848] ss:$16 sps:$4 sm:$0xff]  }
 0x1f7   :  { %5526 = vmatpush2.bf16.msra.mxu0 %v7941_v30  ;;  %v7992_v30 = vld [vmem:[%s11145_s1 + $0x828] ss:$16 sps:$4 sm:$0xff]  }
 0x1f8   :  { %5493 = vmatpush2.bf16.msra.mxu1 %v7938_v31  ;;  %5527 = vmatprep.subr.bf16.mxu0 %v7949_v32  ;;  %v7994_v31 = vld [vmem:[%s11145_s1 + $0x82c] ss:$16 sps:$4 sm:$0xff]  }
 0x1f9   :  { %5494 = vmatprep.subr.bf16.mxu1 %v7946_v36  ;;  %v7995_v36 = vld [vmem:[%s11145_s1 + $0xaa8] ss:$16 sps:$4 sm:$0xff]   ;;  %v8000_v32 = vld [vmem:[%s11145_s1 + $0x80c] ss:$16 sps:$4 sm:$0xff]  }
 0x1fb   :  { %5528 = vmatpush2.bf16.msra.mxu0 %v7947_v47  ;;  %v8001_v47 = vld [vmem:[%s11145_s1 + $0xa88] ss:$16 sps:$4 sm:$0xff]  }
 0x1fc   :  { %5495 = vmatpush2.bf16.msra.mxu1 %v7944_v33  ;;  %5529 = vmatprep.subr.bf16.mxu0 %v7955_v41  ;;  %v7998_v33 = vld [vmem:[%s11145_s1 + $0x808] ss:$16 sps:$4 sm:$0xff]   ;;  %v8009_v41 = vld [vmem:[%s11145_s1 + $0xa6c] ss:$16 sps:$4 sm:$0xff]  }
 0x1fd   :  { %5496 = vmatprep.subr.bf16.mxu1 %v7952_v34  ;;  %v8006_v34 = vld [vmem:[%s11145_s1 + $0x9ec] ss:$16 sps:$4 sm:$0xff]  }
 0x1ff   :  { %5530 = vmatpush2.bf16.msra.mxu0 %v7953_v23  ;;  %v8007_v23 = vld [vmem:[%s11145_s1 + $0xa68] ss:$16 sps:$4 sm:$0xff]  }
 0x200   :  { %5497 = vmatpush2.bf16.msra.mxu1 %v7950_v22  ;;  %5531 = vmatprep.subr.bf16.mxu0 %v7958_v44  ;;  %v8004_v22 = vld [vmem:[%s11145_s1 + $0x9e8] ss:$16 sps:$4 sm:$0xff]   ;;  %v8012_v44 = vld [vmem:[%s11145_s1 + $0x9cc] ss:$16 sps:$4 sm:$0xff]  }
 0x201   :  { %5548 = vmatprep.subr.bf16.mxu1 %v7961_v45  ;;  %v8015_v45 = vld [vmem:[%s11145_s1 + $0xa4c] ss:$16 sps:$4 sm:$0xff]  }
 0x202   :  { %v5213_v50 = vpop.f32.mrf.mxu0 }
 0x203   :  { %v5254_v37 = vpop.f32.mrf.mxu1  ;;  %5499 = vmatmul.mubr.bf16.vlgmr.msra.gmra.mxu1 %v8859_v16  ;;  %v5214_v52 = vadd.f32 %v5213_v50, %v10003_v15  ;;  %5532 = vmatpush2.bf16.msra.mxu0 %v7956_v46  ;;  %v7970_v16 = vld [vmem:[%s11145_s1 + $0x72c] ss:$16 sps:$4 sm:$0xff]   ;;  %v8010_v46 = vld [vmem:[%s11145_s1 + $0x9c8] ss:$16 sps:$4 sm:$0xff]  }
 0x204   :  { %5549 = vmatpush1.bf16.msra.mxu1 %v7959_v7  ;;  %v5215_v56 = vpop.f32.mrf.mxu0  ;;  %5533 = vmatprep.subr.bf16.mxu0 %v7964_v48  ;;  %v7973_v15 = vld [vmem:[%s11145_s1 + $0x8ac] ss:$16 sps:$4 sm:$0xff]   ;;  %v8013_v7 = vld [vmem:[%s11145_s1 + $0xa48] ss:$16 sps:$4 sm:$0xff]  }
 0x205   :  { %v5256_v59 = vpop.f32.mrf.mxu1  ;;  %5550 = vmatprep.subr.bf16.mxu1 %v7967_v49  ;;  %v10205_v51 = vadd.f32 %v5254_v37, %v5214_v52  ;;  %v5216_v60 = vadd.f32 %v5215_v56, %v10013_v27  ;;  %5580 = vmatprep.mubr.bf16.mxu1 %v8889_v24  ;;  %v7976_v24 = vld [vmem:[%s11145_s1 + $0x70c] ss:$16 sps:$4 sm:$0xff]   ;;  %v8016_v50 = vld [vmem:[%s11145_s1 + $0x9a8] ss:$16 sps:$4 sm:$0xff]  }
 0x206   :  { %v5217_v2 = vpop.f32.mrf.mxu0  ;;  %v7979_v27 = vld [vmem:[%s11145_s1 + $0x88c] ss:$16 sps:$4 sm:$0xff]   ;;  %v8019_v37 = vld [vmem:[%s11145_s1 + $0xa28] ss:$16 sps:$4 sm:$0xff]  }
 0x207   :  { %v5258_v3 = vpop.f32.mrf.mxu1  ;;  %v10209_v57 = vadd.f32 %v5256_v59, %v5216_v60  ;;  %5534 = vmatpush2.bf16.msra.mxu0 %v7962_v53  ;;  %v8018_v48 = vld [vmem:[%s11145_s1 + $0x9ac] ss:$16 sps:$4 sm:$0xff]   ;;  %v8025_v56 = vld [vmem:[%s11145_s1 + $0xa08] ss:$16 sps:$4 sm:$0xff]  }
 0x208   :  { %5551 = vmatpush1.bf16.msra.mxu1 %v7965_v55  ;;  %v5218_v8 = vpop.f32.mrf.mxu0  ;;  %5535 = vmatprep.subr.bf16.mxu0 %v7970_v16  ;;  %v8021_v49 = vld [vmem:[%s11145_s1 + $0xa2c] ss:$16 sps:$4 sm:$0xff]   ;;  %v8022_v55 = vld [vmem:[%s11145_s1 + $0x988] ss:$16 sps:$4 sm:$0xff]  }
 0x209   :  { %v5259_v11 = vpop.f32.mrf.mxu1  ;;  %5552 = vmatprep.subr.bf16.mxu1 %v7973_v15  ;;  %v8024_v52 = vld [vmem:[%s11145_s1 + $0x98c] ss:$16 sps:$4 sm:$0xff]   ;;  %v8028_v15 = vld [vmem:[%s11145_s1 + $0x968] ss:$16 sps:$4 sm:$0xff]  }
 0x20a   :  { %v8027_v53 = vld [vmem:[%s11145_s1 + $0xa0c] ss:$16 sps:$4 sm:$0xff]   ;;  %v8031_v60 = vld [vmem:[%s11145_s1 + $0xbe8] ss:$16 sps:$4 sm:$0xff]  }
 0x20b   :  { %5536 = vmatpush2.bf16.msra.mxu0 %v7968_v58  ;;  %v8030_v59 = vld [vmem:[%s11145_s1 + $0x96c] ss:$16 sps:$4 sm:$0xff]   ;;  %v8034_v58 = vld [vmem:[%s11145_s1 + $0x948] ss:$16 sps:$4 sm:$0xff]  }
 0x20c   :  { %5553 = vmatpush1.bf16.msra.mxu1 %v7971_v5  ;;  %5537 = vmatprep.subr.bf16.mxu0 %v7976_v24  ;;  %v8033_v16 = vld [vmem:[%s11145_s1 + $0xbec] ss:$16 sps:$4 sm:$0xff]   ;;  %v8037_v5 = vld [vmem:[%s11145_s1 + $0xbc8] ss:$16 sps:$4 sm:$0xff]  }
 0x20d   :  { %5554 = vmatprep.subr.bf16.mxu1 %v7979_v27  ;;  %v8036_v2 = vld [vmem:[%s11145_s1 + $0x94c] ss:$16 sps:$4 sm:$0xff]   ;;  %v8040_v24 = vld [vmem:[%s11145_s1 + $0x928] ss:$16 sps:$4 sm:$0xff]  }
 0x20e   :  { %v8039_v3 = vld [vmem:[%s11145_s1 + $0xbcc] ss:$16 sps:$4 sm:$0xff]   ;;  %v8043_v27 = vld [vmem:[%s11145_s1 + $0xba8] ss:$16 sps:$4 sm:$0xff]  }
 0x20f   :  { %5538 = vmatpush2.bf16.msra.mxu0 %v7974_v12  ;;  %v8042_v8 = vld [vmem:[%s11145_s1 + $0x92c] ss:$16 sps:$4 sm:$0xff]  }
 0x210   :  { %5555 = vmatpush1.bf16.msra.mxu1 %v7977_v13  ;;  %5589 = vmatprep.subr.bf16.mxu0 %v7985_v6  ;;  %v8045_v11 = vld [vmem:[%s11145_s1 + $0xbac] ss:$16 sps:$4 sm:$0xff]   ;;  %v8049_v6 = vld [vmem:[%s11145_s1 + $0xb88] ss:$16 sps:$4 sm:$0xff]  }
 0x211   :  { %5556 = vmatprep.subr.bf16.mxu1 %v7982_v14  ;;  %v8048_v12 = vld [vmem:[%s11145_s1 + $0x90c] ss:$16 sps:$4 sm:$0xff]   ;;  %v8046_v14 = vld [vmem:[%s11145_s1 + $0x908] ss:$16 sps:$4 sm:$0xff]  }
 0x212   :  { %5540 = vmatmul.mubr.bf16.vlgmr.msra.gmra.mxu0 %v8863_v17  ;;  %v7997_v17 = vld [vmem:[%s11145_s1 + $0xaac] ss:$16 sps:$4 sm:$0xff]  }
 0x213   :  { %5590 = vmatpush1.bf16.msra.mxu0 %v7983_v26  ;;  %5621 = vmatprep.mubr.bf16.mxu0 %v8893_v25  ;;  %v8003_v25 = vld [vmem:[%s11145_s1 + $0xa8c] ss:$16 sps:$4 sm:$0xff]  }
 0x214   :  { %5557 = vmatpush1.bf16.msra.mxu1 %v7980_v19  ;;  %5591 = vmatprep.subr.bf16.mxu0 %v7991_v20  ;;  %v8051_v13 = vld [vmem:[%s11145_s1 + $0xb8c] ss:$16 sps:$4 sm:$0xff]   ;;  %v8055_v20 = vld [vmem:[%s11145_s1 + $0xce8] ss:$16 sps:$4 sm:$0xff]  }
 0x215   :  { %5558 = vmatprep.subr.bf16.mxu1 %v7988_v18  ;;  %v8054_v19 = vld [vmem:[%s11145_s1 + $0xb6c] ss:$16 sps:$4 sm:$0xff]   ;;  %v8052_v18 = vld [vmem:[%s11145_s1 + $0xb68] ss:$16 sps:$4 sm:$0xff]  }
 0x216   :  { %v8057_v26 = vld [vmem:[%s11145_s1 + $0xcec] ss:$16 sps:$4 sm:$0xff]  }
 0x217   :  { %5592 = vmatpush1.bf16.msra.mxu0 %v7989_v28  ;;  %v8063_v28 = vld [vmem:[%s11145_s1 + $0xccc] ss:$16 sps:$4 sm:$0xff]  }
 0x218   :  { %5559 = vmatpush1.bf16.msra.mxu1 %v7986_v29  ;;  %5593 = vmatprep.subr.bf16.mxu0 %v7997_v17  ;;  %v8060_v29 = vld [vmem:[%s11145_s1 + $0xb4c] ss:$16 sps:$4 sm:$0xff]  }
 0x219   :  { %5560 = vmatprep.subr.bf16.mxu1 %v7994_v31 }
 0x21b   :  { %5594 = vmatpush1.bf16.msra.mxu0 %v7995_v36  ;;  %v8058_v36 = vld [vmem:[%s11145_s1 + $0xb48] ss:$16 sps:$4 sm:$0xff]  }
 0x21c   :  { %5561 = vmatpush1.bf16.msra.mxu1 %v7992_v30  ;;  %5595 = vmatprep.subr.bf16.mxu0 %v8003_v25 }
 0x21d   :  { %5562 = vmatprep.subr.bf16.mxu1 %v8000_v32  ;;  %v8061_v32 = vld [vmem:[%s11145_s1 + $0xcc8] ss:$16 sps:$4 sm:$0xff]  }
 0x21f   :  { %5596 = vmatpush1.bf16.msra.mxu0 %v8001_v47 }
 0x220   :  { %5563 = vmatpush1.bf16.msra.mxu1 %v7998_v33  ;;  %5597 = vmatprep.subr.bf16.mxu0 %v8009_v41 }
 0x221   :  { %5564 = vmatprep.subr.bf16.mxu1 %v8006_v34 }
 0x223   :  { %5598 = vmatpush1.bf16.msra.mxu0 %v8007_v23 }
 0x224   :  { %5565 = vmatpush2.bf16.msra.mxu1 %v8004_v22  ;;  %5599 = vmatprep.subr.bf16.mxu0 %v8015_v45  ;;  %v8067_v45 = vld [vmem:[%s11145_s1 + $0xca8] ss:$16 sps:$4 sm:$0xff]  }
 0x225   :  { %5566 = vmatprep.subr.bf16.mxu1 %v8012_v44  ;;  %v8064_v44 = vld [vmem:[%s11145_s1 + $0xb28] ss:$16 sps:$4 sm:$0xff]  }
 0x227   :  { %5600 = vmatpush1.bf16.msra.mxu0 %v8013_v7 }
 0x228   :  { %5567 = vmatpush2.bf16.msra.mxu1 %v8010_v46  ;;  %5601 = vmatprep.subr.bf16.mxu0 %v8021_v49  ;;  %v8073_v49 = vld [vmem:[%s11145_s1 + $0xc88] ss:$16 sps:$4 sm:$0xff]  }
 0x229   :  { %5568 = vmatprep.subr.bf16.mxu1 %v8018_v48  ;;  %v8070_v48 = vld [vmem:[%s11145_s1 + $0xb08] ss:$16 sps:$4 sm:$0xff]  }
 0x22b   :  { %5602 = vmatpush1.bf16.msra.mxu0 %v8019_v37  ;;  %v8081_v37 = vld [vmem:[%s11145_s1 + $0xeec] ss:$16 sps:$4 sm:$0xff]  }
 0x22c   :  { %5569 = vmatpush2.bf16.msra.mxu1 %v8016_v50  ;;  %5603 = vmatprep.subr.bf16.mxu0 %v8027_v53  ;;  %v8078_v50 = vld [vmem:[%s11145_s1 + $0xc6c] ss:$16 sps:$4 sm:$0xff]   ;;  %v8079_v53 = vld [vmem:[%s11145_s1 + $0xee8] ss:$16 sps:$4 sm:$0xff]  }
 0x22d   :  { %5570 = vmatprep.subr.bf16.mxu1 %v8024_v52  ;;  %v8076_v52 = vld [vmem:[%s11145_s1 + $0xc68] ss:$16 sps:$4 sm:$0xff]  }
 0x22f   :  { %5604 = vmatpush1.bf16.msra.mxu0 %v8025_v56  ;;  %v8087_v56 = vld [vmem:[%s11145_s1 + $0xecc] ss:$16 sps:$4 sm:$0xff]  }
 0x230   :  { %5571 = vmatpush2.bf16.msra.mxu1 %v8022_v55  ;;  %5605 = vmatprep.subr.bf16.mxu0 %v8033_v16  ;;  %v8084_v55 = vld [vmem:[%s11145_s1 + $0xc4c] ss:$16 sps:$4 sm:$0xff]  }
 0x231   :  { %5572 = vmatprep.subr.bf16.mxu1 %v8030_v59 }
 0x233   :  { %5606 = vmatpush2.bf16.msra.mxu0 %v8031_v60  ;;  %v8085_v60 = vld [vmem:[%s11145_s1 + $0xec8] ss:$16 sps:$4 sm:$0xff]  }
 0x234   :  { %5573 = vmatpush2.bf16.msra.mxu1 %v8028_v15  ;;  %5607 = vmatprep.subr.bf16.mxu0 %v8039_v3  ;;  %v8082_v15 = vld [vmem:[%s11145_s1 + $0xc48] ss:$16 sps:$4 sm:$0xff]   ;;  %v8090_v3 = vld [vmem:[%s11145_s1 + $0xc2c] ss:$16 sps:$4 sm:$0xff]  }
 0x235   :  { %5574 = vmatprep.subr.bf16.mxu1 %v8036_v2 }
 0x237   :  { %5608 = vmatpush2.bf16.msra.mxu0 %v8037_v5 }
 0x238   :  { %5575 = vmatpush2.bf16.msra.mxu1 %v8034_v58  ;;  %5609 = vmatprep.subr.bf16.mxu0 %v8045_v11  ;;  %v8091_v11 = vld [vmem:[%s11145_s1 + $0xea8] ss:$16 sps:$4 sm:$0xff]  }
 0x239   :  { %5576 = vmatprep.subr.bf16.mxu1 %v8042_v8  ;;  %v8088_v8 = vld [vmem:[%s11145_s1 + $0xc28] ss:$16 sps:$4 sm:$0xff]  }
 0x23b   :  { %5610 = vmatpush2.bf16.msra.mxu0 %v8043_v27  ;;  %v8096_v27 = vld [vmem:[%s11145_s1 + $0xc0c] ss:$16 sps:$4 sm:$0xff]  }
 0x23c   :  { %5577 = vmatpush2.bf16.msra.mxu1 %v8040_v24  ;;  %5611 = vmatprep.subr.bf16.mxu0 %v8051_v13  ;;  %v8097_v13 = vld [vmem:[%s11145_s1 + $0xe88] ss:$16 sps:$4 sm:$0xff]  }
 0x23d   :  { %5578 = vmatprep.subr.bf16.mxu1 %v8048_v12  ;;  %v8094_v12 = vld [vmem:[%s11145_s1 + $0xc08] ss:$16 sps:$4 sm:$0xff]  }
 0x23f   :  { %5612 = vmatpush2.bf16.msra.mxu0 %v8049_v6  ;;  %v8105_v6 = vld [vmem:[%s11145_s1 + $0xe6c] ss:$16 sps:$4 sm:$0xff]  }
 0x240   :  { %5579 = vmatpush2.bf16.msra.mxu1 %v8046_v14  ;;  %5613 = vmatprep.subr.bf16.mxu0 %v8054_v19  ;;  %v8102_v14 = vld [vmem:[%s11145_s1 + $0xdec] ss:$16 sps:$4 sm:$0xff]   ;;  %v8100_v19 = vld [vmem:[%s11145_s1 + $0xde8] ss:$16 sps:$4 sm:$0xff]  }
 0x241   :  { %5630 = vmatprep.subr.bf16.mxu1 %v8057_v26  ;;  %v8103_v26 = vld [vmem:[%s11145_s1 + $0xe68] ss:$16 sps:$4 sm:$0xff]  }
 0x242   :  { %v5295_v31 = vpop.f32.mrf.mxu0 }
 0x243   :  { %v5336_v17 = vpop.f32.mrf.mxu1  ;;  %5581 = vmatmul.mubr.bf16.vlgmr.msra.gmra.mxu1 %v9089_v38  ;;  %v5296_v30 = vadd.f32 %v5295_v31, %v10205_v51  ;;  %5614 = vmatpush2.bf16.msra.mxu0 %v8052_v18  ;;  %v8066_v38 = vld [vmem:[%s11145_s1 + $0xb2c] ss:$16 sps:$4 sm:$0xff]  }
 0x244   :  { %5631 = vmatpush1.bf16.msra.mxu1 %v8055_v20  ;;  %v5297_v25 = vpop.f32.mrf.mxu0  ;;  %5615 = vmatprep.subr.bf16.mxu0 %v8060_v29  ;;  %v8069_v51 = vld [vmem:[%s11145_s1 + $0xcac] ss:$16 sps:$4 sm:$0xff]   ;;  %v8106_v29 = vld [vmem:[%s11145_s1 + $0xdc8] ss:$16 sps:$4 sm:$0xff]  }
 0x245   :  { %v5338_v33 = vpop.f32.mrf.mxu1  ;;  %5632 = vmatprep.subr.bf16.mxu1 %v8063_v28  ;;  %v5337_v47 = vadd.f32 %v5336_v17, %v5296_v30  ;;  %v5298_v34 = vadd.f32 %v5297_v25, %v10209_v57  ;;  %5662 = vmatprep.mubr.bf16.mxu1 %v9111_v42  ;;  %v8072_v42 = vld [vmem:[%s11145_s1 + $0xb0c] ss:$16 sps:$4 sm:$0xff]   ;;  %v8109_v28 = vld [vmem:[%s11145_s1 + $0xe48] ss:$16 sps:$4 sm:$0xff]  }
 0x246   :  { %v5299_v41 = vpop.f32.mrf.mxu0  ;;  %v8075_v57 = vld [vmem:[%s11145_s1 + $0xc8c] ss:$16 sps:$4 sm:$0xff]   ;;  %v8112_v30 = vld [vmem:[%s11145_s1 + $0xda8] ss:$16 sps:$4 sm:$0xff]  }
 0x247   :  { %v5340_v22 = vpop.f32.mrf.mxu1  ;;  %v5339_v23 = vadd.f32 %v5338_v33, %v5298_v34  ;;  %5616 = vmatpush2.bf16.msra.mxu0 %v8058_v36  ;;  %v8108_v18 = vld [vmem:[%s11145_s1 + $0xdcc] ss:$16 sps:$4 sm:$0xff]   ;;  %v8115_v36 = vld [vmem:[%s11145_s1 + $0xe28] ss:$16 sps:$4 sm:$0xff]  }
 0x248   :  { %5633 = vmatpush1.bf16.msra.mxu1 %v8061_v32  ;;  %v5300_v46 = vpop.f32.mrf.mxu0  ;;  %5617 = vmatprep.subr.bf16.mxu0 %v8066_v38  ;;  %v8111_v20 = vld [vmem:[%s11145_s1 + $0xe4c] ss:$16 sps:$4 sm:$0xff]   ;;  %v8118_v33 = vld [vmem:[%s11145_s1 + $0xd88] ss:$16 sps:$4 sm:$0xff]  }
 0x249   :  { %v5341_v7 = vpop.f32.mrf.mxu1  ;;  %5634 = vmatprep.subr.bf16.mxu1 %v8069_v51  ;;  %v8114_v31 = vld [vmem:[%s11145_s1 + $0xdac] ss:$16 sps:$4 sm:$0xff]   ;;  %v8121_v38 = vld [vmem:[%s11145_s1 + $0xe08] ss:$16 sps:$4 sm:$0xff]  }
 0x24a   :  { %v8117_v17 = vld [vmem:[%s11145_s1 + $0xe2c] ss:$16 sps:$4 sm:$0xff]   ;;  %v8124_v34 = vld [vmem:[%s11145_s1 + $0xd68] ss:$16 sps:$4 sm:$0xff]  }
 0x24b   :  { %5618 = vmatpush2.bf16.msra.mxu0 %v8064_v44  ;;  %v8120_v32 = vld [vmem:[%s11145_s1 + $0xd8c] ss:$16 sps:$4 sm:$0xff]   ;;  %v8127_v41 = vld [vmem:[%s11145_s1 + $0xfe8] ss:$16 sps:$4 sm:$0xff]  }
 0x24c   :  { %5635 = vmatpush1.bf16.msra.mxu1 %v8067_v45  ;;  %5619 = vmatprep.subr.bf16.mxu0 %v8072_v42  ;;  %v8123_v25 = vld [vmem:[%s11145_s1 + $0xe0c] ss:$16 sps:$4 sm:$0xff]   ;;  %v8130_v44 = vld [vmem:[%s11145_s1 + $0xd48] ss:$16 sps:$4 sm:$0xff]  }
 0x24d   :  { %5636 = vmatprep.subr.bf16.mxu1 %v8075_v57  ;;  %v8126_v51 = vld [vmem:[%s11145_s1 + $0xd6c] ss:$16 sps:$4 sm:$0xff]   ;;  %v8133_v45 = vld [vmem:[%s11145_s1 + $0xfc8] ss:$16 sps:$4 sm:$0xff]  }
 0x24e   :  { %v8132_v22 = vld [vmem:[%s11145_s1 + $0xd4c] ss:$16 sps:$4 sm:$0xff]   ;;  %v8136_v42 = vld [vmem:[%s11145_s1 + $0xd28] ss:$16 sps:$4 sm:$0xff]  }
 0x24f   :  { %5620 = vmatpush2.bf16.msra.mxu0 %v8070_v48  ;;  %v8138_v46 = vld [vmem:[%s11145_s1 + $0xd2c] ss:$16 sps:$4 sm:$0xff]   ;;  %v8139_v57 = vld [vmem:[%s11145_s1 + $0xfa8] ss:$16 sps:$4 sm:$0xff]  }
 0x250   :  { %5637 = vmatpush1.bf16.msra.mxu1 %v8073_v49  ;;  %5671 = vmatprep.subr.bf16.mxu0 %v8081_v37  ;;  %v8141_v7 = vld [vmem:[%s11145_s1 + $0xfac] ss:$16 sps:$4 sm:$0xff]   ;;  %v8145_v37 = vld [vmem:[%s11145_s1 + $0xf88] ss:$16 sps:$4 sm:$0xff]  }
 0x251   :  { %5638 = vmatprep.subr.bf16.mxu1 %v8078_v50  ;;  %v8144_v48 = vld [vmem:[%s11145_s1 + $0xd0c] ss:$16 sps:$4 sm:$0xff]   ;;  %v8142_v50 = vld [vmem:[%s11145_s1 + $0xd08] ss:$16 sps:$4 sm:$0xff]  }
 0x252   :  { %v5377_v59 = vpop.f32.mrf.mxu0  ;;  %5622 = vmatmul.mubr.bf16.vlgmr.msra.gmra.mxu0 %v9093_v39  ;;  %v8093_v39 = vld [vmem:[%s11145_s1 + $0xeac] ss:$16 sps:$4 sm:$0xff]  }
 0x253   :  { %v10446_v16 = vadd.f32 %v5377_v59, %v5337_v47  ;;  %5672 = vmatpush1.bf16.msra.mxu0 %v8079_v53  ;;  %5703 = vmatprep.mubr.bf16.mxu0 %v9115_v43  ;;  %v8099_v43 = vld [vmem:[%s11145_s1 + $0xe8c] ss:$16 sps:$4 sm:$0xff]  }
 0x254   :  { %5639 = vmatpush1.bf16.msra.mxu1 %v8076_v52  ;;  %v5379_v2 = vpop.f32.mrf.mxu0  ;;  %5673 = vmatprep.subr.bf16.mxu0 %v8087_v56  ;;  %v8129_v47 = vld [vmem:[%s11145_s1 + $0xfec] ss:$16 sps:$4 sm:$0xff]   ;;  %v8151_v56 = vld [vmem:[%s11145_s1 + $0x10e8] ss:$16 sps:$4 sm:$0xff]  }
 0x255   :  { %5640 = vmatprep.subr.bf16.mxu1 %v8084_v55  ;;  %v10460_v58 = vadd.f32 %v5379_v2, %v5339_v23  ;;  %v8135_v23 = vld [vmem:[%s11145_s1 + $0xfcc] ss:$16 sps:$4 sm:$0xff]   ;;  %v8148_v55 = vld [vmem:[%s11145_s1 + $0xf68] ss:$16 sps:$4 sm:$0xff]  }
 0x256   :  { %v5381_v5 = vpop.f32.mrf.mxu0  ;;  %v8147_v49 = vld [vmem:[%s11145_s1 + $0xf8c] ss:$16 sps:$4 sm:$0xff]   ;;  %v8154_v2 = vld [vmem:[%s11145_s1 + $0xf48] ss:$16 sps:$4 sm:$0xff]  }
 0x257   :  { %5674 = vmatpush1.bf16.msra.mxu0 %v8085_v60  ;;  %v8150_v52 = vld [vmem:[%s11145_s1 + $0xf6c] ss:$16 sps:$4 sm:$0xff]  }
 0x258   :  { %5641 = vmatpush1.bf16.msra.mxu1 %v8082_v15  ;;  %v5382_v24 = vpop.f32.mrf.mxu0  ;;  %5675 = vmatprep.subr.bf16.mxu0 %v8093_v39  ;;  %v8153_v53 = vld [vmem:[%s11145_s1 + $0x10ec] ss:$16 sps:$4 sm:$0xff]  }
 0x259   :  { %5642 = vmatprep.subr.bf16.mxu1 %v8090_v3  ;;  %v8156_v59 = vld [vmem:[%s11145_s1 + $0xf4c] ss:$16 sps:$4 sm:$0xff]   ;;  %v8157_v3 = vld [vmem:[%s11145_s1 + $0x10c8] ss:$16 sps:$4 sm:$0xff]  }
 0x25a   :  { %v8159_v15 = vld [vmem:[%s11145_s1 + $0x10cc] ss:$16 sps:$4 sm:$0xff]   ;;  %v8163_v24 = vld [vmem:[%s11145_s1 + $0x10a8] ss:$16 sps:$4 sm:$0xff]  }
 0x25b   :  { %5676 = vmatpush1.bf16.msra.mxu0 %v8091_v11  ;;  %v8162_v5 = vld [vmem:[%s11145_s1 + $0xf2c] ss:$16 sps:$4 sm:$0xff]   ;;  %v8160_v11 = vld [vmem:[%s11145_s1 + $0xf28] ss:$16 sps:$4 sm:$0xff]  }
 0x25c   :  { %5643 = vmatpush1.bf16.msra.mxu1 %v8088_v8  ;;  %5677 = vmatprep.subr.bf16.mxu0 %v8099_v43  ;;  %v8168_v43 = vld [vmem:[%s11145_s1 + $0xf0c] ss:$16 sps:$4 sm:$0xff]  }
 0x25d   :  { %5644 = vmatprep.subr.bf16.mxu1 %v8096_v27 }
 0x25f   :  { %5678 = vmatpush1.bf16.msra.mxu0 %v8097_v13  ;;  %v834_v13 = vsub.s32 3, %v9286_v54 }
 0x260   :  { %5645 = vmatpush1.bf16.msra.mxu1 %v8094_v12  ;;  %5679 = vmatprep.subr.bf16.mxu0 %v8105_v6  ;;  %v830_v12 = vsub.s32 2, %v9286_v54  ;;  %v8169_v6 = vld [vmem:[%s11145_s1 + $0x1088] ss:$16 sps:$4 sm:$0xff]   ;;  %v8177_v54 = vld [vmem:[%s11145_s1 + $0x12ec] ss:$16 sps:$4 sm:$0xff]  }
 0x261   :  { %5646 = vmatprep.subr.bf16.mxu1 %v8102_v14  ;;  %v8166_v14 = vld [vmem:[%s11145_s1 + $0xf08] ss:$16 sps:$4 sm:$0xff]  }
 0x263   :  { %5680 = vmatpush1.bf16.msra.mxu0 %v8103_v26  ;;  %v8396_v26 = vld [vmem:[%s11147_s2] sm:$0xf] }
 0x264   :  { %5647 = vmatpush2.bf16.msra.mxu1 %v8100_v19  ;;  %5681 = vmatprep.subr.bf16.mxu0 %v8111_v20  ;;  %v8174_v19 = vld [vmem:[%s11145_s1 + $0x106c] ss:$16 sps:$4 sm:$0xff]   ;;  %v835_v20 = vrot.slane %v8396_v26, %v834_v13 }
 0x265   :  { %5648 = vmatprep.subr.bf16.mxu1 %v8108_v18  ;;  %v831_v18 = vrot.slane %v8396_v26, %v830_v12  ;;  %v8234_v12 = vld [vmem:[%s11145_s1 + $0x112c] ss:$16 sps:$4 sm:$0xff]   ;;  %v8238_v26 = vld [vmem:[%s11145_s1 + $0x1108] ss:$16 sps:$4 sm:$0xff]  }
 0x266   :  { %v8237_v13 = vld [vmem:[%s11145_s1 + $0x13ac] ss:$16 sps:$4 sm:$0xff]  }
 0x267   :  { %5682 = vmatpush1.bf16.msra.mxu0 %v8109_v28  ;;  %v8175_v28 = vld [vmem:[%s11145_s1 + $0x12e8] ss:$16 sps:$4 sm:$0xff]  }
 0x268   :  { %5649 = vmatpush2.bf16.msra.mxu1 %v8106_v29  ;;  %5683 = vmatprep.subr.bf16.mxu0 %v8117_v17  ;;  %v8172_v29 = vld [vmem:[%s11145_s1 + $0x1068] ss:$16 sps:$4 sm:$0xff]   ;;  %v8183_v17 = vld [vmem:[%s11145_s1 + $0x12cc] ss:$16 sps:$4 sm:$0xff]  }
 0x269   :  { %5650 = vmatprep.subr.bf16.mxu1 %v8114_v31  ;;  %v8180_v31 = vld [vmem:[%s11145_s1 + $0x104c] ss:$16 sps:$4 sm:$0xff]  }
 0x26b   :  { %5684 = vmatpush1.bf16.msra.mxu0 %v8115_v36  ;;  %v8178_v36 = vld [vmem:[%s11145_s1 + $0x1048] ss:$16 sps:$4 sm:$0xff]  }
 0x26c   :  { %5651 = vmatpush2.bf16.msra.mxu1 %v8112_v30  ;;  %5685 = vmatprep.subr.bf16.mxu0 %v8123_v25 }
 0x26d   :  { %5652 = vmatprep.subr.bf16.mxu1 %v8120_v32  ;;  %v8181_v32 = vld [vmem:[%s11145_s1 + $0x12c8] ss:$16 sps:$4 sm:$0xff]  }
 0x26f   :  { %5686 = vmatpush1.bf16.msra.mxu0 %v8121_v38 }
 0x270   :  { %5653 = vmatpush2.bf16.msra.mxu1 %v8118_v33  ;;  %5687 = vmatprep.subr.bf16.mxu0 %v8129_v47  ;;  %v8186_v33 = vld [vmem:[%s11145_s1 + $0x102c] ss:$16 sps:$4 sm:$0xff]  }
 0x271   :  { %5654 = vmatprep.subr.bf16.mxu1 %v8126_v51 }
 0x273   :  { %5688 = vmatpush2.bf16.msra.mxu0 %v8127_v41 }
 0x274   :  { %5655 = vmatpush2.bf16.msra.mxu1 %v8124_v34  ;;  %5689 = vmatprep.subr.bf16.mxu0 %v8135_v23  ;;  %v8189_v34 = vld [vmem:[%s11145_s1 + $0x12ac] ss:$16 sps:$4 sm:$0xff]  }
 0x275   :  { %5656 = vmatprep.subr.bf16.mxu1 %v8132_v22  ;;  %v8187_v22 = vld [vmem:[%s11145_s1 + $0x12a8] ss:$16 sps:$4 sm:$0xff]  }
 0x277   :  { %5690 = vmatpush2.bf16.msra.mxu0 %v8133_v45  ;;  %v8192_v45 = vld [vmem:[%s11145_s1 + $0x100c] ss:$16 sps:$4 sm:$0xff]  }
 0x278   :  { %5657 = vmatpush2.bf16.msra.mxu1 %v8130_v44  ;;  %5691 = vmatprep.subr.bf16.mxu0 %v8141_v7  ;;  %v8190_v7 = vld [vmem:[%s11145_s1 + $0x1008] ss:$16 sps:$4 sm:$0xff]  }
 0x279   :  { %5658 = vmatprep.subr.bf16.mxu1 %v8138_v46  ;;  %v8195_v46 = vld [vmem:[%s11145_s1 + $0x128c] ss:$16 sps:$4 sm:$0xff]  }
 0x27b   :  { %5692 = vmatpush2.bf16.msra.mxu0 %v8139_v57  ;;  %v8201_v57 = vld [vmem:[%s11145_s1 + $0x126c] ss:$16 sps:$4 sm:$0xff]  }
 0x27c   :  { %5659 = vmatpush2.bf16.msra.mxu1 %v8136_v42  ;;  %5693 = vmatprep.subr.bf16.mxu0 %v8147_v49  ;;  %v8198_v42 = vld [vmem:[%s11145_s1 + $0x11ec] ss:$16 sps:$4 sm:$0xff]   ;;  %v8199_v49 = vld [vmem:[%s11145_s1 + $0x1268] ss:$16 sps:$4 sm:$0xff]  }
 0x27d   :  { %5660 = vmatprep.subr.bf16.mxu1 %v8144_v48  ;;  %v8196_v48 = vld [vmem:[%s11145_s1 + $0x11e8] ss:$16 sps:$4 sm:$0xff]  }
 0x27f   :  { %5694 = vmatpush2.bf16.msra.mxu0 %v8145_v37  ;;  %v8207_v37 = vld [vmem:[%s11145_s1 + $0x124c] ss:$16 sps:$4 sm:$0xff]  }
 0x280   :  { %5661 = vmatpush2.bf16.msra.mxu1 %v8142_v50  ;;  %5695 = vmatprep.subr.bf16.mxu0 %v8150_v52  ;;  %v8204_v50 = vld [vmem:[%s11145_s1 + $0x11cc] ss:$16 sps:$4 sm:$0xff]   ;;  %v8202_v52 = vld [vmem:[%s11145_s1 + $0x11c8] ss:$16 sps:$4 sm:$0xff]  }
 0x281   :  { %5712 = vmatprep.subr.bf16.mxu1 %v8153_v53  ;;  %v8205_v53 = vld [vmem:[%s11145_s1 + $0x1248] ss:$16 sps:$4 sm:$0xff]  }
 0x283   :  { %v5418_v60 = vpop.f32.mrf.mxu1  ;;  %5663 = vmatmul.mubr.bf16.vlgmr.msra.gmra.mxu1 %v9313_v0  ;;  %5696 = vmatpush2.bf16.msra.mxu0 %v8148_v55  ;;  %v8165_v0 = vld [vmem:[%s11145_s1 + $0x10ac] ss:$16 sps:$4 sm:$0xff]  }
 0x284   :  { %5713 = vmatpush1.bf16.msra.mxu1 %v8151_v56  ;;  %5697 = vmatprep.subr.bf16.mxu0 %v8156_v59  ;;  %v5419_v30 = vadd.f32 %v5418_v60, %v831_v18  ;;  %v8210_v55 = vld [vmem:[%s11145_s1 + $0x11ac] ss:$16 sps:$4 sm:$0xff]   ;;  %v8208_v59 = vld [vmem:[%s11145_s1 + $0x11a8] ss:$16 sps:$4 sm:$0xff]  }
 0x285   :  { %v5420_v39 = vpop.f32.mrf.mxu1  ;;  %5714 = vmatprep.subr.bf16.mxu1 %v8159_v15  ;;  %5744 = vmatprep.mubr.bf16.mxu1 %v9340_v9  ;;  %v8171_v9 = vld [vmem:[%s11145_s1 + $0x108c] ss:$16 sps:$4 sm:$0xff]   ;;  %v8211_v15 = vld [vmem:[%s11145_s1 + $0x1228] ss:$16 sps:$4 sm:$0xff]  }
 0x286   :  { %v5421_v38 = vadd.f32 %v5420_v39, %v835_v20  ;;  %v8213_v56 = vld [vmem:[%s11145_s1 + $0x122c] ss:$16 sps:$4 sm:$0xff]   ;;  %v8217_v39 = vld [vmem:[%s11145_s1 + $0x1208] ss:$16 sps:$4 sm:$0xff]  }
 0x287   :  { %v5422_v8 = vpop.f32.mrf.mxu1  ;;  %5698 = vmatpush2.bf16.msra.mxu0 %v8154_v2  ;;  %v8216_v60 = vld [vmem:[%s11145_s1 + $0x118c] ss:$16 sps:$4 sm:$0xff]   ;;  %v8241_v18 = vld [vmem:[%s11145_s1 + $0x1388] ss:$16 sps:$4 sm:$0xff]  }
 0x288   :  { %5715 = vmatpush1.bf16.msra.mxu1 %v8157_v3  ;;  %5699 = vmatprep.subr.bf16.mxu0 %v8162_v5  ;;  %v8219_v2 = vld [vmem:[%s11145_s1 + $0x120c] ss:$16 sps:$4 sm:$0xff]   ;;  %v8214_v3 = vld [vmem:[%s11145_s1 + $0x1188] ss:$16 sps:$4 sm:$0xff]  }
 0x289   :  { %v5423_v27 = vpop.f32.mrf.mxu1  ;;  %5716 = vmatprep.subr.bf16.mxu1 %v8165_v0  ;;  %v8222_v5 = vld [vmem:[%s11145_s1 + $0x116c] ss:$16 sps:$4 sm:$0xff]   ;;  %v8220_v8 = vld [vmem:[%s11145_s1 + $0x1168] ss:$16 sps:$4 sm:$0xff]  }
 0x28a   :  { %v8225_v0 = vld [vmem:[%s11145_s1 + $0x13ec] ss:$16 sps:$4 sm:$0xff]  }
 0x28b   :  { %5700 = vmatpush2.bf16.msra.mxu0 %v8160_v11  ;;  %v8223_v11 = vld [vmem:[%s11145_s1 + $0x13e8] ss:$16 sps:$4 sm:$0xff]   ;;  %v8231_v27 = vld [vmem:[%s11145_s1 + $0x13cc] ss:$16 sps:$4 sm:$0xff]  }
 0x28c   :  { %5717 = vmatpush1.bf16.msra.mxu1 %v8163_v24  ;;  %5701 = vmatprep.subr.bf16.mxu0 %v8168_v43  ;;  %v8228_v24 = vld [vmem:[%s11145_s1 + $0x114c] ss:$16 sps:$4 sm:$0xff]   ;;  %v8226_v43 = vld [vmem:[%s11145_s1 + $0x1148] ss:$16 sps:$4 sm:$0xff]  }
 0x28d   :  { %5718 = vmatprep.subr.bf16.mxu1 %v8171_v9  ;;  %v8229_v9 = vld [vmem:[%s11145_s1 + $0x13c8] ss:$16 sps:$4 sm:$0xff]   ;;  %v8246_v20 = vld [vmem:[%s11145_s1 + $0x136c] ss:$16 sps:$4 sm:$0xff]  }
 0x28f   :  { %5702 = vmatpush2.bf16.msra.mxu0 %v8166_v14  ;;  %v8232_v14 = vld [vmem:[%s11145_s1 + $0x1128] ss:$16 sps:$4 sm:$0xff]  }
 0x290   :  { %5719 = vmatpush1.bf16.msra.mxu1 %v8169_v6  ;;  %5753 = vmatprep.subr.bf16.mxu0 %v8177_v54  ;;  %v8235_v6 = vld [vmem:[%s11145_s1 + $0x13a8] ss:$16 sps:$4 sm:$0xff]   ;;  %v8243_v54 = vld [vmem:[%s11145_s1 + $0x138c] ss:$16 sps:$4 sm:$0xff]  }
 0x291   :  { %5720 = vmatprep.subr.bf16.mxu1 %v8174_v19  ;;  %v8240_v19 = vld [vmem:[%s11145_s1 + $0x110c] ss:$16 sps:$4 sm:$0xff]  }
 0x292   :  { %v5459_v25 = vpop.f32.mrf.mxu0  ;;  %5704 = vmatmul.mubr.bf16.vlgmr.msra.gmra.mxu0 %v9317_v1  ;;  %v8184_v1 = vld [vmem:[%s11145_s1 + $0x1028] ss:$16 sps:$4 sm:$0xff]  }
 0x293   :  { %v10660_v51 = vadd.f32 %v5459_v25, %v5419_v30  ;;  %5754 = vmatpush1.bf16.msra.mxu0 %v8175_v28  ;;  %5785 = vmatprep.mubr.bf16.mxu0 %v9344_v10  ;;  %v8193_v10 = vld [vmem:[%s11145_s1 + $0x1288] ss:$16 sps:$4 sm:$0xff]   ;;  %v8255_v30 = vld [vmem:[%s11145_s1 + $0x14cc] ss:$16 sps:$4 sm:$0xff]  }
 0x294   :  { %5721 = vmatpush1.bf16.msra.mxu1 %v8172_v29  ;;  %v5461_v47 = vpop.f32.mrf.mxu0  ;;  %5755 = vmatprep.subr.bf16.mxu0 %v8183_v17  ;;  %v8249_v29 = vld [vmem:[%s11145_s1 + $0x14ec] ss:$16 sps:$4 sm:$0xff]   ;;  %v8244_v28 = vld [vmem:[%s11145_s1 + $0x1368] ss:$16 sps:$4 sm:$0xff]  }
 0x295   :  { %5722 = vmatprep.subr.bf16.mxu1 %v8180_v31  ;;  %v10665_v41 = vadd.f32 %v5461_v47, %v5421_v38  ;;  %v8247_v31 = vld [vmem:[%s11145_s1 + $0x14e8] ss:$16 sps:$4 sm:$0xff]   ;;  %v8252_v17 = vld [vmem:[%s11145_s1 + $0x134c] ss:$16 sps:$4 sm:$0xff]  }
 0x296   :  { %v5463_v23 = vpop.f32.mrf.mxu0  ;;  %v8250_v25 = vld [vmem:[%s11145_s1 + $0x1348] ss:$16 sps:$4 sm:$0xff]   ;;  %v8258_v47 = vld [vmem:[%s11145_s1 + $0x132c] ss:$16 sps:$4 sm:$0xff]  }
 0x297   :  { %5756 = vmatpush1.bf16.msra.mxu0 %v8181_v32 }
 0x298   :  { %5723 = vmatpush1.bf16.msra.mxu1 %v8178_v36  ;;  %v5464_v44 = vpop.f32.mrf.mxu0  ;;  %5757 = vmatprep.subr.bf16.mxu0 %v8189_v34 }
 0x299   :  { %5724 = vmatprep.subr.bf16.mxu1 %v8186_v33  ;;  %v8253_v33 = vld [vmem:[%s11145_s1 + $0x14c8] ss:$16 sps:$4 sm:$0xff]  }
 0x29a   :  { %v8262_v44 = vld [vmem:[%s11145_s1 + $0x1308] ss:$16 sps:$4 sm:$0xff]  }
 0x29b   :  { %5758 = vmatpush1.bf16.msra.mxu0 %v8187_v22  ;;  %v8259_v22 = vld [vmem:[%s11145_s1 + $0x14a8] ss:$16 sps:$4 sm:$0xff]  }
 0x29c   :  { %5725 = vmatpush1.bf16.msra.mxu1 %v8184_v1  ;;  %5759 = vmatprep.subr.bf16.mxu0 %v8195_v46  ;;  %v8256_v1 = vld [vmem:[%s11145_s1 + $0x1328] ss:$16 sps:$4 sm:$0xff]   ;;  %v8270_v46 = vld [vmem:[%s11145_s1 + $0x146c] ss:$16 sps:$4 sm:$0xff]  }
 0x29d   :  { %5726 = vmatprep.subr.bf16.mxu1 %v8192_v45  ;;  %v8265_v45 = vld [vmem:[%s11145_s1 + $0x1488] ss:$16 sps:$4 sm:$0xff]  }
 0x29f   :  { %5760 = vmatpush1.bf16.msra.mxu0 %v8193_v10  ;;  %v8268_v10 = vld [vmem:[%s11145_s1 + $0x1468] ss:$16 sps:$4 sm:$0xff]  }
 0x2a0   :  { %5727 = vmatpush1.bf16.msra.mxu1 %v8190_v7  ;;  %5761 = vmatprep.subr.bf16.mxu0 %v8201_v57  ;;  %v8273_v7 = vld [vmem:[%s11145_s1 + $0x16ec] ss:$16 sps:$4 sm:$0xff]  }
 0x2a1   :  { %5728 = vmatprep.subr.bf16.mxu1 %v8198_v42  ;;  %v8271_v42 = vld [vmem:[%s11145_s1 + $0x16e8] ss:$16 sps:$4 sm:$0xff]   ;;  %v8276_v57 = vld [vmem:[%s11145_s1 + $0x144c] ss:$16 sps:$4 sm:$0xff]  }
 0x2a3   :  { %5762 = vmatpush1.bf16.msra.mxu0 %v8199_v49 }
 0x2a4   :  { %5729 = vmatpush2.bf16.msra.mxu1 %v8196_v48  ;;  %5763 = vmatprep.subr.bf16.mxu0 %v8207_v37  ;;  %v8279_v48 = vld [vmem:[%s11145_s1 + $0x16cc] ss:$16 sps:$4 sm:$0xff]   ;;  %v8274_v37 = vld [vmem:[%s11145_s1 + $0x1448] ss:$16 sps:$4 sm:$0xff]  }
 0x2a5   :  { %5730 = vmatprep.subr.bf16.mxu1 %v8204_v50 }
 0x2a7   :  { %5764 = vmatpush1.bf16.msra.mxu0 %v8205_v53 }
 0x2a8   :  { %5731 = vmatpush2.bf16.msra.mxu1 %v8202_v52  ;;  %5765 = vmatprep.subr.bf16.mxu0 %v8213_v56  ;;  %v8277_v52 = vld [vmem:[%s11145_s1 + $0x16c8] ss:$16 sps:$4 sm:$0xff]  }
 0x2a9   :  { %5732 = vmatprep.subr.bf16.mxu1 %v8210_v55  ;;  %v8282_v55 = vld [vmem:[%s11145_s1 + $0x142c] ss:$16 sps:$4 sm:$0xff]  }
 0x2ab   :  { %5766 = vmatpush1.bf16.msra.mxu0 %v8211_v15  ;;  %v8280_v15 = vld [vmem:[%s11145_s1 + $0x1428] ss:$16 sps:$4 sm:$0xff]  }
 0x2ac   :  { %5733 = vmatpush2.bf16.msra.mxu1 %v8208_v59  ;;  %5767 = vmatprep.subr.bf16.mxu0 %v8219_v2 }
 0x2ad   :  { %5734 = vmatprep.subr.bf16.mxu1 %v8216_v60  ;;  %v8283_v60 = vld [vmem:[%s11145_s1 + $0x16a8] ss:$16 sps:$4 sm:$0xff]  }
 0x2af   :  { %5768 = vmatpush1.bf16.msra.mxu0 %v8217_v39  ;;  %v8286_v39 = vld [vmem:[%s11145_s1 + $0x1408] ss:$16 sps:$4 sm:$0xff]  }
 0x2b0   :  { %5735 = vmatpush2.bf16.msra.mxu1 %v8214_v3  ;;  %5769 = vmatprep.subr.bf16.mxu0 %v8225_v0  ;;  %v8288_v3 = vld [vmem:[%s11145_s1 + $0x140c] ss:$16 sps:$4 sm:$0xff]  }
 0x2b1   :  { %5736 = vmatprep.subr.bf16.mxu1 %v8222_v5  ;;  %v8289_v5 = vld [vmem:[%s11145_s1 + $0x1688] ss:$16 sps:$4 sm:$0xff]   ;;  %v8294_v0 = vld [vmem:[%s11145_s1 + $0x15ec] ss:$16 sps:$4 sm:$0xff]  }
 0x2b3   :  { %5770 = vmatpush2.bf16.msra.mxu0 %v8223_v11  ;;  %v8292_v11 = vld [vmem:[%s11145_s1 + $0x15e8] ss:$16 sps:$4 sm:$0xff]  }
 0x2b4   :  { %5737 = vmatpush2.bf16.msra.mxu1 %v8220_v8  ;;  %5771 = vmatprep.subr.bf16.mxu0 %v8231_v27  ;;  %v8297_v8 = vld [vmem:[%s11145_s1 + $0x166c] ss:$16 sps:$4 sm:$0xff]  }
 0x2b5   :  { %5738 = vmatprep.subr.bf16.mxu1 %v8228_v24  ;;  %v8295_v24 = vld [vmem:[%s11145_s1 + $0x1668] ss:$16 sps:$4 sm:$0xff]   ;;  %v8300_v27 = vld [vmem:[%s11145_s1 + $0x15cc] ss:$16 sps:$4 sm:$0xff]  }
 0x2b7   :  { %5772 = vmatpush2.bf16.msra.mxu0 %v8229_v9  ;;  %v8298_v9 = vld [vmem:[%s11145_s1 + $0x15c8] ss:$16 sps:$4 sm:$0xff]  }
 0x2b8   :  { %5739 = vmatpush2.bf16.msra.mxu1 %v8226_v43  ;;  %5773 = vmatprep.subr.bf16.mxu0 %v8237_v13  ;;  %v8303_v43 = vld [vmem:[%s11145_s1 + $0x164c] ss:$16 sps:$4 sm:$0xff]  }
 0x2b9   :  { %5740 = vmatprep.subr.bf16.mxu1 %v8234_v12  ;;  %v8301_v12 = vld [vmem:[%s11145_s1 + $0x1648] ss:$16 sps:$4 sm:$0xff]   ;;  %v8306_v13 = vld [vmem:[%s11145_s1 + $0x15ac] ss:$16 sps:$4 sm:$0xff]  }
 0x2bb   :  { %5774 = vmatpush2.bf16.msra.mxu0 %v8235_v6  ;;  %v8304_v6 = vld [vmem:[%s11145_s1 + $0x15a8] ss:$16 sps:$4 sm:$0xff]  }
 0x2bc   :  { %5741 = vmatpush2.bf16.msra.mxu1 %v8232_v14  ;;  %5775 = vmatprep.subr.bf16.mxu0 %v8243_v54  ;;  %v8309_v14 = vld [vmem:[%s11145_s1 + $0x162c] ss:$16 sps:$4 sm:$0xff]  }
 0x2bd   :  { %5742 = vmatprep.subr.bf16.mxu1 %v8240_v19  ;;  %v8307_v19 = vld [vmem:[%s11145_s1 + $0x1628] ss:$16 sps:$4 sm:$0xff]   ;;  %v8312_v54 = vld [vmem:[%s11145_s1 + $0x158c] ss:$16 sps:$4 sm:$0xff]  }
 0x2bf   :  { %5776 = vmatpush2.bf16.msra.mxu0 %v8241_v18  ;;  %v8310_v18 = vld [vmem:[%s11145_s1 + $0x1588] ss:$16 sps:$4 sm:$0xff]  }
 0x2c0   :  { %5743 = vmatpush2.bf16.msra.mxu1 %v8238_v26  ;;  %5777 = vmatprep.subr.bf16.mxu0 %v8246_v20  ;;  %v8315_v26 = vld [vmem:[%s11145_s1 + $0x160c] ss:$16 sps:$4 sm:$0xff]   ;;  %v8313_v20 = vld [vmem:[%s11145_s1 + $0x1608] ss:$16 sps:$4 sm:$0xff]  }
 0x2c1   :  { %5794 = vmatprep.subr.bf16.mxu1 %v8249_v29  ;;  %v8318_v29 = vld [vmem:[%s11145_s1 + $0x156c] ss:$16 sps:$4 sm:$0xff]  }
 0x2c3   :  { %v5500_v36 = vpop.f32.mrf.mxu1  ;;  %5745 = vmatmul.mubr.bf16.vlgmr.msra.gmra.mxu1 %v9552_v61  ;;  %5778 = vmatpush2.bf16.msra.mxu0 %v8244_v28  ;;  %v8261_v61 = vld [vmem:[%s11145_s1 + $0x14ac] ss:$16 sps:$4 sm:$0xff]  }
 0x2c4   :  { %v5501_v32 = vadd.f32 %v5500_v36, %v10660_v51  ;;  %5795 = vmatpush1.bf16.msra.mxu1 %v8247_v31  ;;  %5779 = vmatprep.subr.bf16.mxu0 %v8252_v17  ;;  %v8321_v28 = vld [vmem:[%s11145_s1 + $0x17ec] ss:$16 sps:$4 sm:$0xff]   ;;  %v8316_v31 = vld [vmem:[%s11145_s1 + $0x1568] ss:$16 sps:$4 sm:$0xff]  }
 0x2c5   :  { %v5502_v38 = vpop.f32.mrf.mxu1  ;;  %5796 = vmatprep.subr.bf16.mxu1 %v8255_v30  ;;  %5826 = vmatprep.mubr.bf16.mxu1 %v9572_v35  ;;  %v8267_v35 = vld [vmem:[%s11145_s1 + $0x148c] ss:$16 sps:$4 sm:$0xff]   ;;  %v8319_v17 = vld [vmem:[%s11145_s1 + $0x17e8] ss:$16 sps:$4 sm:$0xff]  }
 0x2c6   :  { %v5503_v51 = vadd.f32 %v5502_v38, %v10665_v41  ;;  %v8264_v41 = vld [vmem:[%s11145_s1 + $0x130c] ss:$16 sps:$4 sm:$0xff]  }
 0x2c7   :  { %v5504_v34 = vpop.f32.mrf.mxu1  ;;  %5780 = vmatpush2.bf16.msra.mxu0 %v8250_v25  ;;  %v8324_v30 = vld [vmem:[%s11145_s1 + $0x154c] ss:$16 sps:$4 sm:$0xff]   ;;  %v8325_v25 = vld [vmem:[%s11145_s1 + $0x17c8] ss:$16 sps:$4 sm:$0xff]  }
 0x2c8   :  { %5797 = vmatpush1.bf16.msra.mxu1 %v8253_v33  ;;  %5781 = vmatprep.subr.bf16.mxu0 %v8258_v47  ;;  %v8327_v36 = vld [vmem:[%s11145_s1 + $0x17cc] ss:$16 sps:$4 sm:$0xff]   ;;  %v8328_v47 = vld [vmem:[%s11145_s1 + $0x1528] ss:$16 sps:$4 sm:$0xff]  }
 0x2c9   :  { %v5505_v23 = vpop.f32.mrf.mxu1  ;;  %5798 = vmatprep.subr.bf16.mxu1 %v8261_v61  ;;  %v8330_v33 = vld [vmem:[%s11145_s1 + $0x152c] ss:$16 sps:$4 sm:$0xff]   ;;  %v8331_v61 = vld [vmem:[%s11145_s1 + $0x17a8] ss:$16 sps:$4 sm:$0xff]  }
 0x2ca   :  { %v8333_v38 = vld [vmem:[%s11145_s1 + $0x17ac] ss:$16 sps:$4 sm:$0xff]  }
 0x2cb   :  { %5782 = vmatpush2.bf16.msra.mxu0 %v8256_v1  ;;  %v8339_v34 = vld [vmem:[%s11145_s1 + $0x178c] ss:$16 sps:$4 sm:$0xff]   ;;  %v8334_v1 = vld [vmem:[%s11145_s1 + $0x1508] ss:$16 sps:$4 sm:$0xff]  }
 0x2cc   :  { %5799 = vmatpush1.bf16.msra.mxu1 %v8259_v22  ;;  %5783 = vmatprep.subr.bf16.mxu0 %v8264_v41  ;;  %v8337_v22 = vld [vmem:[%s11145_s1 + $0x1788] ss:$16 sps:$4 sm:$0xff]   ;;  %v8342_v23 = vld [vmem:[%s11145_s1 + $0x176c] ss:$16 sps:$4 sm:$0xff]  }
 0x2cd   :  { %5800 = vmatprep.subr.bf16.mxu1 %v8267_v35  ;;  %v8345_v41 = vld [vmem:[%s11145_s1 + $0x186c] ss:$16 sps:$4 sm:$0xff]   ;;  %v8340_v35 = vld [vmem:[%s11145_s1 + $0x1768] ss:$16 sps:$4 sm:$0xff]  }
 0x2cf   :  { %5784 = vmatpush2.bf16.msra.mxu0 %v8262_v44  ;;  %v8343_v44 = vld [vmem:[%s11145_s1 + $0x1868] ss:$16 sps:$4 sm:$0xff]  }
 0x2d0   :  { %5801 = vmatpush1.bf16.msra.mxu1 %v8265_v45  ;;  %5835 = vmatprep.subr.bf16.mxu0 %v8273_v7  ;;  %v8348_v45 = vld [vmem:[%s11145_s1 + $0x174c] ss:$16 sps:$4 sm:$0xff]  }
 0x2d1   :  { %5802 = vmatprep.subr.bf16.mxu1 %v8270_v46  ;;  %v8351_v46 = vld [vmem:[%s11145_s1 + $0x184c] ss:$16 sps:$4 sm:$0xff]  }
 0x2d2   :  { %v5541_v49 = vpop.f32.mrf.mxu0  ;;  %5786 = vmatmul.mubr.bf16.vlgmr.msra.gmra.mxu0 %v9556_v62  ;;  %v8285_v62 = vld [vmem:[%s11145_s1 + $0x16ac] ss:$16 sps:$4 sm:$0xff]  }
 0x2d3   :  { %v10853_v50 = vadd.f32 %v5541_v49, %v5501_v32  ;;  %5836 = vmatpush1.bf16.msra.mxu0 %v8271_v42  ;;  %5867 = vmatprep.mubr.bf16.mxu0 %v9576_v40  ;;  %v8291_v40 = vld [vmem:[%s11145_s1 + $0x168c] ss:$16 sps:$4 sm:$0xff]   ;;  %v8322_v32 = vld [vmem:[%s11145_s1 + $0x1548] ss:$16 sps:$4 sm:$0xff]  }
 0x2d4   :  { %5803 = vmatpush1.bf16.msra.mxu1 %v8268_v10  ;;  %v5543_v53 = vpop.f32.mrf.mxu0  ;;  %5837 = vmatprep.subr.bf16.mxu0 %v8279_v48  ;;  %v8346_v42 = vld [vmem:[%s11145_s1 + $0x1748] ss:$16 sps:$4 sm:$0xff]   ;;  %v8354_v49 = vld [vmem:[%s11145_s1 + $0x172c] ss:$16 sps:$4 sm:$0xff]  }
 0x2d5   :  { %5804 = vmatprep.subr.bf16.mxu1 %v8276_v57  ;;  %v10867_v56 = vadd.f32 %v5543_v53, %v5503_v51  ;;  %v8336_v51 = vld [vmem:[%s11145_s1 + $0x150c] ss:$16 sps:$4 sm:$0xff]   ;;  %v8349_v57 = vld [vmem:[%s11145_s1 + $0x1848] ss:$16 sps:$4 sm:$0xff]  }
 0x2d6   :  { %v5545_v59 = vpop.f32.mrf.mxu0  ;;  %v8355_v53 = vld [vmem:[%s11145_s1 + $0x1828] ss:$16 sps:$4 sm:$0xff]  }
 0x2d7   :  { %5838 = vmatpush1.bf16.msra.mxu0 %v8277_v52  ;;  %v8352_v52 = vld [vmem:[%s11145_s1 + $0x1728] ss:$16 sps:$4 sm:$0xff]  }
 0x2d8   :  { %5805 = vmatpush1.bf16.msra.mxu1 %v8274_v37  ;;  %v5546_v2 = vpop.f32.mrf.mxu0  ;;  %5839 = vmatprep.subr.bf16.mxu0 %v8285_v62  ;;  %v8360_v62 = vld [vmem:[%s11145_s1 + $0x170c] ss:$16 sps:$4 sm:$0xff]   ;;  %v8361_v59 = vld [vmem:[%s11145_s1 + $0x1808] ss:$16 sps:$4 sm:$0xff]  }
 0x2d9   :  { %5806 = vmatprep.subr.bf16.mxu1 %v8282_v55  ;;  %v8365_v2 = vld [vmem:[%s11148_s3 + $0x38] sm:$0xff]  }
 0x2db   :  { %5840 = vmatpush1.bf16.msra.mxu0 %v8283_v60  ;;  %v5918_v60 = vmax.f32 %v10460_v58, 0.0 }
 0x2dc   :  { %5807 = vmatpush1.bf16.msra.mxu1 %v8280_v15  ;;  %5841 = vmatprep.subr.bf16.mxu0 %v8291_v40  ;;  %v8364_v15 = vld [vmem:[%s11148_s3 + $0x78] sm:$0xff]  }
 0x2dd   :  { %5808 = vmatprep.subr.bf16.mxu1 %v8288_v3  ;;  %v8366_v3 = vld [vmem:[%s11148_s3 + $0x70] sm:$0xff]   ;;  %v5922_v40 = vpack.c.bf16 %v5918_v60, %v5918_v60 }
 0x2df   :  { %5842 = vmatpush1.bf16.msra.mxu0 %v8289_v5  ;;  %v8397_v5 = vld [vmem:[%s11146_s0 + $0x60] ss:$0 sps:$4 sm:$0xff]  }
 0x2e0   :  { %5809 = vmatpush1.bf16.msra.mxu1 %v8286_v39  ;;  %5843 = vmatprep.subr.bf16.mxu0 %v8297_v8 }
 0x2e1   :  { %5810 = vmatprep.subr.bf16.mxu1 %v8294_v0  ;;  %v8367_v0 = vld [vmem:[%s11148_s3 + $0x30] sm:$0xff]  }
 0x2e3   :  { %5844 = vmatpush1.bf16.msra.mxu0 %v8295_v24 }
 0x2e4   :  { %5811 = vmatpush2.bf16.msra.mxu1 %v8292_v11  ;;  %5845 = vmatprep.subr.bf16.mxu0 %v8303_v43  ;;  %v8368_v11 = vld [vmem:[%s11148_s3 + $0x68] sm:$0xff]  }
 0x2e5   :  { %5812 = vmatprep.subr.bf16.mxu1 %v8300_v27  ;;  %v8369_v27 = vld [vmem:[%s11148_s3 + $0x28] sm:$0xff]  }
 0x2e7   :  { %5846 = vmatpush1.bf16.msra.mxu0 %v8301_v12  ;;  %v8380_v12 = vld [vmem:[%s11148_s3 + $0xf8] sm:$0xff]  }
 0x2e8   :  { %5813 = vmatpush2.bf16.msra.mxu1 %v8298_v9  ;;  %5847 = vmatprep.subr.bf16.mxu0 %v8309_v14  ;;  %v8370_v9 = vld [vmem:[%s11148_s3 + $0x60] sm:$0xff]  }
 0x2e9   :  { %5814 = vmatprep.subr.bf16.mxu1 %v8306_v13  ;;  %v8381_v13 = vld [vmem:[%s11148_s3 + $0xb8] sm:$0xff]   ;;  %v8371_v14 = vld [vmem:[%s11148_s3 + $0x20] sm:$0xff]  }
 0x2eb   :  { %5848 = vmatpush1.bf16.msra.mxu0 %v8307_v19  ;;  %v8373_v19 = vld [vmem:[%s11148_s3 + $0x18] sm:$0xff]  }
 0x2ec   :  { %5815 = vmatpush2.bf16.msra.mxu1 %v8304_v6  ;;  %5849 = vmatprep.subr.bf16.mxu0 %v8315_v26  ;;  %v8372_v6 = vld [vmem:[%s11148_s3 + $0x58] sm:$0xff]   ;;  %v8375_v26 = vld [vmem:[%s11148_s3 + $0x10] sm:$0xff]  }
 0x2ed   :  { %5816 = vmatprep.subr.bf16.mxu1 %v8312_v54  ;;  %v8374_v54 = vld [vmem:[%s11148_s3 + $0x50] sm:$0xff]  }
 0x2ef   :  { %5850 = vmatpush1.bf16.msra.mxu0 %v8313_v20  ;;  %v8377_v20 = vld [vmem:[%s11148_s3 + $0x8] sm:$0xff]  }
 0x2f0   :  { %5817 = vmatpush2.bf16.msra.mxu1 %v8310_v18  ;;  %5851 = vmatprep.subr.bf16.mxu0 %v8321_v28  ;;  %v8376_v18 = vld [vmem:[%s11148_s3 + $0x48] sm:$0xff]   ;;  %v8379_v28 = vld [vmem:[%s11148_s3] sm:$0xff]  }
 0x2f1   :  { %5818 = vmatprep.subr.bf16.mxu1 %v8318_v29  ;;  %v8378_v29 = vld [vmem:[%s11148_s3 + $0x40] sm:$0xff]  }
 0x2f3   :  { %5852 = vmatpush2.bf16.msra.mxu0 %v8319_v17 }
 0x2f4   :  { %5819 = vmatpush2.bf16.msra.mxu1 %v8316_v31  ;;  %5853 = vmatprep.subr.bf16.mxu0 %v8327_v36  ;;  %v5917_v31 = vmax.f32 %v10446_v16, 0.0  ;;  %v8383_v36 = vld [vmem:[%s11148_s3 + $0xb0] sm:$0xff]   ;;  %v8384_v16 = vld [vmem:[%s11148_s3 + $0xe8] sm:$0xff]  }
 0x2f5   :  { %5820 = vmatprep.subr.bf16.mxu1 %v8324_v30  ;;  %v8382_v30 = vld [vmem:[%s11148_s3 + $0xf0] sm:$0xff]  }
 0x2f6   :  { %v5921_v17 = vpack.c.bf16 %v5917_v31, %v5917_v31 }
 0x2f7   :  { %5854 = vmatpush2.bf16.msra.mxu0 %v8325_v25 }
 0x2f8   :  { %5821 = vmatpush2.bf16.msra.mxu1 %v8322_v32  ;;  %5855 = vmatprep.subr.bf16.mxu0 %v8333_v38 }
 0x2f9   :  { %5822 = vmatprep.subr.bf16.mxu1 %v8330_v33 }
 0x2fb   :  { %5856 = vmatpush2.bf16.msra.mxu0 %v8331_v61 }
 0x2fc   :  { %5823 = vmatpush2.bf16.msra.mxu1 %v8328_v47  ;;  %5857 = vmatprep.subr.bf16.mxu0 %v8339_v34  ;;  %v8385_v47 = vld [vmem:[%s11148_s3 + $0xa8] sm:$0xff]   ;;  %v8386_v34 = vld [vmem:[%s11148_s3 + $0xe0] sm:$0xff]  }
 0x2fd   :  { %5824 = vmatprep.subr.bf16.mxu1 %v8336_v51 }
 0x2ff   :  { %5858 = vmatpush2.bf16.msra.mxu0 %v8337_v22  ;;  %v8388_v22 = vld [vmem:[%s11148_s3 + $0xd8] sm:$0xff]  }
 0x300   :  { %5825 = vmatpush2.bf16.msra.mxu1 %v8334_v1  ;;  %5859 = vmatprep.subr.bf16.mxu0 %v8342_v23  ;;  %v8387_v1 = vld [vmem:[%s11148_s3 + $0xa0] sm:$0xff]   ;;  %v8389_v23 = vld [vmem:[%s11148_s3 + $0x98] sm:$0xff]  }
 0x301   :  { %5884 = vmatprep.subr.bf16.mxu1 %v8345_v41  ;;  %v8390_v41 = vld [vmem:[%s11148_s3 + $0xd0] sm:$0xff]  }
 0x303   :  { %v5582_v7 = vpop.f32.mrf.mxu1  ;;  %5827 = vmatmul.mubr.bf16.vlgmr.msra.gmra.mxu1 %v9770_v63  ;;  %5860 = vmatpush2.bf16.msra.mxu0 %v8340_v35  ;;  %v8357_v63 = vld [vmem:[%s11145_s1 + $0x182c] ss:$16 sps:$4 sm:$0xff]   ;;  %v8391_v35 = vld [vmem:[%s11148_s3 + $0x90] sm:$0xff]  }
 0x304   :  { %v5583_v10 = vadd.f32 %v5582_v7, %v10853_v50  ;;  %5885 = vmatpush1.bf16.msra.mxu1 %v8343_v44  ;;  %5861 = vmatprep.subr.bf16.mxu0 %v8348_v45  ;;  %v8392_v7 = vld [vmem:[%s11148_s3 + $0xc8] sm:$0xff]  }
 0x305   :  { %v5584_v48 = vpop.f32.mrf.mxu1  ;;  %5886 = vmatprep.subr.bf16.mxu1 %v8351_v46  ;;  %5908 = vmatprep.mubr.bf16.mxu1 %v8398_v21  ;;  %v8363_v21 = vld [vmem:[%s11145_s1 + $0x180c] ss:$16 sps:$4 sm:$0xff]  }
 0x306   :  { %v5585_v50 = vadd.f32 %v5584_v48, %v10867_v56  ;;  %v8358_v56 = vld [vmem:[%s11145_s1 + $0x1708] ss:$16 sps:$4 sm:$0xff]  }
 0x307   :  { %v5586_v37 = vpop.f32.mrf.mxu1  ;;  %5862 = vmatpush2.bf16.msra.mxu0 %v8346_v42  ;;  %v8393_v42 = vld [vmem:[%s11148_s3 + $0x88] sm:$0xff]  }
 0x308   :  { %5887 = vmatpush1.bf16.msra.mxu1 %v8349_v57  ;;  %5863 = vmatprep.subr.bf16.mxu0 %v8354_v49  ;;  %v8394_v49 = vld [vmem:[%s11148_s3 + $0xc0] sm:$0xff]  }
 0x309   :  { %v5587_v55 = vpop.f32.mrf.mxu1  ;;  %5888 = vmatprep.subr.bf16.mxu1 %v8357_v63  ;;  %v8395_v63 = vld [vmem:[%s11148_s3 + $0x80] sm:$0xff]  }
 0x30b   :  { %5864 = vmatpush2.bf16.msra.mxu0 %v8352_v52 }
 0x30c   :  { %5889 = vmatpush1.bf16.msra.mxu1 %v8355_v53  ;;  %5865 = vmatprep.subr.bf16.mxu0 %v8360_v62 }
 0x30d   :  { %5890 = vmatprep.subr.bf16.mxu1 %v8363_v21 }
 0x30f   :  { %5866 = vmatpush2.bf16.msra.mxu0 %v8358_v56 }
 0x310   :  { %5891 = vmatpush1.bf16.msra.mxu1 %v8361_v59  ;;  %7118 = vmatprep.subr.bf16.mxu0 %v8364_v15 }
 0x311   :  { %7140 = vmatprep.subr.bf16.mxu1 %v8380_v12 }
 0x312   :  { %v5623_v39 = vpop.f32.mrf.mxu0  ;;  %5868 = vmatmul.mubr.bf16.vlgmr.msra.gmra.mxu0 %v9774_v4 }
 0x313   :  { %7084 = vmatmul.mubr.msk.bf16.vlgmr.msra.gmra.mxu1 %vm4847_vm0, %v8397_v5  ;;  %v5624_v58 = vadd.f32 %v5623_v39, %v5583_v10  ;;  %7119 = vmatpush3.bf16.msra.mxu0 %v8365_v2 }
 0x314   :  { %6220 = vmatprep.mubr.bf16.mxu0 %v5922_v40  ;;  %v5625_v8 = vpop.f32.mrf.mxu0  ;;  %7120 = vmatprep.subr.bf16.mxu0 %v8366_v3 }
 0x315   :  { %v5626_v4 = vadd.f32 %v5625_v8, %v5585_v50  ;;  %7141 = vmatpush3.bf16.msra.mxu1 %v8381_v13 }
 0x316   :  { %v5627_v24 = vpop.f32.mrf.mxu0  ;;  %7142 = vmatprep.subr.bf16.mxu1 %v8382_v30 }
 0x317   :  { %7121 = vmatpush3.bf16.msra.mxu0 %v8367_v0 }
 0x318   :  { %v5628_v43 = vpop.f32.mrf.mxu0  ;;  %7122 = vmatprep.subr.bf16.mxu0 %v8368_v11 }
 0x319   :  { %7143 = vmatpush3.bf16.msra.mxu1 %v8383_v36  ;;  %v7085_v36 = vld [vmem:[%s11149_s4] ss:$0 sm:$0xff] }
 0x31a   :  { %7144 = vmatprep.subr.bf16.mxu1 %v8384_v16 }
 0x31b   :  { %7123 = vmatpush3.bf16.msra.mxu0 %v8369_v27 }
 0x31c   :  { %7124 = vmatprep.subr.bf16.mxu0 %v8370_v9 }
 0x31d   :  { %7145 = vmatpush3.bf16.msra.mxu1 %v8385_v47 }
 0x31e   :  { %7146 = vmatprep.subr.bf16.mxu1 %v8386_v34 }
 0x31f   :  { %7125 = vmatpush3.bf16.msra.mxu0 %v8371_v14 }
 0x320   :  { %7126 = vmatprep.subr.bf16.mxu0 %v8372_v6 }
 0x321   :  { %7147 = vmatpush3.bf16.msra.mxu1 %v8387_v1 }
 0x322   :  { %7148 = vmatprep.subr.bf16.mxu1 %v8388_v22 }
 0x323   :  { %7127 = vmatpush3.bf16.msra.mxu0 %v8373_v19 }
 0x324   :  { %7128 = vmatprep.subr.bf16.mxu0 %v8374_v54 }
 0x325   :  { %7149 = vmatpush3.bf16.msra.mxu1 %v8389_v23 }
 0x326   :  { %7150 = vmatprep.subr.bf16.mxu1 %v8390_v41 }
 0x327   :  { %7129 = vmatpush3.bf16.msra.mxu0 %v8375_v26 }
 0x328   :  { %7130 = vmatprep.subr.bf16.mxu0 %v8376_v18 }
 0x329   :  { %7151 = vmatpush3.bf16.msra.mxu1 %v8391_v35 }
 0x32a   :  { %7152 = vmatprep.subr.bf16.mxu1 %v8392_v7 }
 0x32b   :  { %7131 = vmatpush3.bf16.msra.mxu0 %v8377_v20 }
 0x32c   :  { %7132 = vmatprep.subr.bf16.mxu0 %v8378_v29 }
 0x32d   :  { %7153 = vmatpush3.bf16.msra.mxu1 %v8393_v42 }
 0x32e   :  { %7154 = vmatprep.subr.bf16.mxu1 %v8394_v49 }
 0x32f   :  { %7133 = vmatpush3.bf16.msra.mxu0 %v8379_v28 }
 0x331   :  { %7155 = vmatpush3.bf16.msra.mxu1 %v8395_v63 }
 0x332   :  { %6221 = vmatmul.mubr.bf16.vlgmr.msra.gmra.mxu0 %v5921_v17 }
 0x343   :  { %v5664_v32 = vpop.f32.mrf.mxu1 }
 0x344   :  { %v5665_v25 = vadd.f32 %v5664_v32, %v5624_v58 }
 0x345   :  { %v5666_v33 = vpop.f32.mrf.mxu1 }
 0x346   :  { %v5667_v38 = vadd.f32 %v5666_v33, %v5626_v4 }
 0x347   :  { %v5668_v61 = vpop.f32.mrf.mxu1 }
 0x349   :  { %v5669_v51 = vpop.f32.mrf.mxu1 }
 0x352   :  { %v5705_v44 = vpop.f32.mrf.mxu0 }
 0x353   :  { %v5706_v45 = vadd.f32 %v5705_v44, %v5665_v25 }
 0x354   :  { %v5707_v46 = vpop.f32.mrf.mxu0 }
 0x355   :  { %v5708_v10 = vadd.f32 %v5707_v46, %v5667_v38 }
 0x356   :  { %v5709_v57 = vpop.f32.mrf.mxu0 }
 0x358   :  { %v5710_v48 = vpop.f32.mrf.mxu0 }
 0x383   :  { %v5746_v50 = vpop.f32.mrf.mxu1 }
 0x384   :  { %v5747_v37 = vadd.f32 %v5746_v50, %v5706_v45 }
 0x385   :  { %v5748_v52 = vpop.f32.mrf.mxu1 }
 0x386   :  { %v5749_v53 = vadd.f32 %v5748_v52, %v5708_v10 }
 0x387   :  { %v5750_v55 = vpop.f32.mrf.mxu1 }
 0x389   :  { %v5751_v62 = vpop.f32.mrf.mxu1 }
 0x392   :  { %v5787_v21 = vpop.f32.mrf.mxu0 }
 0x393   :  { %v5788_v39 = vadd.f32 %v5787_v21, %v5747_v37 }
 0x394   :  { %v5789_v56 = vpop.f32.mrf.mxu0 }
 0x395   :  { %v5790_v5 = vadd.f32 %v5789_v56, %v5749_v53 }
 0x396   :  { %v5791_v59 = vpop.f32.mrf.mxu0 }
 0x398   :  { %v5792_v15 = vpop.f32.mrf.mxu0 }
 0x3c3   :  { %v5828_v60 = vpop.f32.mrf.mxu1 }
 0x3c4   :  { %v5829_v58 = vadd.f32 %v5828_v60, %v5788_v39 }
 0x3c5   :  { %v5830_v2 = vpop.f32.mrf.mxu1 }
 0x3c6   :  { %v5831_v11 = vadd.f32 %v5830_v2, %v5790_v5 }
 0x3c7   :  { %v5832_v3 = vpop.f32.mrf.mxu1 }
 0x3c9   :  { %v5833_v40 = vpop.f32.mrf.mxu1 }
 0x3d2   :  { %v5869_v0 = vpop.f32.mrf.mxu0 }
 0x3d3   :  { %v5910_v8 = vpop.f32.mrf.mxu1  ;;  %v5870_v4 = vadd.f32 %v5869_v0, %v5829_v58 }
 0x3d4   :  { %v5871_v24 = vpop.f32.mrf.mxu0 }
 0x3d5   :  { %v5912_v27 = vpop.f32.mrf.mxu1  ;;  %v5911_v43 = vadd.f32 %v5910_v8, %v5870_v4  ;;  %v5872_v9 = vadd.f32 %v5871_v24, %v5831_v11 }
 0x3d6   :  { %v5873_v12 = vpop.f32.mrf.mxu0 }
 0x3d7   :  { %v5914_v13 = vpop.f32.mrf.mxu1  ;;  %v5913_v14 = vadd.f32 %v5912_v27, %v5872_v9  ;;  %v5919_v6 = vmax.f32 %v5911_v43, 0.0 }
 0x3d8   :  { %v5874_v19 = vpop.f32.mrf.mxu0 }
 0x3d9   :  { %v5915_v54 = vpop.f32.mrf.mxu1  ;;  %v5920_v26 = vmax.f32 %v5913_v14, 0.0  ;;  %v5923_v20 = vpack.c.bf16 %v5919_v6, %v5919_v6 }
 0x3db   :  { %v5924_v18 = vpack.c.bf16 %v5920_v26, %v5920_v26 }
 0x3dd   :  { %6260 = vmatprep.mubr.bf16.mxu1 %v5924_v18 }
 0x3de   :  { %6261 = vmatmul.mubr.bf16.vlgmr.msra.gmra.mxu1 %v5923_v20 }
 0x3f2   :  { %v7134_v29 = vpop.f32.mrf.mxu0 }
 0x3f4   :  { %v7135_v28 = vpop.f32.mrf.mxu0 }
 0x3f5   :  { %v7136_v31 = vadd.f32 %v7135_v28, %v7134_v29 }
 0x3f6   :  { %v7137_v17 = vpop.f32.mrf.mxu0 }
 0x3f7   :  { %v6223_v33 = vadd.f32 %v7136_v31, %v7085_v36 }
 0x3f8   :  { %v7138_v30 = vpop.f32.mrf.mxu0 }
 0x49e   :  { %v7156_v32 = vpop.f32.mrf.mxu1 }
 0x4a0   :  { %v7157_v25 = vpop.f32.mrf.mxu1 }
 0x4a1   :  { %v7158_v16 = vadd.f32 %v7157_v25, %v7156_v32 }
 0x4a2   :  { %v7159_v38 = vpop.f32.mrf.mxu1 }
 0x4a3   :  { %v6263_v47 = vadd.f32 %v7158_v16, %v6223_v33 }
 0x4a4   :  { %v7160_v61 = vpop.f32.mrf.mxu1 }
 0x4a5   :  { %6269 = vst.msk [vmem:[%s11150_s5] sm:$0xff] %vm6268_vm1, %v6263_v47 }

</bundles_post_ra>
